<compile_context>
chip_gen: v6e
topology: v6e:2x2x1
jax: 0.10.0
libtpu: 0.0.40
codegen_flags: <defaults>
</compile_context>

<pallas_src>
import jax
import jax.numpy as jnp
from jax import lax
from jax.experimental import pallas as pl
from jax.experimental.pallas import tpu as pltpu


_TN = 1024      # point-axis chunk length (multiple of 128)
_BT_MAX = 4     # batch elements fused per grid step


def _split_chunks(n, tn):
    full = tuple((i * tn, tn) for i in range(n // tn))
    tail_start = (n // tn) * tn
    return full, tail_start, n - tail_start


def _pick_bt(b):
    for bt in range(min(b, _BT_MAX), 0, -1):
        if b % bt == 0:
            return bt
    return 1


def _vmem_limit_bytes(bt, n, weight_args):
    blk = bt * 6 * n * 4                                   # one (Bt,6,N) f32 block
    wbytes = sum(int(w.size) * w.dtype.itemsize for w in weight_args)
    pipelined = 2 * (2 * blk + wbytes)                     # double-buffered in+out blocks + params
    tn = min(_TN, n)
    work = (6 + 64 + 128 + 256 + 256 + 256) * tn * 4 * 2   # live chunk intermediates (+bf16 copies, slack)
    total = pipelined + work + (4 << 20)                   # headroom for spills / small tiles
    return int(min(max(total, 16 << 20), 48 << 20))        # cap keeps headroom even on v7x (64 MiB VMEM)


# ------------------------------- fused kernel -------------------------------

def _make_tnet_kernel(Bt, N, full_chunks, tail_start, tail_len):
    f32 = jnp.float32
    bf16 = jnp.bfloat16

    def kernel(pts_ref, w1, b1, w2, b2, w3, b3, w4, b4, w5, b5, w6, b6, out_ref):
        # Hoisted parameter loads (shared across the batch / chunk unrolls).
        W1, B1 = w1[...], b1[...]
        W2, B2 = w2[...], b2[...]
        W3, B3 = w3[...], b3[...]
        W4, B4 = w4[...], b4[...]
        W5, B5 = w5[...], b5[...]
        W6, B6 = w6[...], b6[...]

        def encode(x):  # (6, l) f32 -> (256, l) f32 ; bf16 MXU operands, f32 accumulate
            h = jnp.dot(W1, x.astype(bf16), preferred_element_type=f32)
            h = jnp.maximum(h + B1, 0.0)
            h = jnp.dot(W2, h.astype(bf16), preferred_element_type=f32)
            h = jnp.maximum(h + B2, 0.0)
            h = jnp.dot(W3, h.astype(bf16), preferred_element_type=f32)
            return jnp.maximum(h + B3, 0.0)

        # ---------- encoder + max-pool over points, per fused batch element ----------
        cols = []
        for b in range(Bt):
            run = None
            for s, l in full_chunks:            # equal-size chunks: running elementwise max (VPU)
                h = encode(pts_ref[b, :, s:s + l])
                run = h if run is None else jnp.maximum(run, h)
            pooled_b = None if run is None else jnp.max(run, axis=-1, keepdims=True)
            if tail_len:                        # ragged tail: reduce separately, fold in
                h = encode(pts_ref[b, :, tail_start:N])
                m = jnp.max(h, axis=-1, keepdims=True)
                pooled_b = m if pooled_b is None else jnp.maximum(pooled_b, m)
            cols.append(pooled_b)
        pooled = cols[0] if Bt == 1 else jnp.concatenate(cols, axis=1)      # (256, Bt)

        # ---------- decoder MLP, batched over the lane dim (f32) ----------
        h = jnp.maximum(jnp.dot(W4, pooled, preferred_element_type=f32) + B4, 0.0)  # (128, Bt)
        h = jnp.maximum(jnp.dot(W5, h, preferred_element_type=f32) + B5, 0.0)       # (64, Bt)
        f = jnp.dot(W6, h, preferred_element_type=f32) + B6                         # (6, Bt)

        # ---------- Gram-Schmidt f -> R, lane-parallel over the Bt batch elements ----------
        eps2 = 1e-24                                         # == (1e-12)**2, matches F.normalize eps
        f0, f1, f2 = f[0:1, :], f[1:2, :], f[2:3, :]
        f3, f4, f5 = f[3:4, :], f[4:5, :], f[5:6, :]
        inv_a = lax.rsqrt(jnp.maximum(f0 * f0 + f1 * f1 + f2 * f2, eps2))
        a0, a1, a2 = f0 * inv_a, f1 * inv_a, f2 * inv_a                     # r1
        proj = a0 * f3 + a1 * f4 + a2 * f5
        v0, v1, v2 = f3 - proj * a0, f4 - proj * a1, f5 - proj * a2
        inv_v = lax.rsqrt(jnp.maximum(v0 * v0 + v1 * v1 + v2 * v2, eps2))
        g0, g1, g2 = v0 * inv_v, v1 * inv_v, v2 * inv_v                     # r2
        c0 = a1 * g2 - a2 * g1                                              # r3 = r1 x r2
        c1 = a2 * g0 - a0 * g2
        c2 = a0 * g1 - a1 * g0

        all_chunks = list(full_chunks)
        if tail_len:
            all_chunks.append((tail_start, tail_len))

        # ---------- apply per-batch R: two (3,3)@(3,l) MXU matmuls, lane-dense stores ----------
        for b in range(Bt):
            Rb = jnp.concatenate(
                [jnp.concatenate([a0[:, b:b + 1], g0[:, b:b + 1], c0[:, b:b + 1]], axis=1),
                 jnp.concatenate([a1[:, b:b + 1], g1[:, b:b + 1], c1[:, b:b + 1]], axis=1),
                 jnp.concatenate([a2[:, b:b + 1], g2[:, b:b + 1], c2[:, b:b + 1]], axis=1)],
                axis=0)                                                     # (3,3), columns (r1,r2,r3)
            for s, l in all_chunks:
                seg = pts_ref[b, :, s:s + l]                                # (6, l) f32, single load
                out_ref[b, 0:3, s:s + l] = jnp.dot(
                    Rb, seg[0:3, :], preferred_element_type=f32).astype(out_ref.dtype)
                out_ref[b, 3:6, s:s + l] = jnp.dot(
                    Rb, seg[3:6, :], preferred_element_type=f32).astype(out_ref.dtype)

    return kernel


# --------------------------------- wrapper ----------------------------------

def tnet_forward(pts, params):
    B, C, N = pts.shape
    assert C == 6
    Bt = _pick_bt(B)
    full_chunks, tail_start, tail_len = _split_chunks(N, _TN)
    kernel = _make_tnet_kernel(Bt, N, full_chunks, tail_start, tail_len)

    # bf16 MXU operands for the encoder (cast on host); decoder / transform weights stay f32.
    weight_args = (params["w1"].astype(jnp.bfloat16), params["b1"],
                   params["w2"].astype(jnp.bfloat16), params["b2"],
                   params["w3"].astype(jnp.bfloat16), params["b3"],
                   params["w4"], params["b4"],
                   params["w5"], params["b5"],
                   params["w6"], params["b6"])

    in_specs = [pl.BlockSpec((Bt, 6, N), lambda g: (g, 0, 0))]
    in_specs += [pl.BlockSpec(w.shape, lambda g: (0, 0)) for w in weight_args]

    return pl.pallas_call(
        kernel,
        out_shape=jax.ShapeDtypeStruct((B, 6, N), pts.dtype),
        grid=(B // Bt,),
        in_specs=in_specs,
        out_specs=pl.BlockSpec((Bt, 6, N), lambda g: (g, 0, 0)),
        compiler_params=pltpu.CompilerParams(
            # Blocks of Bt batch elements are independent (megacore / 2-TC on v7x).
            # Note: with grid == 1 (B <= Bt) only one TC is used on v7x.
            dimension_semantics=("parallel",),
            vmem_limit_bytes=_vmem_limit_bytes(Bt, N, weight_args),
        ),
    )(pts, *weight_args)


# --------------------------- parameters & reference -------------------------

def init_params(key):
    ks = jax.random.split(key, 6)
    eps = 1e-5

    def fold_bn(k, cin, cout):
        kw, kg, kb, km, kv = jax.random.split(k, 5)
        w = jax.random.normal(kw, (cout, cin), jnp.float32) / jnp.sqrt(cin)
        gamma = jax.random.uniform(kg, (cout,), jnp.float32, 0.5, 1.5)
        beta = 0.1 * jax.random.normal(kb, (cout,), jnp.float32)
        mean = 0.1 * jax.random.normal(km, (cout,), jnp.float32)
        var = jax.random.uniform(kv, (cout,), jnp.float32, 0.5, 1.5)
        scale = gamma / jnp.sqrt(var + eps)
        return scale[:, None] * w, (beta - mean * scale)[:, None]

    w1, b1 = fold_bn(ks[0], 6, 64)
    w2, b2 = fold_bn(ks[1], 64, 128)
    w3, b3 = fold_bn(ks[2], 128, 256)
    w4, b4 = fold_bn(ks[3], 256, 128)
    w5, b5 = fold_bn(ks[4], 128, 64)
    kw6, kb6 = jax.random.split(ks[5], 2)
    bound = 1.0 / jnp.sqrt(64.0)
    w6 = jax.random.uniform(kw6, (6, 64), jnp.float32, -bound, bound)
    b6 = jax.random.uniform(kb6, (6, 1), jnp.float32, -bound, bound)

    return {"w1": w1, "b1": b1, "w2": w2, "b2": b2, "w3": w3, "b3": b3,
            "w4": w4, "b4": b4, "w5": w5, "b5": b5, "w6": w6, "b6": b6}


def _f2R(f):
    eps = 1e-12
    a, b = f[:, :3], f[:, 3:]
    r1 = a / jnp.maximum(jnp.linalg.norm(a, axis=1, keepdims=True), eps)
    proj = jnp.sum(r1 * b, axis=1, keepdims=True)
    v = b - proj * r1
    r2 = v / jnp.maximum(jnp.linalg.norm(v, axis=1, keepdims=True), eps)
    r3 = jnp.cross(r1, r2)
    return jnp.stack([r1, r2, r3], axis=2)                   # (B,3,3), columns r1, r2, r3


def tnet_ref(pts, params, encoder_matmul_dtype=jnp.float32):
    """Pure-JAX reference.  encoder_matmul_dtype=jnp.bfloat16 mirrors the kernel's
    mixed-precision policy (bf16 MXU operands, f32 accumulate) for a matched check."""
    P = jax.lax.Precision.HIGHEST

    def cbr(x, w, b):
        y = jnp.einsum("oc,bcn->bon", w.astype(encoder_matmul_dtype),
                       x.astype(encoder_matmul_dtype),
                       preferred_element_type=jnp.float32, precision=P)
        return jnp.maximum(y + b[None], 0.0)

    h = cbr(pts, params["w1"], params["b1"])
    h = cbr(h, params["w2"], params["b2"])
    h = cbr(h, params["w3"], params["b3"])
    pooled = jnp.max(h, axis=2)                                              # (B, 256)
    h = jnp.maximum(jnp.einsum("bc,oc->bo", pooled, params["w4"], precision=P)
                    + params["b4"][:, 0], 0.0)
    h = jnp.maximum(jnp.einsum("bc,oc->bo", h, params["w5"], precision=P)
                    + params["b5"][:, 0], 0.0)
    f = jnp.einsum("bc,oc->bo", h, params["w6"], precision=P) + params["b6"][:, 0]
    R = _f2R(f)
    pos = jnp.einsum("bij,bjn->bin", R, pts[:, :3, :], precision=P)
    nrm = jnp.einsum("bij,bjn->bin", R, pts[:, 3:, :], precision=P)
    return jnp.concatenate([pos, nrm], axis=1)


if __name__ == "__main__":
    key = jax.random.PRNGKey(0)
    kp, kx1, kx2 = jax.random.split(key, 3)
    params = init_params(kp)

    # Case 1: small canonical shape (single chunk, Bt == B, grid == 1).
    pts1 = jax.random.normal(kx1, (2, 6, 256), jnp.float32)
    out1 = jax.block_until_ready(tnet_forward(pts1, params))
    ref1 = tnet_ref(pts1, params, encoder_matmul_dtype=jnp.bfloat16)
    assert out1.shape == pts1.shape
    err1 = float(jnp.max(jnp.abs(out1 - ref1)))
    assert jnp.allclose(out1, ref1, rtol=2e-4, atol=2e-4), f"case1 max abs err {err1}"

    # Case 2: multi-chunk N (running-max path + ragged tail) and grid > 1 (B // Bt = 2 blocks).
    pts2 = jax.random.normal(kx2, (8, 6, 2200), jnp.float32)
    out2 = jax.block_until_ready(tnet_forward(pts2, params))
    ref2 = tnet_ref(pts2, params, encoder_matmul_dtype=jnp.bfloat16)
    assert out2.shape == pts2.shape
    err2 = float(jnp.max(jnp.abs(out2 - ref2)))
    assert jnp.allclose(out2, ref2, rtol=2e-4, atol=2e-4), f"case2 max abs err {err2}"

    print("KERNEL_OK")
</pallas_src>

<mosaic_0001>
module attributes {stable_mosaic.version = 11 : i64} {
  func.func @kernel(%arg0: i32, %arg1: memref<2x6x256xf32, #tpu.memory_space<vmem>>, %arg2: memref<64x6xbf16, #tpu.memory_space<vmem>>, %arg3: memref<64x1xf32, #tpu.memory_space<vmem>>, %arg4: memref<128x64xbf16, #tpu.memory_space<vmem>>, %arg5: memref<128x1xf32, #tpu.memory_space<vmem>>, %arg6: memref<256x128xbf16, #tpu.memory_space<vmem>>, %arg7: memref<256x1xf32, #tpu.memory_space<vmem>>, %arg8: memref<128x256xf32, #tpu.memory_space<vmem>>, %arg9: memref<128x1xf32, #tpu.memory_space<vmem>>, %arg10: memref<64x128xf32, #tpu.memory_space<vmem>>, %arg11: memref<64x1xf32, #tpu.memory_space<vmem>>, %arg12: memref<6x64xf32, #tpu.memory_space<vmem>>, %arg13: memref<6x1xf32, #tpu.memory_space<vmem>>, %arg14: memref<2x6x256xf32, #tpu.memory_space<vmem>>) attributes {dimension_semantics = [#tpu.dimension_semantics<parallel>], iteration_bounds = array<i64: 1>, scalar_prefetch = 0 : i64, scratch_operands = 0 : i64, tpu.core_type = #tpu.core_type<tc>, window_params = [{transform_indices = @transform_0, window_bounds = array<i64: 2, 6, 256>}, {pipeline_mode = #tpu.pipeline_mode<synchronous>, transform_indices = @transform_1, window_bounds = array<i64: 64, 6>}, {pipeline_mode = #tpu.pipeline_mode<synchronous>, transform_indices = @transform_2, window_bounds = array<i64: 64, 1>}, {pipeline_mode = #tpu.pipeline_mode<synchronous>, transform_indices = @transform_3, window_bounds = array<i64: 128, 64>}, {pipeline_mode = #tpu.pipeline_mode<synchronous>, transform_indices = @transform_4, window_bounds = array<i64: 128, 1>}, {pipeline_mode = #tpu.pipeline_mode<synchronous>, transform_indices = @transform_5, window_bounds = array<i64: 256, 128>}, {pipeline_mode = #tpu.pipeline_mode<synchronous>, transform_indices = @transform_6, window_bounds = array<i64: 256, 1>}, {pipeline_mode = #tpu.pipeline_mode<synchronous>, transform_indices = @transform_7, window_bounds = array<i64: 128, 256>}, {pipeline_mode = #tpu.pipeline_mode<synchronous>, transform_indices = @transform_8, window_bounds = array<i64: 128, 1>}, {pipeline_mode = #tpu.pipeline_mode<synchronous>, transform_indices = @transform_9, window_bounds = array<i64: 64, 128>}, {pipeline_mode = #tpu.pipeline_mode<synchronous>, transform_indices = @transform_10, window_bounds = array<i64: 64, 1>}, {pipeline_mode = #tpu.pipeline_mode<synchronous>, transform_indices = @transform_11, window_bounds = array<i64: 6, 64>}, {pipeline_mode = #tpu.pipeline_mode<synchronous>, transform_indices = @transform_12, window_bounds = array<i64: 6, 1>}, {transform_indices = @transform_13, window_bounds = array<i64: 2, 6, 256>}]} {
    %c0 = arith.constant 0 : index
    %c0_0 = arith.constant 0 : index
    %0 = vector.load %arg2[%c0, %c0_0] : memref<64x6xbf16, #tpu.memory_space<vmem>>, vector<64x6xbf16>
    %c0_1 = arith.constant 0 : index
    %c0_2 = arith.constant 0 : index
    %1 = vector.load %arg3[%c0_1, %c0_2] : memref<64x1xf32, #tpu.memory_space<vmem>>, vector<64x1xf32>
    %c0_3 = arith.constant 0 : index
    %c0_4 = arith.constant 0 : index
    %2 = vector.load %arg4[%c0_3, %c0_4] : memref<128x64xbf16, #tpu.memory_space<vmem>>, vector<128x64xbf16>
    %c0_5 = arith.constant 0 : index
    %c0_6 = arith.constant 0 : index
    %3 = vector.load %arg5[%c0_5, %c0_6] : memref<128x1xf32, #tpu.memory_space<vmem>>, vector<128x1xf32>
    %c0_7 = arith.constant 0 : index
    %c0_8 = arith.constant 0 : index
    %4 = vector.load %arg6[%c0_7, %c0_8] : memref<256x128xbf16, #tpu.memory_space<vmem>>, vector<256x128xbf16>
    %c0_9 = arith.constant 0 : index
    %c0_10 = arith.constant 0 : index
    %5 = vector.load %arg7[%c0_9, %c0_10] : memref<256x1xf32, #tpu.memory_space<vmem>>, vector<256x1xf32>
    %c0_11 = arith.constant 0 : index
    %c0_12 = arith.constant 0 : index
    %6 = vector.load %arg8[%c0_11, %c0_12] : memref<128x256xf32, #tpu.memory_space<vmem>>, vector<128x256xf32>
    %c0_13 = arith.constant 0 : index
    %c0_14 = arith.constant 0 : index
    %7 = vector.load %arg9[%c0_13, %c0_14] : memref<128x1xf32, #tpu.memory_space<vmem>>, vector<128x1xf32>
    %c0_15 = arith.constant 0 : index
    %c0_16 = arith.constant 0 : index
    %8 = vector.load %arg10[%c0_15, %c0_16] : memref<64x128xf32, #tpu.memory_space<vmem>>, vector<64x128xf32>
    %c0_17 = arith.constant 0 : index
    %c0_18 = arith.constant 0 : index
    %9 = vector.load %arg11[%c0_17, %c0_18] : memref<64x1xf32, #tpu.memory_space<vmem>>, vector<64x1xf32>
    %c0_19 = arith.constant 0 : index
    %c0_20 = arith.constant 0 : index
    %10 = vector.load %arg12[%c0_19, %c0_20] : memref<6x64xf32, #tpu.memory_space<vmem>>, vector<6x64xf32>
    %c0_21 = arith.constant 0 : index
    %c0_22 = arith.constant 0 : index
    %11 = vector.load %arg13[%c0_21, %c0_22] : memref<6x1xf32, #tpu.memory_space<vmem>>, vector<6x1xf32>
    %c0_23 = arith.constant 0 : index
    %c0_24 = arith.constant 0 : index
    %c0_25 = arith.constant 0 : index
    %12 = vector.load %arg1[%c0_23, %c0_24, %c0_25] : memref<2x6x256xf32, #tpu.memory_space<vmem>>, vector<1x6x256xf32>
    %13 = vector.shape_cast %12 : vector<1x6x256xf32> to vector<6x256xf32>
    %14 = arith.truncf %13 : vector<6x256xf32> to vector<6x256xbf16>
    %cst = arith.constant dense<0.000000e+00> : vector<64x256xf32>
    %15 = tpu.matmul %0, %14, %cst {dimension_numbers = #tpu.dot_dimension_numbers<[1], [0], [0], [1], [0, 0, 1, 1], [], []>} : vector<64x6xbf16>, vector<6x256xbf16>, vector<64x256xf32> -> vector<64x256xf32>
    %16 = vector.broadcast %1 : vector<64x1xf32> to vector<64x256xf32>
    %17 = arith.addf %15, %16 : vector<64x256xf32>
    %cst_26 = arith.constant 0.000000e+00 : f32
    %18 = vector.broadcast %cst_26 : f32 to vector<64x256xf32>
    %19 = arith.maximumf %17, %18 : vector<64x256xf32>
    %20 = arith.truncf %19 : vector<64x256xf32> to vector<64x256xbf16>
    %cst_27 = arith.constant dense<0.000000e+00> : vector<128x256xf32>
    %21 = tpu.matmul %2, %20, %cst_27 {dimension_numbers = #tpu.dot_dimension_numbers<[1], [0], [0], [1], [0, 0, 1, 1], [], []>} : vector<128x64xbf16>, vector<64x256xbf16>, vector<128x256xf32> -> vector<128x256xf32>
    %22 = vector.broadcast %3 : vector<128x1xf32> to vector<128x256xf32>
    %23 = arith.addf %21, %22 : vector<128x256xf32>
    %cst_28 = arith.constant 0.000000e+00 : f32
    %24 = vector.broadcast %cst_28 : f32 to vector<128x256xf32>
    %25 = arith.maximumf %23, %24 : vector<128x256xf32>
    %26 = arith.truncf %25 : vector<128x256xf32> to vector<128x256xbf16>
    %cst_29 = arith.constant dense<0.000000e+00> : vector<256x256xf32>
    %27 = tpu.matmul %4, %26, %cst_29 {dimension_numbers = #tpu.dot_dimension_numbers<[1], [0], [0], [1], [0, 0, 1, 1], [], []>} : vector<256x128xbf16>, vector<128x256xbf16>, vector<256x256xf32> -> vector<256x256xf32>
    %28 = vector.broadcast %5 : vector<256x1xf32> to vector<256x256xf32>
    %29 = arith.addf %27, %28 : vector<256x256xf32>
    %cst_30 = arith.constant 0.000000e+00 : f32
    %30 = vector.broadcast %cst_30 : f32 to vector<256x256xf32>
    %31 = arith.maximumf %29, %30 : vector<256x256xf32>
    %cst_31 = arith.constant dense<0xFF800000> : vector<256xf32>
    %32 = vector.multi_reduction <maximumf>, %31, %cst_31 [1] : vector<256x256xf32> to vector<256xf32>
    %33 = vector.shape_cast %32 : vector<256xf32> to vector<256x1xf32>
    %c1 = arith.constant 1 : index
    %c0_32 = arith.constant 0 : index
    %c0_33 = arith.constant 0 : index
    %34 = vector.load %arg1[%c1, %c0_32, %c0_33] : memref<2x6x256xf32, #tpu.memory_space<vmem>>, vector<1x6x256xf32>
    %35 = vector.shape_cast %34 : vector<1x6x256xf32> to vector<6x256xf32>
    %36 = arith.truncf %35 : vector<6x256xf32> to vector<6x256xbf16>
    %cst_34 = arith.constant dense<0.000000e+00> : vector<64x256xf32>
    %37 = tpu.matmul %0, %36, %cst_34 {dimension_numbers = #tpu.dot_dimension_numbers<[1], [0], [0], [1], [0, 0, 1, 1], [], []>} : vector<64x6xbf16>, vector<6x256xbf16>, vector<64x256xf32> -> vector<64x256xf32>
    %38 = vector.broadcast %1 : vector<64x1xf32> to vector<64x256xf32>
    %39 = arith.addf %37, %38 : vector<64x256xf32>
    %cst_35 = arith.constant 0.000000e+00 : f32
    %40 = vector.broadcast %cst_35 : f32 to vector<64x256xf32>
    %41 = arith.maximumf %39, %40 : vector<64x256xf32>
    %42 = arith.truncf %41 : vector<64x256xf32> to vector<64x256xbf16>
    %cst_36 = arith.constant dense<0.000000e+00> : vector<128x256xf32>
    %43 = tpu.matmul %2, %42, %cst_36 {dimension_numbers = #tpu.dot_dimension_numbers<[1], [0], [0], [1], [0, 0, 1, 1], [], []>} : vector<128x64xbf16>, vector<64x256xbf16>, vector<128x256xf32> -> vector<128x256xf32>
    %44 = vector.broadcast %3 : vector<128x1xf32> to vector<128x256xf32>
    %45 = arith.addf %43, %44 : vector<128x256xf32>
    %cst_37 = arith.constant 0.000000e+00 : f32
    %46 = vector.broadcast %cst_37 : f32 to vector<128x256xf32>
    %47 = arith.maximumf %45, %46 : vector<128x256xf32>
    %48 = arith.truncf %47 : vector<128x256xf32> to vector<128x256xbf16>
    %cst_38 = arith.constant dense<0.000000e+00> : vector<256x256xf32>
    %49 = tpu.matmul %4, %48, %cst_38 {dimension_numbers = #tpu.dot_dimension_numbers<[1], [0], [0], [1], [0, 0, 1, 1], [], []>} : vector<256x128xbf16>, vector<128x256xbf16>, vector<256x256xf32> -> vector<256x256xf32>
    %50 = vector.broadcast %5 : vector<256x1xf32> to vector<256x256xf32>
    %51 = arith.addf %49, %50 : vector<256x256xf32>
    %cst_39 = arith.constant 0.000000e+00 : f32
    %52 = vector.broadcast %cst_39 : f32 to vector<256x256xf32>
    %53 = arith.maximumf %51, %52 : vector<256x256xf32>
    %cst_40 = arith.constant dense<0xFF800000> : vector<256xf32>
    %54 = vector.multi_reduction <maximumf>, %53, %cst_40 [1] : vector<256x256xf32> to vector<256xf32>
    %55 = vector.shape_cast %54 : vector<256xf32> to vector<256x1xf32>
    %56 = tpu.concatenate %33, %55 in 1 : vector<256x1xf32>, vector<256x1xf32> -> vector<256x2xf32>
    %cst_41 = arith.constant dense<0.000000e+00> : vector<128x2xf32>
    %57 = tpu.matmul %6, %56, %cst_41 {dimension_numbers = #tpu.dot_dimension_numbers<[1], [0], [0], [1], [0, 0, 1, 1], [], []>} : vector<128x256xf32>, vector<256x2xf32>, vector<128x2xf32> -> vector<128x2xf32>
    %58 = vector.broadcast %7 : vector<128x1xf32> to vector<128x2xf32>
    %59 = arith.addf %57, %58 : vector<128x2xf32>
    %cst_42 = arith.constant 0.000000e+00 : f32
    %60 = vector.broadcast %cst_42 : f32 to vector<128x2xf32>
    %61 = arith.maximumf %59, %60 : vector<128x2xf32>
    %cst_43 = arith.constant dense<0.000000e+00> : vector<64x2xf32>
    %62 = tpu.matmul %8, %61, %cst_43 {dimension_numbers = #tpu.dot_dimension_numbers<[1], [0], [0], [1], [0, 0, 1, 1], [], []>} : vector<64x128xf32>, vector<128x2xf32>, vector<64x2xf32> -> vector<64x2xf32>
    %63 = vector.broadcast %9 : vector<64x1xf32> to vector<64x2xf32>
    %64 = arith.addf %62, %63 : vector<64x2xf32>
    %cst_44 = arith.constant 0.000000e+00 : f32
    %65 = vector.broadcast %cst_44 : f32 to vector<64x2xf32>
    %66 = arith.maximumf %64, %65 : vector<64x2xf32>
    %cst_45 = arith.constant dense<0.000000e+00> : vector<6x2xf32>
    %67 = tpu.matmul %10, %66, %cst_45 {dimension_numbers = #tpu.dot_dimension_numbers<[1], [0], [0], [1], [0, 0, 1, 1], [], []>} : vector<6x64xf32>, vector<64x2xf32>, vector<6x2xf32> -> vector<6x2xf32>
    %68 = vector.broadcast %11 : vector<6x1xf32> to vector<6x2xf32>
    %69 = arith.addf %67, %68 : vector<6x2xf32>
    %70 = vector.extract_strided_slice %69 {offsets = [0, 0], sizes = [1, 2], strides = [1, 1]} : vector<6x2xf32> to vector<1x2xf32>
    %71 = vector.extract_strided_slice %69 {offsets = [1, 0], sizes = [1, 2], strides = [1, 1]} : vector<6x2xf32> to vector<1x2xf32>
    %72 = vector.extract_strided_slice %69 {offsets = [2, 0], sizes = [1, 2], strides = [1, 1]} : vector<6x2xf32> to vector<1x2xf32>
    %73 = vector.extract_strided_slice %69 {offsets = [3, 0], sizes = [1, 2], strides = [1, 1]} : vector<6x2xf32> to vector<1x2xf32>
    %74 = vector.extract_strided_slice %69 {offsets = [4, 0], sizes = [1, 2], strides = [1, 1]} : vector<6x2xf32> to vector<1x2xf32>
    %75 = vector.extract_strided_slice %69 {offsets = [5, 0], sizes = [1, 2], strides = [1, 1]} : vector<6x2xf32> to vector<1x2xf32>
    %76 = arith.mulf %70, %70 : vector<1x2xf32>
    %77 = arith.mulf %71, %71 : vector<1x2xf32>
    %78 = arith.addf %76, %77 : vector<1x2xf32>
    %79 = arith.mulf %72, %72 : vector<1x2xf32>
    %80 = arith.addf %78, %79 : vector<1x2xf32>
    %cst_46 = arith.constant 1.000000e-24 : f32
    %81 = vector.broadcast %cst_46 : f32 to vector<1x2xf32>
    %82 = arith.maximumf %80, %81 : vector<1x2xf32>
    %83 = math.rsqrt %82 : vector<1x2xf32>
    %84 = arith.mulf %70, %83 : vector<1x2xf32>
    %85 = arith.mulf %71, %83 : vector<1x2xf32>
    %86 = arith.mulf %72, %83 : vector<1x2xf32>
    %87 = arith.mulf %84, %73 : vector<1x2xf32>
    %88 = arith.mulf %85, %74 : vector<1x2xf32>
    %89 = arith.addf %87, %88 : vector<1x2xf32>
    %90 = arith.mulf %86, %75 : vector<1x2xf32>
    %91 = arith.addf %89, %90 : vector<1x2xf32>
    %92 = arith.mulf %91, %84 : vector<1x2xf32>
    %93 = arith.subf %73, %92 : vector<1x2xf32>
    %94 = arith.mulf %91, %85 : vector<1x2xf32>
    %95 = arith.subf %74, %94 : vector<1x2xf32>
    %96 = arith.mulf %91, %86 : vector<1x2xf32>
    %97 = arith.subf %75, %96 : vector<1x2xf32>
    %98 = arith.mulf %93, %93 : vector<1x2xf32>
    %99 = arith.mulf %95, %95 : vector<1x2xf32>
    %100 = arith.addf %98, %99 : vector<1x2xf32>
    %101 = arith.mulf %97, %97 : vector<1x2xf32>
    %102 = arith.addf %100, %101 : vector<1x2xf32>
    %cst_47 = arith.constant 1.000000e-24 : f32
    %103 = vector.broadcast %cst_47 : f32 to vector<1x2xf32>
    %104 = arith.maximumf %102, %103 : vector<1x2xf32>
    %105 = math.rsqrt %104 : vector<1x2xf32>
    %106 = arith.mulf %93, %105 : vector<1x2xf32>
    %107 = arith.mulf %95, %105 : vector<1x2xf32>
    %108 = arith.mulf %97, %105 : vector<1x2xf32>
    %109 = arith.mulf %85, %108 : vector<1x2xf32>
    %110 = arith.mulf %86, %107 : vector<1x2xf32>
    %111 = arith.subf %109, %110 : vector<1x2xf32>
    %112 = arith.mulf %86, %106 : vector<1x2xf32>
    %113 = arith.mulf %84, %108 : vector<1x2xf32>
    %114 = arith.subf %112, %113 : vector<1x2xf32>
    %115 = arith.mulf %84, %107 : vector<1x2xf32>
    %116 = arith.mulf %85, %106 : vector<1x2xf32>
    %117 = arith.subf %115, %116 : vector<1x2xf32>
    %118 = vector.extract_strided_slice %84 {offsets = [0, 0], sizes = [1, 1], strides = [1, 1]} : vector<1x2xf32> to vector<1x1xf32>
    %119 = vector.extract_strided_slice %106 {offsets = [0, 0], sizes = [1, 1], strides = [1, 1]} : vector<1x2xf32> to vector<1x1xf32>
    %120 = vector.extract_strided_slice %111 {offsets = [0, 0], sizes = [1, 1], strides = [1, 1]} : vector<1x2xf32> to vector<1x1xf32>
    %121 = tpu.concatenate %118, %119, %120 in 1 : vector<1x1xf32>, vector<1x1xf32>, vector<1x1xf32> -> vector<1x3xf32>
    %122 = vector.extract_strided_slice %85 {offsets = [0, 0], sizes = [1, 1], strides = [1, 1]} : vector<1x2xf32> to vector<1x1xf32>
    %123 = vector.extract_strided_slice %107 {offsets = [0, 0], sizes = [1, 1], strides = [1, 1]} : vector<1x2xf32> to vector<1x1xf32>
    %124 = vector.extract_strided_slice %114 {offsets = [0, 0], sizes = [1, 1], strides = [1, 1]} : vector<1x2xf32> to vector<1x1xf32>
    %125 = tpu.concatenate %122, %123, %124 in 1 : vector<1x1xf32>, vector<1x1xf32>, vector<1x1xf32> -> vector<1x3xf32>
    %126 = vector.extract_strided_slice %86 {offsets = [0, 0], sizes = [1, 1], strides = [1, 1]} : vector<1x2xf32> to vector<1x1xf32>
    %127 = vector.extract_strided_slice %108 {offsets = [0, 0], sizes = [1, 1], strides = [1, 1]} : vector<1x2xf32> to vector<1x1xf32>
    %128 = vector.extract_strided_slice %117 {offsets = [0, 0], sizes = [1, 1], strides = [1, 1]} : vector<1x2xf32> to vector<1x1xf32>
    %129 = tpu.concatenate %126, %127, %128 in 1 : vector<1x1xf32>, vector<1x1xf32>, vector<1x1xf32> -> vector<1x3xf32>
    %130 = tpu.concatenate %121, %125, %129 in 0 : vector<1x3xf32>, vector<1x3xf32>, vector<1x3xf32> -> vector<3x3xf32>
    %c0_48 = arith.constant 0 : index
    %c0_49 = arith.constant 0 : index
    %c0_50 = arith.constant 0 : index
    %131 = vector.load %arg1[%c0_48, %c0_49, %c0_50] : memref<2x6x256xf32, #tpu.memory_space<vmem>>, vector<1x6x256xf32>
    %132 = vector.shape_cast %131 : vector<1x6x256xf32> to vector<6x256xf32>
    %133 = vector.extract_strided_slice %132 {offsets = [0, 0], sizes = [3, 256], strides = [1, 1]} : vector<6x256xf32> to vector<3x256xf32>
    %cst_51 = arith.constant dense<0.000000e+00> : vector<3x256xf32>
    %134 = tpu.matmul %130, %133, %cst_51 {dimension_numbers = #tpu.dot_dimension_numbers<[1], [0], [0], [1], [0, 0, 1, 1], [], []>} : vector<3x3xf32>, vector<3x256xf32>, vector<3x256xf32> -> vector<3x256xf32>
    %c0_52 = arith.constant 0 : index
    %c0_53 = arith.constant 0 : index
    %c0_54 = arith.constant 0 : index
    %135 = vector.load %arg14[%c0_52, %c0_53, %c0_54] : memref<2x6x256xf32, #tpu.memory_space<vmem>>, vector<1x3x256xf32>
    %136 = vector.shape_cast %135 : vector<1x3x256xf32> to vector<3x256xf32>
    %137 = vector.shape_cast %134 : vector<3x256xf32> to vector<1x3x256xf32>
    tpu.vector_store %arg14[%c0_52, %c0_53, %c0_54], %137 {strides = array<i32>} : memref<2x6x256xf32, #tpu.memory_space<vmem>>, vector<1x3x256xf32>,
    %138 = vector.extract_strided_slice %132 {offsets = [3, 0], sizes = [3, 256], strides = [1, 1]} : vector<6x256xf32> to vector<3x256xf32>
    %cst_55 = arith.constant dense<0.000000e+00> : vector<3x256xf32>
    %139 = tpu.matmul %130, %138, %cst_55 {dimension_numbers = #tpu.dot_dimension_numbers<[1], [0], [0], [1], [0, 0, 1, 1], [], []>} : vector<3x3xf32>, vector<3x256xf32>, vector<3x256xf32> -> vector<3x256xf32>
    %c0_56 = arith.constant 0 : index
    %c3 = arith.constant 3 : index
    %c0_57 = arith.constant 0 : index
    %140 = vector.load %arg14[%c0_56, %c3, %c0_57] : memref<2x6x256xf32, #tpu.memory_space<vmem>>, vector<1x3x256xf32>
    %141 = vector.shape_cast %140 : vector<1x3x256xf32> to vector<3x256xf32>
    %142 = vector.shape_cast %139 : vector<3x256xf32> to vector<1x3x256xf32>
    tpu.vector_store %arg14[%c0_56, %c3, %c0_57], %142 {strides = array<i32>} : memref<2x6x256xf32, #tpu.memory_space<vmem>>, vector<1x3x256xf32>,
    %143 = vector.extract_strided_slice %84 {offsets = [0, 1], sizes = [1, 1], strides = [1, 1]} : vector<1x2xf32> to vector<1x1xf32>
    %144 = vector.extract_strided_slice %106 {offsets = [0, 1], sizes = [1, 1], strides = [1, 1]} : vector<1x2xf32> to vector<1x1xf32>
    %145 = vector.extract_strided_slice %111 {offsets = [0, 1], sizes = [1, 1], strides = [1, 1]} : vector<1x2xf32> to vector<1x1xf32>
    %146 = tpu.concatenate %143, %144, %145 in 1 : vector<1x1xf32>, vector<1x1xf32>, vector<1x1xf32> -> vector<1x3xf32>
    %147 = vector.extract_strided_slice %85 {offsets = [0, 1], sizes = [1, 1], strides = [1, 1]} : vector<1x2xf32> to vector<1x1xf32>
    %148 = vector.extract_strided_slice %107 {offsets = [0, 1], sizes = [1, 1], strides = [1, 1]} : vector<1x2xf32> to vector<1x1xf32>
    %149 = vector.extract_strided_slice %114 {offsets = [0, 1], sizes = [1, 1], strides = [1, 1]} : vector<1x2xf32> to vector<1x1xf32>
    %150 = tpu.concatenate %147, %148, %149 in 1 : vector<1x1xf32>, vector<1x1xf32>, vector<1x1xf32> -> vector<1x3xf32>
    %151 = vector.extract_strided_slice %86 {offsets = [0, 1], sizes = [1, 1], strides = [1, 1]} : vector<1x2xf32> to vector<1x1xf32>
    %152 = vector.extract_strided_slice %108 {offsets = [0, 1], sizes = [1, 1], strides = [1, 1]} : vector<1x2xf32> to vector<1x1xf32>
    %153 = vector.extract_strided_slice %117 {offsets = [0, 1], sizes = [1, 1], strides = [1, 1]} : vector<1x2xf32> to vector<1x1xf32>
    %154 = tpu.concatenate %151, %152, %153 in 1 : vector<1x1xf32>, vector<1x1xf32>, vector<1x1xf32> -> vector<1x3xf32>
    %155 = tpu.concatenate %146, %150, %154 in 0 : vector<1x3xf32>, vector<1x3xf32>, vector<1x3xf32> -> vector<3x3xf32>
    %c1_58 = arith.constant 1 : index
    %c0_59 = arith.constant 0 : index
    %c0_60 = arith.constant 0 : index
    %156 = vector.load %arg1[%c1_58, %c0_59, %c0_60] : memref<2x6x256xf32, #tpu.memory_space<vmem>>, vector<1x6x256xf32>
    %157 = vector.shape_cast %156 : vector<1x6x256xf32> to vector<6x256xf32>
    %158 = vector.extract_strided_slice %157 {offsets = [0, 0], sizes = [3, 256], strides = [1, 1]} : vector<6x256xf32> to vector<3x256xf32>
    %cst_61 = arith.constant dense<0.000000e+00> : vector<3x256xf32>
    %159 = tpu.matmul %155, %158, %cst_61 {dimension_numbers = #tpu.dot_dimension_numbers<[1], [0], [0], [1], [0, 0, 1, 1], [], []>} : vector<3x3xf32>, vector<3x256xf32>, vector<3x256xf32> -> vector<3x256xf32>
    %c1_62 = arith.constant 1 : index
    %c0_63 = arith.constant 0 : index
    %c0_64 = arith.constant 0 : index
    %160 = vector.load %arg14[%c1_62, %c0_63, %c0_64] : memref<2x6x256xf32, #tpu.memory_space<vmem>>, vector<1x3x256xf32>
    %161 = vector.shape_cast %160 : vector<1x3x256xf32> to vector<3x256xf32>
    %162 = vector.shape_cast %159 : vector<3x256xf32> to vector<1x3x256xf32>
    tpu.vector_store %arg14[%c1_62, %c0_63, %c0_64], %162 {strides = array<i32>} : memref<2x6x256xf32, #tpu.memory_space<vmem>>, vector<1x3x256xf32>,
    %163 = vector.extract_strided_slice %157 {offsets = [3, 0], sizes = [3, 256], strides = [1, 1]} : vector<6x256xf32> to vector<3x256xf32>
    %cst_65 = arith.constant dense<0.000000e+00> : vector<3x256xf32>
    %164 = tpu.matmul %155, %163, %cst_65 {dimension_numbers = #tpu.dot_dimension_numbers<[1], [0], [0], [1], [0, 0, 1, 1], [], []>} : vector<3x3xf32>, vector<3x256xf32>, vector<3x256xf32> -> vector<3x256xf32>
    %c1_66 = arith.constant 1 : index
    %c3_67 = arith.constant 3 : index
    %c0_68 = arith.constant 0 : index
    %165 = vector.load %arg14[%c1_66, %c3_67, %c0_68] : memref<2x6x256xf32, #tpu.memory_space<vmem>>, vector<1x3x256xf32>
    %166 = vector.shape_cast %165 : vector<1x3x256xf32> to vector<3x256xf32>
    %167 = vector.shape_cast %164 : vector<3x256xf32> to vector<1x3x256xf32>
    tpu.vector_store %arg14[%c1_66, %c3_67, %c0_68], %167 {strides = array<i32>} : memref<2x6x256xf32, #tpu.memory_space<vmem>>, vector<1x3x256xf32>,
    return
  }
  func.func @transform_0(%arg0: i32) -> (i32, i32, i32) {
    %c0_i32 = arith.constant 0 : i32
    %c0_i32_0 = arith.constant 0 : i32
    %c0_i32_1 = arith.constant 0 : i32
    return %arg0, %c0_i32, %c0_i32_0 : i32, i32, i32
  }
  func.func @transform_1(%arg0: i32) -> (i32, i32) {
    %c0_i32 = arith.constant 0 : i32
    %c0_i32_0 = arith.constant 0 : i32
    %c0_i32_1 = arith.constant 0 : i32
    return %c0_i32, %c0_i32_0 : i32, i32
  }
  func.func @transform_2(%arg0: i32) -> (i32, i32) {
    %c0_i32 = arith.constant 0 : i32
    %c0_i32_0 = arith.constant 0 : i32
    %c0_i32_1 = arith.constant 0 : i32
    return %c0_i32, %c0_i32_0 : i32, i32
  }
  func.func @transform_3(%arg0: i32) -> (i32, i32) {
    %c0_i32 = arith.constant 0 : i32
    %c0_i32_0 = arith.constant 0 : i32
    %c0_i32_1 = arith.constant 0 : i32
    return %c0_i32, %c0_i32_0 : i32, i32
  }
  func.func @transform_4(%arg0: i32) -> (i32, i32) {
    %c0_i32 = arith.constant 0 : i32
    %c0_i32_0 = arith.constant 0 : i32
    %c0_i32_1 = arith.constant 0 : i32
    return %c0_i32, %c0_i32_0 : i32, i32
  }
  func.func @transform_5(%arg0: i32) -> (i32, i32) {
    %c0_i32 = arith.constant 0 : i32
    %c0_i32_0 = arith.constant 0 : i32
    %c0_i32_1 = arith.constant 0 : i32
    return %c0_i32, %c0_i32_0 : i32, i32
  }
  func.func @transform_6(%arg0: i32) -> (i32, i32) {
    %c0_i32 = arith.constant 0 : i32
    %c0_i32_0 = arith.constant 0 : i32
    %c0_i32_1 = arith.constant 0 : i32
    return %c0_i32, %c0_i32_0 : i32, i32
  }
  func.func @transform_7(%arg0: i32) -> (i32, i32) {
    %c0_i32 = arith.constant 0 : i32
    %c0_i32_0 = arith.constant 0 : i32
    %c0_i32_1 = arith.constant 0 : i32
    return %c0_i32, %c0_i32_0 : i32, i32
  }
  func.func @transform_8(%arg0: i32) -> (i32, i32) {
    %c0_i32 = arith.constant 0 : i32
    %c0_i32_0 = arith.constant 0 : i32
    %c0_i32_1 = arith.constant 0 : i32
    return %c0_i32, %c0_i32_0 : i32, i32
  }
  func.func @transform_9(%arg0: i32) -> (i32, i32) {
    %c0_i32 = arith.constant 0 : i32
    %c0_i32_0 = arith.constant 0 : i32
    %c0_i32_1 = arith.constant 0 : i32
    return %c0_i32, %c0_i32_0 : i32, i32
  }
  func.func @transform_10(%arg0: i32) -> (i32, i32) {
    %c0_i32 = arith.constant 0 : i32
    %c0_i32_0 = arith.constant 0 : i32
    %c0_i32_1 = arith.constant 0 : i32
    return %c0_i32, %c0_i32_0 : i32, i32
  }
  func.func @transform_11(%arg0: i32) -> (i32, i32) {
    %c0_i32 = arith.constant 0 : i32
    %c0_i32_0 = arith.constant 0 : i32
    %c0_i32_1 = arith.constant 0 : i32
    return %c0_i32, %c0_i32_0 : i32, i32
  }
  func.func @transform_12(%arg0: i32) -> (i32, i32) {
    %c0_i32 = arith.constant 0 : i32
    %c0_i32_0 = arith.constant 0 : i32
    %c0_i32_1 = arith.constant 0 : i32
    return %c0_i32, %c0_i32_0 : i32, i32
  }
  func.func @transform_13(%arg0: i32) -> (i32, i32, i32) {
    %c0_i32 = arith.constant 0 : i32
    %c0_i32_0 = arith.constant 0 : i32
    %c0_i32_1 = arith.constant 0 : i32
    return %arg0, %c0_i32, %c0_i32_0 : i32, i32, i32
  }
}

</mosaic_0001>

<bundles_post_ra>
// kernel: tpu_custom_call.1
= control target key start
LH: loop header
LB: loop body
LE: loop exit
PB: predicated region body
PF: predicated region fallthrough
CT: control target
= control target key end

     0   :  { %v4777_v0 = vmov 0   ;;  %vm300_vm0 = vcmask 1042432   ;;  %vm287_vm1 = vcmask 48128   ;;  %vm524_vm2 = vcmask 523264   ;;  %s3295_s24 = smov 1   ;;  %s3296_s25 = smov 2   ;;  %s4763_s2 = inlined_call_operand.vmem [shape: f32[64,1], index: 2, kind: input, shape index: {}]   ;;  %s4764_s0 = inlined_call_operand.vmem [shape: f32[2,6,256], index: 0, kind: input, shape index: {}]   ;;  %s4765_s1 = inlined_call_operand.vmem [shape: bf16[64,6], index: 1, kind: input, shape index: {}]   ;;  %s4766_s4 = inlined_call_operand.vmem [shape: f32[128,1], index: 4, kind: input, shape index: {}]   ;;  %s4767_s6 = inlined_call_operand.vmem [shape: f32[256,1], index: 6, kind: input, shape index: {}]   ;;  %s4768_s3 = inlined_call_operand.vmem [shape: bf16[128,64], index: 3, kind: input, shape index: {}]   ;;  %s4769_s5 = inlined_call_operand.vmem [shape: bf16[256,128], index: 5, kind: input, shape index: {}]   ;;  %s4770_s7 = inlined_call_operand.vmem [shape: f32[128,256], index: 7, kind: input, shape index: {}]   ;;  %s4771_s8 = inlined_call_operand.vmem [shape: f32[128,1], index: 8, kind: input, shape index: {}]   ;;  %s4772_s10 = inlined_call_operand.vmem [shape: f32[64,1], index: 10, kind: input, shape index: {}]   ;;  %s4773_s12 = inlined_call_operand.vmem [shape: f32[6,1], index: 12, kind: input, shape index: {}]   ;;  %s4774_s9 = inlined_call_operand.vmem [shape: f32[64,128], index: 9, kind: input, shape index: {}]   ;;  %s4775_s11 = inlined_call_operand.vmem [shape: f32[6,64], index: 11, kind: input, shape index: {}]   ;;  %s4776_s13 = inlined_call_operand.vmem [shape: f32[2,6,256], index: 13, kind: output, shape index: {}]  }
   0x1   :  { %3237 = vset.pattern.permute.xlu1 %v4777_v0  ;;  %3236 = vset.pattern.permute.xlu0 %v4777_v0  ;;  %v59_v1 = vld [vmem:[%s4763_s2 + $0x30] sm:$0xff]  ;;  %v57_v2 = vld [vmem:[%s4763_s2 + $0x20] sm:$0xff]  ;;  %v224_v3 = vld [vmem:[%s4764_s0 + $0x8] sm:$0x3f]  ;;  %vm1941_vm3 = vcmask 7168   ;;  %vm3293_vm4 = vmmov 0  }
   0x2   :  { %259 = vperm.xlu0 %3236, %v59_v1   ;;  %249 = vperm.xlu1 %3237, %v57_v2   ;;  %v226_v4 = vpack.c.bf16 %v224_v3, %v224_v3  ;;  %v223_v5 = vld [vmem:[%s4764_s0] sm:$0x3f]  ;;  %v60_v7 = vld [vmem:[%s4763_s2 + $0x38] sm:$0xff]  ;;  %v58_v8 = vld [vmem:[%s4763_s2 + $0x28] sm:$0xff]  ;;  %vm2563_vm5 = vcmask 15360   ;;  %vm2587_vm6 = vcmask 1040384  }
   0x3   :  { %v225_v6 = vpack.c.bf16 %v223_v5, %v223_v5  ;;  %339 = vmatprep.mubr.bf16.mxu0 %v4777_v0  ;;  %581 = vmatprep.mubr.bf16.mxu1 %v4777_v0  ;;  %v3394_v10 = vld [vmem:[%s4765_s1] sm:$0xff]   ;;  %v55_v11 = vld [vmem:[%s4763_s2 + $0x10] sm:$0xff]  ;;  %v56_v12 = vld [vmem:[%s4763_s2 + $0x18] sm:$0xff]  ;;  %vm2589_vm7 = vcmask 1041408   ;;  %vm2591_vm8 = vcmask 23552  }
   0x4   :  { %2967 = vmatprep.subr.msk.bf16.mxu0 %vm300_vm0, %v226_v4  ;;  %v53_v13 = vld [vmem:[%s4763_s2] sm:$0xff]  ;;  %v54_v14 = vld [vmem:[%s4763_s2 + $0x8] sm:$0xff]  ;;  %v91_v16 = vld [vmem:[%s4766_s4 + $0x70] sm:$0xff] }
   0x5   :  { %v302_v9 = vsel %vm300_vm0, %v225_v6, 0  ;;  %v3414_v15 = vld [vmem:[%s4765_s1 + $0x8] sm:$0xff]   ;;  %v92_v17 = vld [vmem:[%s4766_s4 + $0x78] sm:$0xff]  ;;  %v89_v18 = vld [vmem:[%s4766_s4 + $0x60] sm:$0xff] }
   0x6   :  { %322 = vmatpush1.bf16.msra.mxu0 %v302_v9  ;;  %264 = vperm.xlu0 %3236, %v60_v7   ;;  %v90_v19 = vld [vmem:[%s4766_s4 + $0x68] sm:$0xff]  ;;  %v3434_v20 = vld [vmem:[%s4765_s1 + $0x10] sm:$0xff]   ;;  %v88_v22 = vld [vmem:[%s4766_s4 + $0x58] sm:$0xff] }
   0x7   :  { %254 = vperm.xlu1 %3237, %v58_v8   ;;  %v87_v21 = vld [vmem:[%s4766_s4 + $0x50] sm:$0xff]  ;;  %v85_v23 = vld [vmem:[%s4766_s4 + $0x40] sm:$0xff]  ;;  %v86_v24 = vld [vmem:[%s4766_s4 + $0x48] sm:$0xff] }
   0x8   :  { %v3454_v25 = vld [vmem:[%s4765_s1 + $0x18] sm:$0xff]   ;;  %v83_v26 = vld [vmem:[%s4766_s4 + $0x30] sm:$0xff]  ;;  %v81_v28 = vld [vmem:[%s4766_s4 + $0x20] sm:$0xff] }
   0x9   :  { %2968 = vmatmul.mubr.msk.bf16.vlgmr.msra.gmra.mxu0 %vm287_vm1, %v3394_v10  ;;  %v84_v27 = vld [vmem:[%s4766_s4 + $0x38] sm:$0xff]  ;;  %v82_v29 = vld [vmem:[%s4766_s4 + $0x28] sm:$0xff]  ;;  %v79_v30 = vld [vmem:[%s4766_s4 + $0x10] sm:$0xff] }
   0xa   :  { %239 = vperm.xlu0 %3236, %v55_v11   ;;  %349 = vmatprep.mubr.bf16.mxu0 %v4777_v0  ;;  %v80_v31 = vld [vmem:[%s4766_s4 + $0x18] sm:$0xff]  ;;  %v77_v32 = vld [vmem:[%s4766_s4] sm:$0xff]  ;;  %v78_v33 = vld [vmem:[%s4766_s4 + $0x8] sm:$0xff] }
   0xb   :  { %244 = vperm.xlu1 %3237, %v56_v12   ;;  %v156_v34 = vld [vmem:[%s4767_s6 + $0xf8] sm:$0xff]  ;;  %v155_v36 = vld [vmem:[%s4767_s6 + $0xf0] sm:$0xff]  ;;  %v154_v38 = vld [vmem:[%s4767_s6 + $0xe8] sm:$0xff] }
   0xc   :  { %v140_v35 = vld [vmem:[%s4767_s6 + $0x78] sm:$0xff]  ;;  %v139_v37 = vld [vmem:[%s4767_s6 + $0x70] sm:$0xff]  ;;  %v138_v39 = vld [vmem:[%s4767_s6 + $0x68] sm:$0xff] }
   0xd   :  { %v153_v40 = vld [vmem:[%s4767_s6 + $0xe0] sm:$0xff]  ;;  %v152_v42 = vld [vmem:[%s4767_s6 + $0xd8] sm:$0xff]  ;;  %v151_v44 = vld [vmem:[%s4767_s6 + $0xd0] sm:$0xff] }
   0xe   :  { %229 = vperm.xlu0 %3236, %v53_v13   ;;  %v137_v41 = vld [vmem:[%s4767_s6 + $0x60] sm:$0xff]  ;;  %v136_v43 = vld [vmem:[%s4767_s6 + $0x58] sm:$0xff]  ;;  %v135_v45 = vld [vmem:[%s4767_s6 + $0x50] sm:$0xff] }
   0xf   :  { %234 = vperm.xlu1 %3237, %v54_v14   ;;  %v150_v46 = vld [vmem:[%s4767_s6 + $0xc8] sm:$0xff]  ;;  %v149_v48 = vld [vmem:[%s4767_s6 + $0xc0] sm:$0xff]  ;;  %v148_v50 = vld [vmem:[%s4767_s6 + $0xb8] sm:$0xff] }
  0x10   :  { %v134_v47 = vld [vmem:[%s4767_s6 + $0x48] sm:$0xff]  ;;  %v133_v49 = vld [vmem:[%s4767_s6 + $0x40] sm:$0xff]  ;;  %v132_v51 = vld [vmem:[%s4767_s6 + $0x38] sm:$0xff] }
  0x11   :  { %2969 = vmatmul.mubr.msk.bf16.gmra.mxu0 %vm287_vm1, %v3414_v15  ;;  %v147_v52 = vld [vmem:[%s4767_s6 + $0xb0] sm:$0xff]  ;;  %v146_v54 = vld [vmem:[%s4767_s6 + $0xa8] sm:$0xff]  ;;  %v145_v56 = vld [vmem:[%s4767_s6 + $0xa0] sm:$0xff] }
  0x12   :  { %476 = vperm.xlu0 %3236, %v91_v16   ;;  %359 = vmatprep.mubr.bf16.mxu0 %v4777_v0  ;;  %v131_v53 = vld [vmem:[%s4767_s6 + $0x30] sm:$0xff]  ;;  %v130_v55 = vld [vmem:[%s4767_s6 + $0x28] sm:$0xff]  ;;  %v129_v57 = vld [vmem:[%s4767_s6 + $0x20] sm:$0xff] }
  0x13   :  { %481 = vperm.xlu1 %3237, %v92_v17   ;;  %v144_v58 = vld [vmem:[%s4767_s6 + $0x98] sm:$0xff]  ;;  %v143_v60 = vld [vmem:[%s4767_s6 + $0x90] sm:$0xff]  ;;  %v142_v62 = vld [vmem:[%s4767_s6 + $0x88] sm:$0xff] }
  0x14   :  { %v128_v59 = vld [vmem:[%s4767_s6 + $0x18] sm:$0xff]  ;;  %v127_v61 = vld [vmem:[%s4767_s6 + $0x10] sm:$0xff]  ;;  %v126_v63 = vld [vmem:[%s4767_s6 + $0x8] sm:$0xff] }
  0x15   :  { %v141_v1 = vld [vmem:[%s4767_s6 + $0x80] sm:$0xff] }
  0x16   :  { %466 = vperm.xlu0 %3236, %v89_v18   ;;  %v125_v2 = vld [vmem:[%s4767_s6] sm:$0xff] }
  0x17   :  { %471 = vperm.xlu1 %3237, %v90_v19  }
  0x19   :  { %2970 = vmatmul.mubr.msk.bf16.gmra.mxu0 %vm287_vm1, %v3434_v20 }
  0x1a   :  { %456 = vperm.xlu0 %3236, %v87_v21   ;;  %369 = vmatprep.mubr.bf16.mxu0 %v4777_v0 }
  0x1b   :  { %461 = vperm.xlu1 %3237, %v88_v22  }
  0x1e   :  { %446 = vperm.xlu0 %3236, %v85_v23  }
  0x1f   :  { %451 = vperm.xlu1 %3237, %v86_v24  }
  0x21   :  { %2971 = vmatmul.mubr.msk.bf16.gmra.mxu0 %vm287_vm1, %v3454_v25 }
  0x22   :  { %436 = vperm.xlu0 %3236, %v83_v26   ;;  %998 = vmatprep.mubr.bf16.mxu0 %v4777_v0 }
  0x23   :  { %441 = vperm.xlu1 %3237, %v84_v27  }
  0x26   :  { %426 = vperm.xlu0 %3236, %v81_v28  }
  0x27   :  { %431 = vperm.xlu1 %3237, %v82_v29  }
  0x2a   :  { %416 = vperm.xlu0 %3236, %v79_v30  }
  0x2b   :  { %421 = vperm.xlu1 %3237, %v80_v31  }
  0x2e   :  { %406 = vperm.xlu0 %3236, %v77_v32  }
  0x2f   :  { %411 = vperm.xlu1 %3237, %v78_v33  }
  0x32   :  { %867 = vperm.xlu0 %3236, %v156_v34  }
  0x33   :  { %787 = vperm.xlu1 %3237, %v140_v35  }
  0x36   :  { %862 = vperm.xlu0 %3236, %v155_v36  }
  0x37   :  { %782 = vperm.xlu1 %3237, %v139_v37  }
  0x3a   :  { %857 = vperm.xlu0 %3236, %v154_v38  }
  0x3b   :  { %777 = vperm.xlu1 %3237, %v138_v39  }
  0x3e   :  { %852 = vperm.xlu0 %3236, %v153_v40  }
  0x3f   :  { %772 = vperm.xlu1 %3237, %v137_v41  }
  0x42   :  { %847 = vperm.xlu0 %3236, %v152_v42  }
  0x43   :  { %767 = vperm.xlu1 %3237, %v136_v43  }
  0x46   :  { %842 = vperm.xlu0 %3236, %v151_v44  }
  0x47   :  { %762 = vperm.xlu1 %3237, %v135_v45  }
  0x4a   :  { %837 = vperm.xlu0 %3236, %v150_v46  }
  0x4b   :  { %757 = vperm.xlu1 %3237, %v134_v47  }
  0x4e   :  { %832 = vperm.xlu0 %3236, %v149_v48  }
  0x4f   :  { %752 = vperm.xlu1 %3237, %v133_v49  }
  0x52   :  { %827 = vperm.xlu0 %3236, %v148_v50  }
  0x53   :  { %747 = vperm.xlu1 %3237, %v132_v51  }
  0x56   :  { %822 = vperm.xlu0 %3236, %v147_v52  }
  0x57   :  { %742 = vperm.xlu1 %3237, %v131_v53  }
  0x5a   :  { %817 = vperm.xlu0 %3236, %v146_v54  }
  0x5b   :  { %737 = vperm.xlu1 %3237, %v130_v55  }
  0x5e   :  { %812 = vperm.xlu0 %3236, %v145_v56  }
  0x5f   :  { %732 = vperm.xlu1 %3237, %v129_v57  }
  0x62   :  { %807 = vperm.xlu0 %3236, %v144_v58  }
  0x63   :  { %727 = vperm.xlu1 %3237, %v128_v59  }
  0x66   :  { %802 = vperm.xlu0 %3236, %v143_v60  }
  0x67   :  { %722 = vperm.xlu1 %3237, %v127_v61  }
  0x6a   :  { %797 = vperm.xlu0 %3236, %v142_v62  }
  0x6b   :  { %717 = vperm.xlu1 %3237, %v126_v63  }
  0x6e   :  { %792 = vperm.xlu0 %3236, %v141_v1  }
  0x6f   :  { %712 = vperm.xlu1 %3237, %v125_v2  }
  0x7d   :  { %v3579_v13 = vpop.permute.xlu1 %249  ;;  %v3581_v16 = vpop.permute.xlu0 %259 }
  0x7e   :  { %4848 = vst [vmem:[#allocation2_spill] sm:$0xff] %v3579_v13  ;;  %4849 = vst [vmem:[#allocation3_spill] sm:$0xff] %v3581_v16 }
  0x81   :  { %v3585_v22 = vpop.permute.xlu0 %264 }
  0x82   :  { %v3583_v19 = vpop.permute.xlu1 %254  ;;  %4851 = vst [vmem:[#allocation5_spill] sm:$0xff] %v3585_v22 }
  0x83   :  { %4850 = vst [vmem:[#allocation4_spill] sm:$0xff] %v3583_v19 }
  0x85   :  { %v3595_v34 = vpop.permute.xlu0 %239 }
  0x86   :  { %v3590_v29 = vpop.permute.xlu1 %244  ;;  %4853 = vst [vmem:[#allocation7_spill] sm:$0xff] %v3595_v34 }
  0x87   :  { %4852 = vst [vmem:[#allocation6_spill] sm:$0xff] %v3590_v29 }
  0x89   :  { %v3605_v53 = vpop.permute.xlu0 %229 }
  0x8a   :  { %v3601_v46 = vpop.permute.xlu1 %234  ;;  %4855 = vst [vmem:[#allocation9_spill] sm:$0xff] %v3605_v53 }
  0x8b   :  { %4854 = vst [vmem:[#allocation8_spill] sm:$0xff] %v3601_v46 }
  0xc9   :  { %v341_v3 = vpop.f32.mrf.mxu0 }
  0xca   :  { %v342_v63 = vadd.f32 %v341_v3, %v3605_v53  ;;  %v3243_v3 = vld [vmem:[%s4768_s3 + $0x8] sm:$0xff]  }
  0xcb   :  { %v343_v4 = vpop.f32.mrf.mxu0 }
  0xcc   :  { %v344_v56 = vadd.f32 %v343_v4, %v3605_v53 }
  0xcd   :  { %v345_v5 = vpop.f32.mrf.mxu0 }
  0xce   :  { %v346_v58 = vadd.f32 %v345_v5, %v3601_v46  ;;  %v381_v2 = vmax.f32 %v344_v56, 0.0  ;;  %v3614_v5 = vld [vmem:[%s4768_s3] sm:$0xff]  }
  0xcf   :  { %v347_v6 = vpop.f32.mrf.mxu0  ;;  %4856 = vst [vmem:[#allocation10_spill] sm:$0xff] %v3614_v5 }
  0xd0   :  { %v348_v50 = vadd.f32 %v347_v6, %v3601_v46  ;;  %v382_v6 = vmax.f32 %v346_v58, 0.0 }
  0xd1   :  { %v351_v7 = vpop.f32.mrf.mxu0 }
  0xd2   :  { %v352_v54 = vadd.f32 %v351_v7, %v3595_v34  ;;  %v383_v61 = vmax.f32 %v348_v50, 0.0 }
  0xd3   :  { %v353_v8 = vpop.f32.mrf.mxu0 }
  0xd4   :  { %v354_v43 = vadd.f32 %v353_v8, %v3595_v34  ;;  %v384_v1 = vmax.f32 %v352_v54, 0.0  ;;  %v397_v8 = vpack.c.bf16 %v383_v61, %v381_v2 }
  0xd5   :  { %v355_v9 = vpop.f32.mrf.mxu0 }
  0xd6   :  { %v356_v47 = vadd.f32 %v355_v9, %v3590_v29  ;;  %v385_v57 = vmax.f32 %v354_v43, 0.0  ;;  %v380_v9 = vmax.f32 %v342_v63, 0.0 }
  0xd7   :  { %v357_v11 = vpop.f32.mrf.mxu0 }
  0xd8   :  { %v358_v37 = vadd.f32 %v357_v11, %v3590_v29  ;;  %v386_v59 = vmax.f32 %v356_v47, 0.0  ;;  %v396_v4 = vpack.c.bf16 %v382_v6, %v380_v9  ;;  %v3244_v11 = vld [vmem:[%s4768_s3 + $0x10] sm:$0xff]  }
  0xd9   :  { %v361_v12 = vpop.f32.mrf.mxu0 }
  0xda   :  { %v362_v41 = vadd.f32 %v361_v12, %v3579_v13  ;;  %v387_v51 = vmax.f32 %v358_v37, 0.0  ;;  %v398_v7 = vpack.c.bf16 %v386_v59, %v384_v1  ;;  %v3245_v12 = vld [vmem:[%s4768_s3 + $0x18] sm:$0xff]  }
  0xdb   :  { %v363_v14 = vpop.f32.mrf.mxu0 }
  0xdc   :  { %v364_v32 = vadd.f32 %v363_v14, %v3579_v13  ;;  %v388_v55 = vmax.f32 %v362_v41, 0.0  ;;  %v399_v62 = vpack.c.bf16 %v387_v51, %v385_v57  ;;  %v3246_v14 = vld [vmem:[%s4768_s3 + $0x20] sm:$0xff]  }
  0xdd   :  { %v365_v17 = vpop.f32.mrf.mxu0 }
  0xde   :  { %v366_v35 = vadd.f32 %v365_v17, %v3583_v19  ;;  %v389_v44 = vmax.f32 %v364_v32, 0.0  ;;  %v3247_v17 = vld [vmem:[%s4768_s3 + $0x28] sm:$0xff]  }
  0xdf   :  { %v367_v18 = vpop.f32.mrf.mxu0 }
  0xe0   :  { %v368_v26 = vadd.f32 %v367_v18, %v3583_v19  ;;  %v390_v48 = vmax.f32 %v366_v35, 0.0  ;;  %v3248_v18 = vld [vmem:[%s4768_s3 + $0x30] sm:$0xff]  }
  0xe1   :  { %v371_v21 = vpop.f32.mrf.mxu0 }
  0xe2   :  { %v372_v30 = vadd.f32 %v371_v21, %v3581_v16  ;;  %v391_v38 = vmax.f32 %v368_v26, 0.0  ;;  %v400_v60 = vpack.c.bf16 %v390_v48, %v388_v55  ;;  %v3249_v21 = vld [vmem:[%s4768_s3 + $0x38] sm:$0xff]  }
  0xe3   :  { %v373_v23 = vpop.f32.mrf.mxu0 }
  0xe4   :  { %v374_v27 = vadd.f32 %v373_v23, %v3581_v16  ;;  %v392_v42 = vmax.f32 %v372_v30, 0.0  ;;  %v401_v52 = vpack.c.bf16 %v391_v38, %v389_v44  ;;  %v3654_v23 = vpop.permute.xlu0 %476 }
  0xe5   :  { %v375_v24 = vpop.f32.mrf.mxu0  ;;  %4857 = vst [vmem:[#allocation11_spill] sm:$0xff] %v3654_v23 }
  0xe6   :  { %v376_v28 = vadd.f32 %v375_v24, %v3585_v22  ;;  %v393_v39 = vmax.f32 %v374_v27, 0.0  ;;  %v3656_v24 = vpop.permute.xlu1 %481 }
  0xe7   :  { %v377_v31 = vpop.f32.mrf.mxu0 }
  0xe8   :  { %v378_v33 = vadd.f32 %v377_v31, %v3585_v22  ;;  %v394_v36 = vmax.f32 %v376_v28, 0.0  ;;  %v3658_v26 = vpop.permute.xlu0 %466 }
  0xea   :  { %v395_v40 = vmax.f32 %v378_v33, 0.0  ;;  %v402_v49 = vpack.c.bf16 %v394_v36, %v392_v42  ;;  %v3660_v27 = vpop.permute.xlu1 %471 }
  0xec   :  { %v403_v45 = vpack.c.bf16 %v395_v40, %v393_v39  ;;  %v3662_v28 = vpop.permute.xlu0 %456 }
  0xed   :  { %4858 = vst [vmem:[#allocation12_spill] sm:$0xff] %v3662_v28 }
  0xee   :  { %557 = vmatprep.subr.bf16.mxu1 %v403_v45  ;;  %v3664_v30 = vpop.permute.xlu1 %461 }
  0xef   :  { %558 = vmatpush1.bf16.msra.mxu1 %v402_v49 }
  0xf0   :  { %559 = vmatprep.subr.bf16.mxu1 %v401_v52  ;;  %v3666_v31 = vpop.permute.xlu0 %446 }
  0xf1   :  { %4859 = vst [vmem:[#allocation13_spill] sm:$0xff] %v3666_v31 }
  0xf2   :  { %v3668_v32 = vpop.permute.xlu1 %451 }
  0xf3   :  { %560 = vmatpush1.bf16.msra.mxu1 %v400_v60  ;;  %4860 = vst [vmem:[#allocation14_spill] sm:$0xff] %v3668_v32 }
  0xf4   :  { %561 = vmatprep.subr.bf16.mxu1 %v399_v62  ;;  %v3670_v33 = vpop.permute.xlu0 %436 }
  0xf5   :  { %4861 = vst [vmem:[#allocation15_spill] sm:$0xff] %v3670_v33 }
  0xf6   :  { %v3672_v35 = vpop.permute.xlu1 %441 }
  0xf7   :  { %562 = vmatpush1.bf16.msra.mxu1 %v398_v7  ;;  %4862 = vst [vmem:[#allocation16_spill] sm:$0xff] %v3672_v35 }
  0xf8   :  { %563 = vmatprep.subr.bf16.mxu1 %v397_v8  ;;  %v3674_v36 = vpop.permute.xlu0 %426 }
  0xf9   :  { %4863 = vst [vmem:[#allocation17_spill] sm:$0xff] %v3674_v36 }
  0xfa   :  { %v3676_v37 = vpop.permute.xlu1 %431 }
  0xfb   :  { %564 = vmatpush1.bf16.msra.mxu1 %v396_v4  ;;  %4864 = vst [vmem:[#allocation18_spill] sm:$0xff] %v3676_v37 }
  0xfc   :  { %v3678_v38 = vpop.permute.xlu0 %416 }
  0xfe   :  { %2980 = vmatmul.mubr.msk.bf16.vlgmr.msra.gmra.mxu1 %vm524_vm2, %v3614_v5  ;;  %v3680_v39 = vpop.permute.xlu1 %421 }
  0xff   :  { %591 = vmatprep.mubr.bf16.mxu1 %v4777_v0 }
 0x100   :  { %v3682_v41 = vpop.permute.xlu0 %406 }
 0x102   :  { %v3687_v44 = vpop.permute.xlu1 %411 }
 0x106   :  { %2981 = vmatmul.mubr.msk.bf16.gmra.mxu1 %vm524_vm2, %v3243_v3 }
 0x107   :  { %601 = vmatprep.mubr.bf16.mxu1 %v4777_v0 }
 0x10e   :  { %2982 = vmatmul.mubr.msk.bf16.gmra.mxu1 %vm524_vm2, %v3244_v11 }
 0x10f   :  { %611 = vmatprep.mubr.bf16.mxu1 %v4777_v0 }
 0x116   :  { %2983 = vmatmul.mubr.msk.bf16.gmra.mxu1 %vm524_vm2, %v3245_v12 }
 0x117   :  { %621 = vmatprep.mubr.bf16.mxu1 %v4777_v0 }
 0x11e   :  { %2984 = vmatmul.mubr.msk.bf16.gmra.mxu1 %vm524_vm2, %v3246_v14 }
 0x11f   :  { %631 = vmatprep.mubr.bf16.mxu1 %v4777_v0 }
 0x126   :  { %2985 = vmatmul.mubr.msk.bf16.gmra.mxu1 %vm524_vm2, %v3247_v17 }
 0x127   :  { %641 = vmatprep.mubr.bf16.mxu1 %v4777_v0 }
 0x12e   :  { %2986 = vmatmul.mubr.msk.bf16.gmra.mxu1 %vm524_vm2, %v3248_v18 }
 0x12f   :  { %651 = vmatprep.mubr.bf16.mxu1 %v4777_v0 }
 0x136   :  { %2987 = vmatmul.mubr.msk.bf16.gmra.mxu1 %vm524_vm2, %v3249_v21 }
 0x137   :  { %1148 = vmatprep.mubr.bf16.mxu1 %v4777_v0 }
 0x1be   :  { %v583_v40 = vpop.f32.mrf.mxu1 }
 0x1bf   :  { %v584_v43 = vadd.f32 %v583_v40, %v3682_v41 }
 0x1c0   :  { %v3684_v42 = vpop.f32.mrf.mxu1 }
 0x1c1   :  { %v662_v49 = vmax.f32 %v584_v43, 0.0 }
 0x1c2   :  { %v587_v45 = vpop.f32.mrf.mxu1 }
 0x1c3   :  { %v588_v47 = vadd.f32 %v587_v45, %v3687_v44 }
 0x1c4   :  { %v3690_v48 = vpop.f32.mrf.mxu1 }
 0x1c5   :  { %v664_v50 = vmax.f32 %v588_v47, 0.0 }
 0x1c6   :  { %v593_v51 = vpop.f32.mrf.mxu1 }
 0x1c7   :  { %v3692_v52 = vpack.c.bf16 %v664_v50, %v662_v49  ;;  %v594_v55 = vadd.f32 %v593_v51, %v3678_v38 }
 0x1c8   :  { %v3694_v54 = vpop.f32.mrf.mxu1 }
 0x1c9   :  { %v666_v59 = vmax.f32 %v594_v55, 0.0 }
 0x1ca   :  { %v597_v56 = vpop.f32.mrf.mxu1 }
 0x1cb   :  { %v598_v57 = vadd.f32 %v597_v56, %v3680_v39 }
 0x1cc   :  { %v3698_v58 = vpop.f32.mrf.mxu1 }
 0x1cd   :  { %v668_v60 = vmax.f32 %v598_v57, 0.0 }
 0x1ce   :  { %v3700_v61 = vpop.f32.mrf.mxu1 }
 0x1cf   :  { %v3702_v62 = vpack.c.bf16 %v668_v60, %v666_v59 }
 0x1d0   :  { %v3704_v63 = vpop.f32.mrf.mxu1 }
 0x1d2   :  { %v3706_v1 = vpop.f32.mrf.mxu1 }
 0x1d4   :  { %v3708_v2 = vpop.f32.mrf.mxu1 }
 0x1d6   :  { %v3710_v6 = vpop.f32.mrf.mxu1 }
 0x1d8   :  { %v615_v7 = vpop.f32.mrf.mxu1 }
 0x1da   :  { %v3712_v8 = vpop.f32.mrf.mxu1 }
 0x1dc   :  { %v619_v9 = vpop.f32.mrf.mxu1 }
 0x1de   :  { %v623_v4 = vpop.f32.mrf.mxu1 }
 0x1e0   :  { %v625_v3 = vpop.f32.mrf.mxu1 }
 0x1e2   :  { %v627_v11 = vpop.f32.mrf.mxu1 }
 0x1e4   :  { %v629_v12 = vpop.f32.mrf.mxu1 }
 0x1e6   :  { %v633_v14 = vpop.f32.mrf.mxu1 }
 0x1e8   :  { %v635_v17 = vpop.f32.mrf.mxu1 }
 0x1ea   :  { %v637_v18 = vpop.f32.mrf.mxu1 }
 0x1ec   :  { %v639_v21 = vpop.f32.mrf.mxu1 }
 0x1ed   :  { %v640_v46 = vadd.f32 %v639_v21, %v3664_v30  ;;  %v634_v21 = vadd.f32 %v633_v14, %v3662_v28 }
 0x1ee   :  { %v643_v40 = vpop.f32.mrf.mxu1 }
 0x1f0   :  { %v645_v43 = vpop.f32.mrf.mxu1 }
 0x1f1   :  { %v646_v0 = vadd.f32 %v645_v43, %v3658_v26 }
 0x1f2   :  { %v647_v45 = vpop.f32.mrf.mxu1 }
 0x1f3   :  { %v648_v53 = vadd.f32 %v647_v45, %v3660_v27  ;;  %v687_v16 = vmax.f32 %v646_v0, 0.0  ;;  %v685_v45 = vmax.f32 %v640_v46, 0.0  ;;  %v628_v0 = vadd.f32 %v627_v11, %v3668_v32 }
 0x1f4   :  { %v649_v47 = vpop.f32.mrf.mxu1 }
 0x1f5   :  { %v650_v55 = vadd.f32 %v649_v47, %v3660_v27  ;;  %v644_v47 = vadd.f32 %v643_v40, %v3658_v26  ;;  %v688_v43 = vmax.f32 %v648_v53, 0.0  ;;  %v626_v40 = vadd.f32 %v625_v3, %v3666_v31 }
 0x1f6   :  { %v653_v49 = vpop.f32.mrf.mxu1  ;;  %v682_v53 = vmax.f32 %v634_v21, 0.0  ;;  %v618_v3 = vadd.f32 %v3712_v8, %v3672_v35  ;;  %v680_v11 = vmax.f32 %v628_v0, 0.0  ;;  %v608_v8 = vadd.f32 %v3706_v1, %v3676_v37 }
 0x1f7   :  { %v654_v59 = vadd.f32 %v653_v49, %v3654_v23  ;;  %v689_v13 = vmax.f32 %v650_v55, 0.0 }
 0x1f8   :  { %v655_v50 = vpop.f32.mrf.mxu1  ;;  %v672_v1 = vmax.f32 %v608_v8, 0.0 }
 0x1f9   :  { %v656_v56 = vadd.f32 %v655_v50, %v3654_v23  ;;  %v690_v50 = vmax.f32 %v654_v59, 0.0  ;;  %v638_v23 = vadd.f32 %v637_v18, %v3664_v30  ;;  %v676_v59 = vmax.f32 %v618_v3, 0.0  ;;  %v3260_v3 = vld [vmem:[%s4769_s5 + $0x48] sm:$0xff]  }
 0x1fa   :  { %v657_v51 = vpop.f32.mrf.mxu1 }
 0x1fb   :  { %v658_v57 = vadd.f32 %v657_v51, %v3656_v24  ;;  %v691_v29 = vmax.f32 %v656_v56, 0.0  ;;  %v636_v51 = vadd.f32 %v635_v17, %v3662_v28  ;;  %v4896_v28 = vld [vmem:[#allocation8_spill] sm:$0xff] }
 0x1fc   :  { %v659_v60 = vpop.f32.mrf.mxu1 }
 0x1fd   :  { %v660_v5 = vadd.f32 %v659_v60, %v3656_v24  ;;  %v692_v34 = vmax.f32 %v658_v57, 0.0  ;;  %v630_v60 = vadd.f32 %v629_v12, %v3668_v32  ;;  %v707_v57 = vpack.c.bf16 %v689_v13, %v687_v16 }
 0x1fe   :  { %v683_v17 = vmax.f32 %v636_v51, 0.0  ;;  %v624_v16 = vadd.f32 %v623_v4, %v3666_v31  ;;  %v679_v12 = vmax.f32 %v626_v40, 0.0  ;;  %v614_v4 = vadd.f32 %v3710_v6, %v3670_v33 }
 0x1ff   :  { %v693_v22 = vmax.f32 %v660_v5, 0.0  ;;  %v708_v19 = vpack.c.bf16 %v692_v34, %v690_v50  ;;  %v686_v5 = vmax.f32 %v644_v47, 0.0  ;;  %v620_v34 = vadd.f32 %v619_v9, %v3672_v35 }
 0x200   :  { %v681_v46 = vmax.f32 %v630_v60, 0.0  ;;  %v705_v13 = vpack.c.bf16 %v685_v45, %v683_v17  ;;  %v610_v9 = vadd.f32 %v3708_v2, %v3676_v37  ;;  %v678_v55 = vmax.f32 %v624_v16, 0.0 }
 0x201   :  { %v709_v49 = vpack.c.bf16 %v693_v22, %v691_v29  ;;  %v684_v22 = vmax.f32 %v638_v23, 0.0  ;;  %v706_v29 = vpack.c.bf16 %v688_v43, %v686_v5  ;;  %v677_v14 = vmax.f32 %v620_v34, 0.0 }
 0x202   :  { %v703_v18 = vpack.c.bf16 %v681_v46, %v679_v12  ;;  %v702_v47 = vpack.c.bf16 %v680_v11, %v678_v55  ;;  %v600_v2 = vadd.f32 %v3698_v58, %v3680_v39  ;;  %v673_v50 = vmax.f32 %v610_v9, 0.0  ;;  %v3250_v46 = vld [vmem:[%s4769_s5] sm:$0xff]   ;;  %v3261_v11 = vld [vmem:[%s4769_s5 + $0x50] sm:$0xff]  }
 0x203   :  { %966 = vmatprep.subr.bf16.mxu0 %v709_v49  ;;  %3214 = vmatprep.subr.bf16.mxu1 %v709_v49  ;;  %v704_v23 = vpack.c.bf16 %v684_v22, %v682_v53  ;;  %v604_v6 = vadd.f32 %v3700_v61, %v3674_v36  ;;  %v674_v49 = vmax.f32 %v614_v4, 0.0  ;;  %v590_v45 = vadd.f32 %v3690_v48, %v3687_v44  ;;  %v3005_v48 = vld [vmem:[%s4764_s0 + $0x18] sm:$0x3f]  ;;  %v3004_v22 = vld [vmem:[%s4764_s0 + $0x10] sm:$0x3f]  ;;  %v3252_v53 = vld [vmem:[%s4769_s5 + $0x8] sm:$0xff]  }
 0x204   :  { %967 = vmatpush1.bf16.msra.mxu0 %v708_v19  ;;  %3222 = vmatpush1.bf16.msra.mxu1 %v708_v19  ;;  %v616_v19 = vadd.f32 %v615_v7, %v3670_v33  ;;  %v606_v7 = vadd.f32 %v3704_v63, %v3674_v36  ;;  %v596_v63 = vadd.f32 %v3694_v54, %v3678_v38  ;;  %v669_v58 = vmax.f32 %v600_v2, 0.0  ;;  %v3259_v12 = vld [vmem:[%s4769_s5 + $0x40] sm:$0xff]   ;;  %v3852_v55 = vld [vmem:[%s4769_s5 + $0x70] sm:$0xff]  }
 0x205   :  { %968 = vmatprep.subr.bf16.mxu0 %v707_v57  ;;  %3215 = vmatprep.subr.bf16.mxu1 %v707_v57  ;;  %v700_v60 = vpack.c.bf16 %v676_v59, %v674_v49  ;;  %v670_v21 = vmax.f32 %v604_v6, 0.0  ;;  %v586_v61 = vadd.f32 %v3684_v42, %v3682_v41  ;;  %v665_v40 = vmax.f32 %v590_v45, 0.0  ;;  %v3834_v9 = vld [vmem:[%s4769_s5 + $0x60] sm:$0xff]   ;;  %4869 = vst [vmem:[#allocation22_spill] sm:$0xff] %v3852_v55  ;;  %v3874_v49 = vpop.permute.xlu0 %867 }
 0x206   :  { %v675_v56 = vmax.f32 %v616_v19, 0.0  ;;  %v671_v43 = vmax.f32 %v606_v7, 0.0  ;;  %v667_v5 = vmax.f32 %v596_v63, 0.0  ;;  %v1322_v34 = vpack.c.bf16 %v3004_v22, %v3004_v22  ;;  %v3257_v19 = vld [vmem:[%s4769_s5 + $0x30] sm:$0xff]   ;;  %4867 = vst [vmem:[#allocation20_spill] sm:$0xff] %v3834_v9  ;;  %4875 = vst [vmem:[#allocation28_spill] sm:$0xff] %v3874_v49 }
 0x207   :  { %v698_v54 = vpack.c.bf16 %v672_v1, %v670_v21  ;;  %v663_v0 = vmax.f32 %v586_v61, 0.0  ;;  %v4865_v16 = vmov 0  }
 0x208   :  { %969 = vmatpush1.bf16.msra.mxu0 %v706_v29  ;;  %3223 = vmatpush1.bf16.msra.mxu1 %v706_v29  ;;  %v701_v51 = vpack.c.bf16 %v677_v14, %v675_v56  ;;  %v699_v57 = vpack.c.bf16 %v673_v50, %v671_v43  ;;  %v697_v17 = vpack.c.bf16 %v669_v58, %v667_v5  ;;  %v3841_v14 = vld [vmem:[%s4769_s5 + $0x68] sm:$0xff]  }
 0x209   :  { %970 = vmatprep.subr.bf16.mxu0 %v705_v13  ;;  %3216 = vmatprep.subr.bf16.mxu1 %v705_v13  ;;  %v695_v42 = vpack.c.bf16 %v665_v40, %v663_v0  ;;  %v1323_v29 = vpack.c.bf16 %v3005_v48, %v3005_v48  ;;  %v3251_v13 = vld [vmem:[%s4769_s5 + $0x78] sm:$0xff]   ;;  %4868 = vst [vmem:[#allocation21_spill] sm:$0xff] %v3841_v14  ;;  %v3878_v43 = vpop.permute.xlu0 %862 }
 0x20a   :  { %4877 = vst [vmem:[#allocation30_spill] sm:$0xff] %v3878_v43 }
 0x20c   :  { %971 = vmatpush1.bf16.msra.mxu0 %v704_v23  ;;  %3224 = vmatpush1.bf16.msra.mxu1 %v704_v23  ;;  %v3827_v23 = vld [vmem:[%s4769_s5 + $0x58] sm:$0xff]  }
 0x20d   :  { %972 = vmatprep.subr.bf16.mxu0 %v703_v18  ;;  %3217 = vmatprep.subr.bf16.mxu1 %v703_v18  ;;  %4866 = vst [vmem:[#allocation19_spill] sm:$0xff] %v3827_v23  ;;  %v3843_v18 = vpop.permute.xlu1 %787 }
 0x210   :  { %973 = vmatpush1.bf16.msra.mxu0 %v702_v47  ;;  %3225 = vmatpush1.bf16.msra.mxu1 %v702_v47 }
 0x211   :  { %974 = vmatprep.subr.bf16.mxu0 %v701_v51  ;;  %3218 = vmatprep.subr.bf16.mxu1 %v701_v51  ;;  %v3847_v4 = vpop.permute.xlu1 %782 }
 0x214   :  { %975 = vmatpush1.bf16.msra.mxu0 %v700_v60  ;;  %3226 = vmatpush1.bf16.msra.mxu1 %v700_v60  ;;  %v3882_v60 = vpop.permute.xlu0 %857 }
 0x215   :  { %976 = vmatprep.subr.bf16.mxu0 %v699_v57  ;;  %3219 = vmatprep.subr.bf16.mxu1 %v699_v57  ;;  %v3855_v7 = vpop.permute.xlu1 %777  ;;  %4879 = vst [vmem:[#allocation32_spill] sm:$0xff] %v3882_v60 }
 0x218   :  { %977 = vmatpush1.bf16.msra.mxu0 %v698_v54  ;;  %3227 = vmatpush1.bf16.msra.mxu1 %v698_v54  ;;  %v3886_v58 = vpop.permute.xlu0 %852 }
 0x219   :  { %978 = vmatprep.subr.bf16.mxu0 %v697_v17  ;;  %3220 = vmatprep.subr.bf16.mxu1 %v697_v17  ;;  %v3858_v56 = vpop.permute.xlu1 %772  ;;  %4881 = vst [vmem:[#allocation34_spill] sm:$0xff] %v3886_v58 }
 0x21c   :  { %979 = vmatpush1.bf16.msra.mxu0 %v3702_v62  ;;  %3228 = vmatpush1.bf16.msra.mxu1 %v3702_v62  ;;  %v1325_v62 = vsel %vm300_vm0, %v1322_v34, 0  ;;  %v3890_v21 = vpop.permute.xlu0 %847 }
 0x21d   :  { %980 = vmatprep.subr.bf16.mxu0 %v695_v42  ;;  %3221 = vmatprep.subr.bf16.mxu1 %v695_v42  ;;  %v3860_v8 = vpop.permute.xlu1 %767  ;;  %4883 = vst [vmem:[#allocation36_spill] sm:$0xff] %v3890_v21 }
 0x220   :  { %981 = vmatpush1.bf16.msra.mxu0 %v3692_v52  ;;  %3229 = vmatpush1.bf16.msra.mxu1 %v3692_v52  ;;  %v3253_v52 = vld [vmem:[%s4769_s5 + $0x10] sm:$0xff]   ;;  %v3896_v22 = vpop.permute.xlu0 %842 }
 0x221   :  { %3006 = vmatprep.subr.msk.bf16.mxu1 %vm300_vm0, %v1323_v29  ;;  %v3862_v59 = vpop.permute.xlu1 %762 }
 0x223   :  { %999 = vmatmul.mubr.bf16.vlgmr.msra.gmra.mxu0 %v3250_v46  ;;  %1149 = vmatmul.mubr.bf16.vlgmr.msra.gmra.mxu1 %v3251_v13 }
 0x224   :  { %1345 = vmatpush1.bf16.msra.mxu1 %v1325_v62  ;;  %1008 = vmatprep.mubr.bf16.mxu0 %v4865_v16 }
 0x225   :  { %1362 = vmatprep.mubr.bf16.mxu1 %v4865_v16  ;;  %v3864_v47 = vpop.permute.xlu1 %757 }
 0x226   :  { %4870 = vst [vmem:[#allocation23_spill] sm:$0xff] %v3864_v47 }
 0x229   :  { %v3866_v2 = vpop.permute.xlu1 %752 }
 0x22a   :  { %4871 = vst [vmem:[#allocation24_spill] sm:$0xff] %v3866_v2 }
 0x22b   :  { %1009 = vmatmul.mubr.bf16.gmra.mxu0 %v3252_v53  ;;  %3007 = vmatmul.mubr.msk.bf16.vlgmr.msra.gmra.mxu1 %vm287_vm1, %v3394_v10  ;;  %v3254_v10 = vld [vmem:[%s4769_s5 + $0x18] sm:$0xff]  }
 0x22c   :  { %1018 = vmatprep.mubr.bf16.mxu0 %v4865_v16  ;;  %1372 = vmatprep.mubr.bf16.mxu1 %v4865_v16 }
 0x22d   :  { %v3868_v50 = vpop.permute.xlu1 %747 }
 0x22e   :  { %4872 = vst [vmem:[#allocation25_spill] sm:$0xff] %v3868_v50 }
 0x231   :  { %v3870_v51 = vpop.permute.xlu1 %742 }
 0x232   :  { %4873 = vst [vmem:[#allocation26_spill] sm:$0xff] %v3870_v51 }
 0x233   :  { %1019 = vmatmul.mubr.bf16.gmra.mxu0 %v3253_v52  ;;  %3008 = vmatmul.mubr.msk.bf16.gmra.mxu1 %vm287_vm1, %v3414_v15  ;;  %v3255_v15 = vld [vmem:[%s4769_s5 + $0x20] sm:$0xff]  }
 0x234   :  { %1028 = vmatprep.mubr.bf16.mxu0 %v4865_v16  ;;  %1382 = vmatprep.mubr.bf16.mxu1 %v4865_v16 }
 0x235   :  { %v3872_v6 = vpop.permute.xlu1 %737 }
 0x236   :  { %4874 = vst [vmem:[#allocation27_spill] sm:$0xff] %v3872_v6 }
 0x239   :  { %v3876_v63 = vpop.permute.xlu1 %732 }
 0x23a   :  { %4876 = vst [vmem:[#allocation29_spill] sm:$0xff] %v3876_v63 }
 0x23b   :  { %1029 = vmatmul.mubr.bf16.gmra.mxu0 %v3254_v10  ;;  %3009 = vmatmul.mubr.msk.bf16.gmra.mxu1 %vm287_vm1, %v3434_v20  ;;  %v3256_v20 = vld [vmem:[%s4769_s5 + $0x28] sm:$0xff]  }
 0x23c   :  { %1038 = vmatprep.mubr.bf16.mxu0 %v4865_v16  ;;  %1392 = vmatprep.mubr.bf16.mxu1 %v4865_v16 }
 0x23d   :  { %v3880_v1 = vpop.permute.xlu1 %727 }
 0x23e   :  { %4878 = vst [vmem:[#allocation31_spill] sm:$0xff] %v3880_v1 }
 0x241   :  { %v3884_v45 = vpop.permute.xlu1 %722 }
 0x242   :  { %4880 = vst [vmem:[#allocation33_spill] sm:$0xff] %v3884_v45 }
 0x243   :  { %1039 = vmatmul.mubr.bf16.gmra.mxu0 %v3255_v15  ;;  %3010 = vmatmul.mubr.msk.bf16.gmra.mxu1 %vm287_vm1, %v3454_v25  ;;  %v3258_v25 = vld [vmem:[%s4769_s5 + $0x38] sm:$0xff]  }
 0x244   :  { %1048 = vmatprep.mubr.bf16.mxu0 %v4865_v16  ;;  %1459 = vmatprep.mubr.bf16.mxu1 %v4865_v16 }
 0x245   :  { %v3888_v57 = vpop.permute.xlu1 %717 }
 0x246   :  { %4882 = vst [vmem:[#allocation35_spill] sm:$0xff] %v3888_v57 }
 0x249   :  { %v3892_v61 = vpop.permute.xlu1 %712 }
 0x24a   :  { %4884 = vst [vmem:[#allocation37_spill] sm:$0xff] %v3892_v61 }
 0x24b   :  { %1049 = vmatmul.mubr.bf16.gmra.mxu0 %v3256_v20 }
 0x24c   :  { %1058 = vmatprep.mubr.bf16.mxu0 %v4865_v16 }
 0x253   :  { %1059 = vmatmul.mubr.bf16.gmra.mxu0 %v3257_v19 }
 0x254   :  { %1068 = vmatprep.mubr.bf16.mxu0 %v4865_v16 }
 0x25b   :  { %1069 = vmatmul.mubr.bf16.gmra.mxu0 %v3258_v25 }
 0x25c   :  { %1078 = vmatprep.mubr.bf16.mxu0 %v4865_v16 }
 0x263   :  { %1079 = vmatmul.mubr.bf16.gmra.mxu0 %v3259_v12 }
 0x264   :  { %1088 = vmatprep.mubr.bf16.mxu0 %v4865_v16 }
 0x26b   :  { %1089 = vmatmul.mubr.bf16.gmra.mxu0 %v3260_v3 }
 0x26c   :  { %1098 = vmatprep.mubr.bf16.mxu0 %v4865_v16 }
 0x273   :  { %1099 = vmatmul.mubr.bf16.gmra.mxu0 %v3261_v11 }
 0x274   :  { %1108 = vmatprep.mubr.bf16.mxu0 %v4865_v16 }
 0x27b   :  { %1109 = vmatmul.mubr.bf16.gmra.mxu0 %v3827_v23 }
 0x27c   :  { %1118 = vmatprep.mubr.bf16.mxu0 %v4865_v16 }
 0x283   :  { %1119 = vmatmul.mubr.bf16.gmra.mxu0 %v3834_v9 }
 0x284   :  { %1128 = vmatprep.mubr.bf16.mxu0 %v4865_v16 }
 0x28b   :  { %1129 = vmatmul.mubr.bf16.gmra.mxu0 %v3841_v14 }
 0x28c   :  { %1138 = vmatprep.mubr.bf16.mxu0 %v4865_v16 }
 0x293   :  { %1139 = vmatmul.mubr.bf16.gmra.mxu0 %v3852_v55 }
 0x294   :  { %1620 = vmatprep.mubr.bf16.mxu0 %v4865_v16 }
 0x2e3   :  { %v1000_v5 = vpop.f32.mrf.mxu0  ;;  %v1150_v54 = vpop.f32.mrf.mxu1 }
 0x2e4   :  { %v1001_v40 = vadd.f32 %v1000_v5, %v3892_v61  ;;  %v1151_v17 = vadd.f32 %v1150_v54, %v3878_v43  ;;  %v3910_v5 = vpop.permute.xlu0 %837 }
 0x2e5   :  { %v1002_v0 = vpop.f32.mrf.mxu0  ;;  %v1152_v48 = vpop.f32.mrf.mxu1 }
 0x2e6   :  { %v1003_v42 = vadd.f32 %v1002_v0, %v3892_v61  ;;  %v1153_v29 = vadd.f32 %v1152_v48, %v3878_v43  ;;  %v1159_v13 = vmax.f32 %v1001_v40, 0.0  ;;  %v1219_v52 = vmax.f32 %v1151_v17, 0.0 }
 0x2e7   :  { %v3900_v34 = vpop.f32.mrf.mxu0  ;;  %v1154_v46 = vpop.f32.mrf.mxu1 }
 0x2e8   :  { %4885 = vst [vmem:[#allocation38_spill] sm:$0xff] %v3900_v34  ;;  %v1160_v62 = vmax.f32 %v1003_v42, 0.0  ;;  %v1220_v53 = vmax.f32 %v1153_v29, 0.0  ;;  %v1155_v10 = vadd.f32 %v1154_v46, %v3874_v49 }
 0x2e9   :  { %v3903_v15 = vpop.f32.mrf.mxu0  ;;  %v1156_v20 = vpop.f32.mrf.mxu1 }
 0x2ea   :  { %4886 = vst [vmem:[#allocation39_spill] sm:$0xff] %v3903_v15  ;;  %v3905_v19 = vmax.f32 %v1159_v13, %v1160_v62  ;;  %v1157_v25 = vadd.f32 %v1156_v20, %v3874_v49  ;;  %v1313_v11 = vmax.f32 %v1219_v52, %v1220_v53  ;;  %v1221_v40 = vmax.f32 %v1155_v10, 0.0  ;;  %v3924_v10 = vpop.permute.xlu0 %832 }
 0x2eb   :  { %v1010_v12 = vpop.f32.mrf.mxu0  ;;  %v3908_v3 = vpop.f32.mrf.mxu1 }
 0x2ec   :  { %4887 = vst [vmem:[#allocation40_spill] sm:$0xff] %v3905_v19  ;;  %v1011_v54 = vadd.f32 %v1010_v12, %v3884_v45  ;;  %v1222_v0 = vmax.f32 %v1157_v25, 0.0  ;;  %1314 = vmax.xlane.f32.xlu1 %v1313_v11 }
 0x2ed   :  { %v1012_v17 = vpop.f32.mrf.mxu0  ;;  %v3913_v48 = vpop.f32.mrf.mxu1 }
 0x2ee   :  { %v1013_v42 = vadd.f32 %v1012_v17, %v3884_v45  ;;  %v1316_v13 = vmax.f32 %v1221_v40, %v1222_v0  ;;  %v1163_v62 = vmax.f32 %v1011_v54, 0.0 }
 0x2ef   :  { %v3916_v29 = vpop.f32.mrf.mxu0  ;;  %v3918_v46 = vpop.f32.mrf.mxu1 }
 0x2f0   :  { %4888 = vst [vmem:[#allocation41_spill] sm:$0xff] %v3916_v29  ;;  %v1164_v20 = vmax.f32 %v1013_v42, 0.0  ;;  %1317 = vmax.xlane.f32.xlu0 %v1316_v13  ;;  %v3936_v42 = vpop.permute.xlu0 %827 }
 0x2f1   :  { %v3920_v53 = vpop.f32.mrf.mxu0  ;;  %v3922_v52 = vpop.f32.mrf.mxu1 }
 0x2f2   :  { %4889 = vst [vmem:[#allocation42_spill] sm:$0xff] %v3920_v53  ;;  %v3926_v25 = vmax.f32 %v1163_v62, %v1164_v20 }
 0x2f3   :  { %v1020_v12 = vpop.f32.mrf.mxu0  ;;  %v3928_v11 = vpop.f32.mrf.mxu1 }
 0x2f4   :  { %4890 = vst [vmem:[#allocation43_spill] sm:$0xff] %v3926_v25  ;;  %v1021_v17 = vadd.f32 %v1020_v12, %v3876_v63  ;;  %v3941_v57 = vpop.permute.xlu0 %822 }
 0x2f5   :  { %v1022_v19 = vpop.f32.mrf.mxu0  ;;  %v3931_v34 = vpop.f32.mrf.mxu1 }
 0x2f6   :  { %v1023_v54 = vadd.f32 %v1022_v19, %v3876_v63  ;;  %v1167_v15 = vmax.f32 %v1021_v17, 0.0 }
 0x2f7   :  { %v1024_v40 = vpop.f32.mrf.mxu0  ;;  %v3934_v0 = vpop.f32.mrf.mxu1 }
 0x2f8   :  { %v1168_v13 = vmax.f32 %v1023_v54, 0.0  ;;  %v1025_v62 = vadd.f32 %v1024_v40, %v3872_v6 }
 0x2f9   :  { %v1026_v20 = vpop.f32.mrf.mxu0  ;;  %v1380_v25 = vpop.f32.mrf.mxu1 }
 0x2fa   :  { %v1027_v29 = vadd.f32 %v1026_v20, %v3872_v6  ;;  %v1235_v49 = vmax.f32 %v1167_v15, %v1168_v13  ;;  %v1169_v1 = vmax.f32 %v1025_v62, 0.0  ;;  %v3946_v6 = vpop.permute.xlu0 %817 }
 0x2fb   :  { %v1030_v53 = vpop.f32.mrf.mxu0  ;;  %v1384_v12 = vpop.f32.mrf.mxu1 }
 0x2fc   :  { %v1170_v43 = vmax.f32 %v1027_v29, 0.0  ;;  %v1031_v19 = vadd.f32 %v1030_v53, %v3870_v51  ;;  %1236 = vmax.xlane.f32.xlu1 %v1235_v49 }
 0x2fd   :  { %v1032_v63 = vpop.f32.mrf.mxu0  ;;  %v1386_v45 = vpop.f32.mrf.mxu1 }
 0x2fe   :  { %v1033_v17 = vadd.f32 %v1032_v63, %v3870_v51  ;;  %v1238_v61 = vmax.f32 %v1169_v1, %v1170_v43  ;;  %v1171_v14 = vmax.f32 %v1031_v19, 0.0 }
 0x2ff   :  { %v1034_v54 = vpop.f32.mrf.mxu0  ;;  %v1388_v40 = vpop.f32.mrf.mxu1 }
 0x300   :  { %v1172_v55 = vmax.f32 %v1033_v17, 0.0  ;;  %v1035_v20 = vadd.f32 %v1034_v54, %v3868_v50  ;;  %1239 = vmax.xlane.f32.xlu1 %v1238_v61  ;;  %v4891_v17 = vld [vmem:[#allocation4_spill] sm:$0xff]  ;;  %v4892_v54 = vld [vmem:[#allocation3_spill] sm:$0xff] }
 0x301   :  { %v1036_v15 = vpop.f32.mrf.mxu0  ;;  %v1390_v29 = vpop.f32.mrf.mxu1 }
 0x302   :  { %v1037_v13 = vadd.f32 %v1036_v15, %v3868_v50  ;;  %v1241_v62 = vmax.f32 %v1171_v14, %v1172_v55  ;;  %v1173_v23 = vmax.f32 %v1035_v20, 0.0  ;;  %v1391_v61 = vadd.f32 %v1390_v29, %v4891_v17  ;;  %v4893_v55 = vld [vmem:[#allocation5_spill] sm:$0xff]  ;;  %v4894_v20 = vld [vmem:[#allocation6_spill] sm:$0xff] }
 0x303   :  { %v1040_v53 = vpop.f32.mrf.mxu0  ;;  %v1394_v49 = vpop.f32.mrf.mxu1  ;;  %v1381_v33 = vadd.f32 %v1380_v25, %v4894_v20 }
 0x304   :  { %v1174_v9 = vmax.f32 %v1037_v13, 0.0  ;;  %v1041_v63 = vadd.f32 %v1040_v53, %v3866_v2  ;;  %1242 = vmax.xlane.f32.xlu1 %v1241_v62  ;;  %v1395_v62 = vadd.f32 %v1394_v49, %v4892_v54 }
 0x305   :  { %v1042_v43 = vpop.f32.mrf.mxu0  ;;  %v1396_v1 = vpop.f32.mrf.mxu1 }
 0x306   :  { %v1043_v19 = vadd.f32 %v1042_v43, %v3866_v2  ;;  %v1397_v51 = vadd.f32 %v1396_v1, %v4892_v54  ;;  %v1244_v50 = vmax.f32 %v1173_v23, %v1174_v9  ;;  %v1175_v53 = vmax.f32 %v1041_v63, 0.0  ;;  %v4895_v2 = vld [vmem:[#allocation2_spill] sm:$0xff]  ;;  %v3960_v9 = vpop.permute.xlu0 %812 }
 0x307   :  { %v1044_v36 = vpop.f32.mrf.mxu0  ;;  %v1398_v15 = vpop.f32.mrf.mxu1  ;;  %v1387_v29 = vadd.f32 %v1386_v45, %v4895_v2  ;;  %v1389_v1 = vadd.f32 %v1388_v40, %v4891_v17  ;;  %v1371_v45 = vadd.f32 %v3922_v52, %v4896_v28  ;;  %v4897_v40 = vld [vmem:[#allocation7_spill] sm:$0xff]  ;;  %v1385_v17 = vadd.f32 %v1384_v12, %v4895_v2 }
 0x308   :  { %v1176_v37 = vmax.f32 %v1043_v19, 0.0  ;;  %v1045_v14 = vadd.f32 %v1044_v36, %v3864_v47  ;;  %v1399_v13 = vadd.f32 %v1398_v15, %v4893_v55  ;;  %1245 = vmax.xlane.f32.xlu1 %v1244_v50  ;;  %v1414_v36 = vmax.f32 %v1391_v61, 0.0 }
 0x309   :  { %v1046_v35 = vpop.f32.mrf.mxu0  ;;  %v1400_v43 = vpop.f32.mrf.mxu1  ;;  %v1416_v19 = vmax.f32 %v1397_v51, 0.0  ;;  %v1412_v51 = vmax.f32 %v1387_v29, 0.0  ;;  %v1411_v29 = vmax.f32 %v1385_v17, 0.0 }
 0x30a   :  { %v1047_v31 = vadd.f32 %v1046_v35, %v3864_v47  ;;  %v1401_v23 = vadd.f32 %v1400_v43, %v4893_v55  ;;  %v1417_v15 = vmax.f32 %v1399_v13, 0.0  ;;  %v1247_v63 = vmax.f32 %v1175_v53, %v1176_v37  ;;  %v3972_v12 = vpop.permute.xlu0 %807 }
 0x30b   :  { %v1050_v25 = vpop.f32.mrf.mxu0  ;;  %v1177_v32 = vmax.f32 %v1045_v14, 0.0  ;;  %v1377_v35 = vadd.f32 %v3931_v34, %v4897_v40  ;;  %v1415_v55 = vmax.f32 %v1395_v62, 0.0  ;;  %v1410_v53 = vmax.f32 %v1381_v33, 0.0  ;;  %4898 = vst [vmem:[#allocation4_spill] sm:$0xff] %v3972_v12 }
 0x30c   :  { %v1178_v49 = vmax.f32 %v1047_v31, 0.0  ;;  %v1418_v50 = vmax.f32 %v1401_v23, 0.0  ;;  %v1051_v54 = vadd.f32 %v1050_v25, %v3862_v59  ;;  %1248 = vmax.xlane.f32.xlu1 %v1247_v63  ;;  %v1379_v31 = vadd.f32 %v3934_v0, %v4894_v20  ;;  %v4899_v0 = vld [vmem:[#allocation9_spill] sm:$0xff] }
 0x30d   :  { %v1052_v61 = vpop.f32.mrf.mxu0  ;;  %v1413_v43 = vmax.f32 %v1389_v1, 0.0  ;;  %v1425_v23 = vpack.c.bf16 %v1417_v15, %v1415_v55  ;;  %v1424_v25 = vpack.c.bf16 %v1414_v36, %v1412_v51  ;;  %v1375_v62 = vadd.f32 %v3928_v11, %v4897_v40 }
 0x30e   :  { %v1426_v13 = vpack.c.bf16 %v1418_v50, %v1416_v19  ;;  %v1053_v37 = vadd.f32 %v1052_v61, %v3862_v59  ;;  %v1250_v14 = vmax.f32 %v1177_v32, %v1178_v49  ;;  %v1179_v47 = vmax.f32 %v1051_v54, 0.0 }
 0x30f   :  { %v1054_v52 = vpop.f32.mrf.mxu0  ;;  %v1367_v33 = vadd.f32 %v3913_v48, %v4899_v0  ;;  %v1408_v20 = vmax.f32 %v1377_v35, 0.0  ;;  %v1369_v19 = vadd.f32 %v3918_v46, %v4896_v28  ;;  %v1406_v15 = vmax.f32 %v1371_v45, 0.0  ;;  %v3985_v46 = vpop.permute.xlu0 %802 }
 0x310   :  { %v1180_v34 = vmax.f32 %v1053_v37, 0.0  ;;  %v1055_v2 = vadd.f32 %v1054_v52, %v3860_v8  ;;  %1435 = vmatprep.subr.bf16.mxu1 %v1426_v13  ;;  %1251 = vmax.xlane.f32.xlu1 %v1250_v14  ;;  %v1409_v63 = vmax.f32 %v1379_v31, 0.0  ;;  %v1423_v49 = vpack.c.bf16 %v1413_v43, %v1411_v29  ;;  %4900 = vst [vmem:[#allocation3_spill] sm:$0xff] %v3985_v46 }
 0x311   :  { %v1056_v32 = vpop.f32.mrf.mxu0  ;;  %1436 = vmatpush1.bf16.msra.mxu1 %v1425_v23  ;;  %v1422_v11 = vpack.c.bf16 %v1410_v53, %v1408_v20  ;;  %v1365_v48 = vadd.f32 %v3908_v3, %v4899_v0  ;;  %v1407_v35 = vmax.f32 %v1375_v62, 0.0  ;;  %v1405_v45 = vmax.f32 %v1369_v19, 0.0 }
 0x312   :  { %v1057_v1 = vadd.f32 %v1056_v32, %v3860_v8  ;;  %1437 = vmatprep.subr.bf16.mxu1 %v1424_v25  ;;  %v1253_v36 = vmax.f32 %v1179_v47, %v1180_v34  ;;  %v1181_v54 = vmax.f32 %v1055_v2, 0.0  ;;  %v1404_v47 = vmax.f32 %v1367_v33, 0.0 }
 0x313   :  { %v1060_v50 = vpop.f32.mrf.mxu0  ;;  %v1421_v51 = vpack.c.bf16 %v1409_v63, %v1407_v35  ;;  %v1403_v3 = vmax.f32 %v1365_v48, 0.0  ;;  %v3990_v32 = vpop.permute.xlu0 %797  ;;  %v4901_v63 = vld [vmem:[#allocation10_spill] sm:$0xff] }
 0x314   :  { %v1182_v40 = vmax.f32 %v1057_v1, 0.0  ;;  %v1061_v17 = vadd.f32 %v1060_v50, %v3858_v56  ;;  %1254 = vmax.xlane.f32.xlu1 %v1253_v36  ;;  %v1420_v37 = vpack.c.bf16 %v1406_v15, %v1404_v47 }
 0x315   :  { %v1062_v55 = vpop.f32.mrf.mxu0  ;;  %1438 = vmatpush1.bf16.msra.mxu1 %v1423_v49  ;;  %v1419_v25 = vpack.c.bf16 %v1405_v45, %v1403_v3 }
 0x316   :  { %v1063_v61 = vadd.f32 %v1062_v55, %v3858_v56  ;;  %1439 = vmatprep.subr.bf16.mxu1 %v1422_v11  ;;  %v1256_v28 = vmax.f32 %v1181_v54, %v1182_v40  ;;  %v1183_v14 = vmax.f32 %v1061_v17, 0.0 }
 0x317   :  { %v1064_v13 = vpop.f32.mrf.mxu0  ;;  %v3998_v54 = vpop.permute.xlu0 %792 }
 0x318   :  { %v1184_v31 = vmax.f32 %v1063_v61, 0.0  ;;  %v1065_v53 = vadd.f32 %v1064_v13, %v3855_v7  ;;  %1257 = vmax.xlane.f32.xlu1 %v1256_v28 }
 0x319   :  { %v1066_v43 = vpop.f32.mrf.mxu0  ;;  %1440 = vmatpush1.bf16.msra.mxu1 %v1421_v51 }
 0x31a   :  { %v1067_v23 = vadd.f32 %v1066_v43, %v3855_v7  ;;  %1441 = vmatprep.subr.bf16.mxu1 %v1420_v37  ;;  %v1259_v52 = vmax.f32 %v1183_v14, %v1184_v31  ;;  %v1185_v2 = vmax.f32 %v1065_v53, 0.0  ;;  %v3270_v37 = vld [vmem:[%s4768_s3 + $0x8] sm:$0xff]  }
 0x31b   :  { %v1070_v34 = vpop.f32.mrf.mxu0 }
 0x31c   :  { %v1186_v62 = vmax.f32 %v1067_v23, 0.0  ;;  %v1071_v29 = vadd.f32 %v1070_v34, %v3847_v4  ;;  %1260 = vmax.xlane.f32.xlu1 %v1259_v52 }
 0x31d   :  { %v1072_v0 = vpop.f32.mrf.mxu0  ;;  %1442 = vmatpush1.bf16.msra.mxu1 %v1419_v25 }
 0x31e   :  { %v1073_v33 = vadd.f32 %v1072_v0, %v3847_v4  ;;  %v1262_v20 = vmax.f32 %v1185_v2, %v1186_v62  ;;  %v1187_v36 = vmax.f32 %v1071_v29, 0.0 }
 0x31f   :  { %v1074_v1 = vpop.f32.mrf.mxu0 }
 0x320   :  { %v1188_v19 = vmax.f32 %v1073_v33, 0.0  ;;  %v1075_v15 = vadd.f32 %v1074_v1, %v3843_v18  ;;  %3011 = vmatmul.mubr.msk.bf16.vlgmr.msra.gmra.mxu1 %vm524_vm2, %v4901_v63  ;;  %1263 = vmax.xlane.f32.xlu1 %v1262_v20  ;;  %v3271_v20 = vld [vmem:[%s4768_s3 + $0x10] sm:$0xff]  }
 0x321   :  { %v1076_v49 = vpop.f32.mrf.mxu0  ;;  %1469 = vmatprep.mubr.bf16.mxu1 %v4865_v16 }
 0x322   :  { %v1077_v50 = vadd.f32 %v1076_v49, %v3843_v18  ;;  %v1265_v11 = vmax.f32 %v1187_v36, %v1188_v19  ;;  %v1189_v17 = vmax.f32 %v1075_v15, 0.0 }
 0x323   :  { %v1080_v40 = vpop.f32.mrf.mxu0 }
 0x324   :  { %v1190_v48 = vmax.f32 %v1077_v50, 0.0  ;;  %v1081_v35 = vadd.f32 %v1080_v40, %v3998_v54  ;;  %1266 = vmax.xlane.f32.xlu1 %v1265_v11 }
 0x325   :  { %v1082_v55 = vpop.f32.mrf.mxu0 }
 0x326   :  { %v1083_v47 = vadd.f32 %v1082_v55, %v3998_v54  ;;  %v1268_v61 = vmax.f32 %v1189_v17, %v1190_v48  ;;  %v1191_v45 = vmax.f32 %v1081_v35, 0.0 }
 0x327   :  { %v1084_v28 = vpop.f32.mrf.mxu0 }
 0x328   :  { %v1192_v51 = vmax.f32 %v1083_v47, 0.0  ;;  %v1085_v13 = vadd.f32 %v1084_v28, %v3990_v32  ;;  %3012 = vmatmul.mubr.msk.bf16.gmra.mxu1 %vm524_vm2, %v3270_v37  ;;  %1269 = vmax.xlane.f32.xlu0 %v1268_v61  ;;  %v3272_v61 = vld [vmem:[%s4768_s3 + $0x18] sm:$0xff]  }
 0x329   :  { %v1086_v14 = vpop.f32.mrf.mxu0  ;;  %1479 = vmatprep.mubr.bf16.mxu1 %v4865_v16 }
 0x32a   :  { %v4008_v31 = vmax.f32 %v1191_v45, %v1192_v51  ;;  %v1087_v53 = vadd.f32 %v1086_v14, %v3990_v32  ;;  %v1193_v43 = vmax.f32 %v1085_v13, 0.0 }
 0x32b   :  { %v1090_v3 = vpop.f32.mrf.mxu0 }
 0x32c   :  { %4902 = vst [vmem:[#allocation5_spill] sm:$0xff] %v4008_v31  ;;  %v1194_v23 = vmax.f32 %v1087_v53, 0.0  ;;  %v1091_v52 = vadd.f32 %v1090_v3, %v3985_v46 }
 0x32d   :  { %v1092_v25 = vpop.f32.mrf.mxu0 }
 0x32e   :  { %v4012_v34 = vmax.f32 %v1193_v43, %v1194_v23  ;;  %v1093_v2 = vadd.f32 %v1092_v25, %v3985_v46  ;;  %v1195_v29 = vmax.f32 %v1091_v52, 0.0 }
 0x32f   :  { %v1094_v62 = vpop.f32.mrf.mxu0 }
 0x330   :  { %4903 = vst [vmem:[#allocation6_spill] sm:$0xff] %v4012_v34  ;;  %v1196_v0 = vmax.f32 %v1093_v2, 0.0  ;;  %v1095_v33 = vadd.f32 %v1094_v62, %v3972_v12  ;;  %3013 = vmatmul.mubr.msk.bf16.gmra.mxu1 %vm524_vm2, %v3271_v20 }
 0x331   :  { %v1096_v1 = vpop.f32.mrf.mxu0  ;;  %1489 = vmatprep.mubr.bf16.mxu1 %v4865_v16 }
 0x332   :  { %v4021_v36 = vmax.f32 %v1195_v29, %v1196_v0  ;;  %v1097_v19 = vadd.f32 %v1096_v1, %v3972_v12  ;;  %v1197_v63 = vmax.f32 %v1095_v33, 0.0  ;;  %v3273_v29 = vld [vmem:[%s4768_s3 + $0x20] sm:$0xff]  }
 0x333   :  { %v1100_v15 = vpop.f32.mrf.mxu0 }
 0x334   :  { %4904 = vst [vmem:[#allocation2_spill] sm:$0xff] %v4021_v36  ;;  %v1198_v49 = vmax.f32 %v1097_v19, 0.0  ;;  %v1101_v50 = vadd.f32 %v1100_v15, %v3960_v9 }
 0x335   :  { %v1102_v11 = vpop.f32.mrf.mxu0 }
 0x336   :  { %v4025_v40 = vmax.f32 %v1197_v63, %v1198_v49  ;;  %v1103_v17 = vadd.f32 %v1102_v11, %v3960_v9  ;;  %v1199_v35 = vmax.f32 %v1101_v50, 0.0 }
 0x337   :  { %v1104_v48 = vpop.f32.mrf.mxu0 }
 0x338   :  { %4905 = vst [vmem:[#allocation8_spill] sm:$0xff] %v4025_v40  ;;  %v1200_v55 = vmax.f32 %v1103_v17, 0.0  ;;  %v1105_v47 = vadd.f32 %v1104_v48, %v3946_v6  ;;  %3014 = vmatmul.mubr.msk.bf16.gmra.mxu1 %vm524_vm2, %v3272_v61 }
 0x339   :  { %v1106_v28 = vpop.f32.mrf.mxu0  ;;  %1499 = vmatprep.mubr.bf16.mxu1 %v4865_v16 }
 0x33a   :  { %v1107_v45 = vadd.f32 %v1106_v28, %v3946_v6  ;;  %v1283_v51 = vmax.f32 %v1199_v35, %v1200_v55  ;;  %v1201_v37 = vmax.f32 %v1105_v47, 0.0  ;;  %v3274_v47 = vld [vmem:[%s4768_s3 + $0x28] sm:$0xff]  }
 0x33b   :  { %v1110_v13 = vpop.f32.mrf.mxu0 }
 0x33c   :  { %v1202_v14 = vmax.f32 %v1107_v45, 0.0  ;;  %v1111_v53 = vadd.f32 %v1110_v13, %v3941_v57  ;;  %1284 = vmax.xlane.f32.xlu1 %v1283_v51 }
 0x33d   :  { %v1112_v3 = vpop.f32.mrf.mxu0 }
 0x33e   :  { %v1113_v43 = vadd.f32 %v1112_v3, %v3941_v57  ;;  %v1286_v23 = vmax.f32 %v1201_v37, %v1202_v14  ;;  %v1203_v25 = vmax.f32 %v1111_v53, 0.0 }
 0x33f   :  { %v1114_v52 = vpop.f32.mrf.mxu0 }
 0x340   :  { %v1204_v2 = vmax.f32 %v1113_v43, 0.0  ;;  %v1115_v62 = vadd.f32 %v1114_v52, %v3936_v42  ;;  %3015 = vmatmul.mubr.msk.bf16.gmra.mxu1 %vm524_vm2, %v3273_v29  ;;  %1287 = vmax.xlane.f32.xlu1 %v1286_v23 }
 0x341   :  { %v1116_v0 = vpop.f32.mrf.mxu0  ;;  %1509 = vmatprep.mubr.bf16.mxu1 %v4865_v16 }
 0x342   :  { %v1117_v33 = vadd.f32 %v1116_v0, %v3936_v42  ;;  %v1289_v20 = vmax.f32 %v1203_v25, %v1204_v2  ;;  %v1205_v19 = vmax.f32 %v1115_v62, 0.0  ;;  %v3275_v62 = vld [vmem:[%s4768_s3 + $0x30] sm:$0xff]  }
 0x343   :  { %v1120_v1 = vpop.f32.mrf.mxu0 }
 0x344   :  { %v1206_v15 = vmax.f32 %v1117_v33, 0.0  ;;  %v1121_v63 = vadd.f32 %v1120_v1, %v3924_v10  ;;  %1290 = vmax.xlane.f32.xlu1 %v1289_v20 }
 0x345   :  { %v1122_v49 = vpop.f32.mrf.mxu0 }
 0x346   :  { %v1123_v50 = vadd.f32 %v1122_v49, %v3924_v10  ;;  %v1292_v11 = vmax.f32 %v1205_v19, %v1206_v15  ;;  %v1207_v48 = vmax.f32 %v1121_v63, 0.0 }
 0x347   :  { %v1124_v17 = vpop.f32.mrf.mxu0 }
 0x348   :  { %v1208_v35 = vmax.f32 %v1123_v50, 0.0  ;;  %v1125_v55 = vadd.f32 %v1124_v17, %v3910_v5  ;;  %3016 = vmatmul.mubr.msk.bf16.gmra.mxu1 %vm524_vm2, %v3274_v47  ;;  %1293 = vmax.xlane.f32.xlu1 %v1292_v11 }
 0x349   :  { %v1126_v61 = vpop.f32.mrf.mxu0  ;;  %1519 = vmatprep.mubr.bf16.mxu1 %v4865_v16 }
 0x34a   :  { %v1127_v28 = vadd.f32 %v1126_v61, %v3910_v5  ;;  %v1295_v45 = vmax.f32 %v1207_v48, %v1208_v35  ;;  %v1209_v13 = vmax.f32 %v1125_v55, 0.0  ;;  %v3276_v55 = vld [vmem:[%s4768_s3 + $0x38] sm:$0xff]  }
 0x34b   :  { %v1130_v51 = vpop.f32.mrf.mxu0 }
 0x34c   :  { %v1210_v37 = vmax.f32 %v1127_v28, 0.0  ;;  %v1131_v14 = vadd.f32 %v1130_v51, %v3896_v22  ;;  %1296 = vmax.xlane.f32.xlu1 %v1295_v45 }
 0x34d   :  { %v1132_v53 = vpop.f32.mrf.mxu0 }
 0x34e   :  { %v1133_v3 = vadd.f32 %v1132_v53, %v3896_v22  ;;  %v1298_v43 = vmax.f32 %v1209_v13, %v1210_v37  ;;  %v1211_v52 = vmax.f32 %v1131_v14, 0.0 }
 0x34f   :  { %v1134_v23 = vpop.f32.mrf.mxu0 }
 0x350   :  { %v1212_v25 = vmax.f32 %v1133_v3, 0.0  ;;  %v1135_v2 = vadd.f32 %v1134_v23, %v3890_v21  ;;  %3017 = vmatmul.mubr.msk.bf16.gmra.mxu1 %vm524_vm2, %v3275_v62  ;;  %1299 = vmax.xlane.f32.xlu1 %v1298_v43 }
 0x351   :  { %v1136_v29 = vpop.f32.mrf.mxu0  ;;  %1529 = vmatprep.mubr.bf16.mxu1 %v4865_v16 }
 0x352   :  { %v1137_v0 = vadd.f32 %v1136_v29, %v3890_v21  ;;  %v1301_v33 = vmax.f32 %v1211_v52, %v1212_v25  ;;  %v1213_v1 = vmax.f32 %v1135_v2, 0.0 }
 0x353   :  { %v1140_v20 = vpop.f32.mrf.mxu0 }
 0x354   :  { %v1214_v19 = vmax.f32 %v1137_v0, 0.0  ;;  %v1141_v15 = vadd.f32 %v1140_v20, %v3886_v58  ;;  %1302 = vmax.xlane.f32.xlu1 %v1301_v33 }
 0x355   :  { %v1142_v63 = vpop.f32.mrf.mxu0 }
 0x356   :  { %v1143_v49 = vadd.f32 %v1142_v63, %v3886_v58  ;;  %v1304_v50 = vmax.f32 %v1213_v1, %v1214_v19  ;;  %v1215_v17 = vmax.f32 %v1141_v15, 0.0 }
 0x357   :  { %v1144_v11 = vpop.f32.mrf.mxu0 }
 0x358   :  { %v1216_v48 = vmax.f32 %v1143_v49, 0.0  ;;  %v1145_v35 = vadd.f32 %v1144_v11, %v3882_v60  ;;  %3018 = vmatmul.mubr.msk.bf16.gmra.mxu1 %vm524_vm2, %v3276_v55  ;;  %1305 = vmax.xlane.f32.xlu1 %v1304_v50 }
 0x359   :  { %v1146_v47 = vpop.f32.mrf.mxu0 }
 0x35a   :  { %v1147_v61 = vadd.f32 %v1146_v47, %v3882_v60  ;;  %v1307_v28 = vmax.f32 %v1215_v17, %v1216_v48  ;;  %v1217_v45 = vmax.f32 %v1145_v35, 0.0  ;;  %v4907_v60 = vld [vmem:[#allocation12_spill] sm:$0xff] }
 0x35c   :  { %v1218_v51 = vmax.f32 %v1147_v61, 0.0  ;;  %1308 = vmax.xlane.f32.xlu1 %v1307_v28 }
 0x35e   :  { %v1310_v13 = vmax.f32 %v1217_v45, %v1218_v51 }
 0x360   :  { %1311 = vmax.xlane.f32.xlu1 %v1310_v13 }
 0x3e0   :  { %v1461_v37 = vpop.f32.mrf.mxu1 }
 0x3e1   :  { %v1462_v53 = vadd.f32 %v1461_v37, %v3682_v41 }
 0x3e2   :  { %v1463_v14 = vpop.f32.mrf.mxu1 }
 0x3e3   :  { %v1464_v43 = vadd.f32 %v1463_v14, %v3682_v41  ;;  %v1540_v25 = vmax.f32 %v1462_v53, 0.0 }
 0x3e4   :  { %v1465_v3 = vpop.f32.mrf.mxu1 }
 0x3e5   :  { %v1466_v23 = vadd.f32 %v1465_v3, %v3687_v44  ;;  %v1541_v0 = vmax.f32 %v1464_v43, 0.0 }
 0x3e6   :  { %v1467_v52 = vpop.f32.mrf.mxu1 }
 0x3e7   :  { %v1542_v2 = vmax.f32 %v1466_v23, 0.0  ;;  %v1468_v62 = vadd.f32 %v1467_v52, %v3687_v44 }
 0x3e8   :  { %v1471_v29 = vpop.f32.mrf.mxu1 }
 0x3e9   :  { %v4074_v33 = vpack.c.bf16 %v1542_v2, %v1540_v25  ;;  %v1543_v20 = vmax.f32 %v1468_v62, 0.0  ;;  %v1472_v15 = vadd.f32 %v1471_v29, %v3678_v38 }
 0x3ea   :  { %v1473_v1 = vpop.f32.mrf.mxu1 }
 0x3eb   :  { %v4076_v19 = vpack.c.bf16 %v1543_v20, %v1541_v0  ;;  %v1474_v41 = vadd.f32 %v1473_v1, %v3678_v38  ;;  %v1544_v11 = vmax.f32 %v1472_v15, 0.0 }
 0x3ec   :  { %v1475_v63 = vpop.f32.mrf.mxu1 }
 0x3ed   :  { %v1476_v49 = vadd.f32 %v1475_v63, %v3680_v39  ;;  %v1545_v35 = vmax.f32 %v1474_v41, 0.0 }
 0x3ee   :  { %v1477_v50 = vpop.f32.mrf.mxu1 }
 0x3ef   :  { %v1546_v17 = vmax.f32 %v1476_v49, 0.0  ;;  %v1478_v44 = vadd.f32 %v1477_v50, %v3680_v39  ;;  %v4906_v49 = vld [vmem:[#allocation11_spill] sm:$0xff] }
 0x3f0   :  { %v4082_v48 = vpop.f32.mrf.mxu1 }
 0x3f1   :  { %v4084_v55 = vpack.c.bf16 %v1546_v17, %v1544_v11  ;;  %v1547_v47 = vmax.f32 %v1478_v44, 0.0 }
 0x3f2   :  { %v4086_v61 = vpop.f32.mrf.mxu1 }
 0x3f3   :  { %v4088_v28 = vpack.c.bf16 %v1547_v47, %v1545_v35 }
 0x3f4   :  { %v4090_v45 = vpop.f32.mrf.mxu1 }
 0x3f6   :  { %v4092_v38 = vpop.f32.mrf.mxu1 }
 0x3f8   :  { %v4094_v51 = vpop.f32.mrf.mxu1 }
 0x3fa   :  { %v1493_v13 = vpop.f32.mrf.mxu1 }
 0x3fc   :  { %v1495_v37 = vpop.f32.mrf.mxu1 }
 0x3fe   :  { %v1497_v14 = vpop.f32.mrf.mxu1 }
 0x400   :  { %v1501_v39 = vpop.f32.mrf.mxu1 }
 0x402   :  { %v1503_v53 = vpop.f32.mrf.mxu1 }
 0x404   :  { %v1505_v3 = vpop.f32.mrf.mxu1 }
 0x406   :  { %v1507_v43 = vpop.f32.mrf.mxu1 }
 0x408   :  { %v1511_v23 = vpop.f32.mrf.mxu1 }
 0x40a   :  { %v1513_v52 = vpop.f32.mrf.mxu1 }
 0x40c   :  { %v1515_v25 = vpop.f32.mrf.mxu1 }
 0x40e   :  { %v1517_v2 = vpop.f32.mrf.mxu1 }
 0x40f   :  { %v1518_v36 = vadd.f32 %v1517_v2, %v3664_v30  ;;  %v1512_v2 = vadd.f32 %v1511_v23, %v4907_v60 }
 0x410   :  { %v1521_v62 = vpop.f32.mrf.mxu1 }
 0x412   :  { %v1523_v29 = vpop.f32.mrf.mxu1 }
 0x413   :  { %v1524_v35 = vadd.f32 %v1523_v29, %v3658_v26 }
 0x414   :  { %v1525_v0 = vpop.f32.mrf.mxu1 }
 0x415   :  { %v1526_v31 = vadd.f32 %v1525_v0, %v3660_v27  ;;  %v1565_v58 = vmax.f32 %v1524_v35, 0.0 }
 0x416   :  { %v1527_v20 = vpop.f32.mrf.mxu1 }
 0x417   :  { %v1528_v41 = vadd.f32 %v1527_v20, %v3660_v27  ;;  %v1522_v20 = vadd.f32 %v1521_v62, %v3658_v26  ;;  %v1566_v29 = vmax.f32 %v1526_v31, 0.0  ;;  %v1563_v27 = vmax.f32 %v1518_v36, 0.0 }
 0x418   :  { %v1531_v1 = vpop.f32.mrf.mxu1 }
 0x419   :  { %v1532_v17 = vadd.f32 %v1531_v1, %v4906_v49  ;;  %v1567_v40 = vmax.f32 %v1528_v41, 0.0  ;;  %v1564_v41 = vmax.f32 %v1522_v20, 0.0 }
 0x41a   :  { %v1533_v15 = vpop.f32.mrf.mxu1 }
 0x41b   :  { %v1534_v50 = vadd.f32 %v1533_v15, %v4906_v49  ;;  %v1568_v15 = vmax.f32 %v1532_v17, 0.0  ;;  %v1516_v49 = vadd.f32 %v1515_v25, %v3664_v30  ;;  %v1585_v0 = vpack.c.bf16 %v1567_v40, %v1565_v58  ;;  %v4910_v30 = vld [vmem:[#allocation16_spill] sm:$0xff]  ;;  %v4911_v40 = vld [vmem:[#allocation15_spill] sm:$0xff] }
 0x41c   :  { %v1535_v63 = vpop.f32.mrf.mxu1  ;;  %v1498_v31 = vadd.f32 %v1497_v14, %v4910_v30  ;;  %v1560_v58 = vmax.f32 %v1512_v2, 0.0  ;;  %v1492_v14 = vadd.f32 %v4094_v51, %v4911_v40  ;;  %v3283_v2 = vld [vmem:[%s4769_s5 + $0x30] sm:$0xff]  }
 0x41d   :  { %v1536_v11 = vadd.f32 %v1535_v63, %v3656_v24  ;;  %v1569_v46 = vmax.f32 %v1534_v50, 0.0  ;;  %v1514_v63 = vadd.f32 %v1513_v52, %v4907_v60  ;;  %v4909_v50 = vld [vmem:[#allocation13_spill] sm:$0xff]  ;;  %v1494_v60 = vadd.f32 %v1493_v13, %v4911_v40 }
 0x41e   :  { %v1537_v44 = vpop.f32.mrf.mxu1  ;;  %v1504_v26 = vadd.f32 %v1503_v53, %v4909_v50  ;;  %v1502_v36 = vadd.f32 %v1501_v39, %v4909_v50  ;;  %v1555_v17 = vmax.f32 %v1498_v31, 0.0  ;;  %v4913_v39 = vld [vmem:[#allocation17_spill] sm:$0xff]  ;;  %v3285_v50 = vld [vmem:[%s4769_s5 + $0x40] sm:$0xff]  }
 0x41f   :  { %v1538_v47 = vadd.f32 %v1537_v44, %v3656_v24  ;;  %v1570_v34 = vmax.f32 %v1536_v11, 0.0  ;;  %v4908_v24 = vld [vmem:[#allocation14_spill] sm:$0xff]  ;;  %v1561_v62 = vmax.f32 %v1514_v63, 0.0  ;;  %v1484_v20 = vadd.f32 %v4086_v61, %v4913_v39  ;;  %v3288_v31 = vld [vmem:[%s4769_s5 + $0x78] sm:$0xff]  }
 0x420   :  { %v1508_v44 = vadd.f32 %v1507_v43, %v4908_v24  ;;  %v1506_v52 = vadd.f32 %v1505_v3, %v4908_v24  ;;  %v1557_v43 = vmax.f32 %v1504_v26, 0.0  ;;  %v4912_v11 = vld [vmem:[#allocation18_spill] sm:$0xff]  ;;  %v1553_v13 = vmax.f32 %v1494_v60, 0.0  ;;  %v3286_v26 = vld [vmem:[%s4769_s5 + $0x48] sm:$0xff]  }
 0x421   :  { %v1571_v12 = vmax.f32 %v1538_v47, 0.0  ;;  %v1586_v21 = vpack.c.bf16 %v1570_v34, %v1568_v15  ;;  %v1583_v25 = vpack.c.bf16 %v1563_v27, %v1561_v62  ;;  %v1488_v3 = vadd.f32 %v4092_v38, %v4912_v11  ;;  %v3287_v62 = vld [vmem:[%s4769_s5 + $0x50] sm:$0xff]  }
 0x422   :  { %v1559_v34 = vmax.f32 %v1508_v44, 0.0  ;;  %v1558_v53 = vmax.f32 %v1506_v52, 0.0  ;;  %v1556_v47 = vmax.f32 %v1502_v36, 0.0  ;;  %v1482_v38 = vadd.f32 %v4082_v48, %v4913_v39  ;;  %v3277_v48 = vld [vmem:[%s4769_s5] sm:$0xff]   ;;  %v4914_v52 = vld [vmem:[#allocation19_spill] sm:$0xff] }
 0x423   :  { %v1587_v1 = vpack.c.bf16 %v1571_v12, %v1569_v46  ;;  %v1562_v12 = vmax.f32 %v1516_v49, 0.0  ;;  %v1584_v46 = vpack.c.bf16 %v1566_v29, %v1564_v41  ;;  %v1579_v49 = vpack.c.bf16 %v1555_v17, %v1553_v13  ;;  %v3284_v41 = vld [vmem:[%s4769_s5 + $0x38] sm:$0xff]  }
 0x424   :  { %v1581_v35 = vpack.c.bf16 %v1559_v34, %v1557_v43  ;;  %v1580_v63 = vpack.c.bf16 %v1558_v53, %v1556_v47  ;;  %v1552_v29 = vmax.f32 %v1492_v14, 0.0  ;;  %v1549_v51 = vmax.f32 %v1484_v20, 0.0  ;;  %v4919_v53 = vld [vmem:[#allocation35_spill] sm:$0xff]  ;;  %v4920_v47 = vld [vmem:[#allocation33_spill] sm:$0xff] }
 0x425   :  { %1588 = vmatprep.subr.bf16.mxu0 %v1587_v1  ;;  %v1582_v23 = vpack.c.bf16 %v1562_v12, %v1560_v58  ;;  %v1551_v1 = vmax.f32 %v1488_v3, 0.0  ;;  %v1548_v61 = vmax.f32 %v1482_v38, 0.0  ;;  %v4915_v12 = vld [vmem:[#allocation20_spill] sm:$0xff] }
 0x426   :  { %1589 = vmatpush1.bf16.msra.mxu0 %v1586_v21  ;;  %v1496_v21 = vadd.f32 %v1495_v37, %v4910_v30  ;;  %v1486_v37 = vadd.f32 %v4090_v45, %v4912_v11  ;;  %v3278_v45 = vld [vmem:[%s4769_s5 + $0x8] sm:$0xff]   ;;  %v4917_v30 = vld [vmem:[#allocation22_spill] sm:$0xff] }
 0x427   :  { %1590 = vmatprep.subr.bf16.mxu0 %v1585_v0  ;;  %v1577_v27 = vpack.c.bf16 %v1551_v1, %v1549_v51 }
 0x428   :  { %v1554_v15 = vmax.f32 %v1496_v21, 0.0  ;;  %v1550_v24 = vmax.f32 %v1486_v37, 0.0 }
 0x42a   :  { %1591 = vmatpush1.bf16.msra.mxu0 %v1584_v46  ;;  %v1578_v44 = vpack.c.bf16 %v1554_v15, %v1552_v29  ;;  %v1576_v0 = vpack.c.bf16 %v1550_v24, %v1548_v61  ;;  %v4916_v46 = vld [vmem:[#allocation21_spill] sm:$0xff] }
 0x42b   :  { %1592 = vmatprep.subr.bf16.mxu0 %v1583_v25  ;;  %v4918_v25 = vld [vmem:[#allocation37_spill] sm:$0xff] }
 0x42e   :  { %1593 = vmatpush1.bf16.msra.mxu0 %v1582_v23 }
 0x42f   :  { %1594 = vmatprep.subr.bf16.mxu0 %v1581_v35 }
 0x432   :  { %1595 = vmatpush1.bf16.msra.mxu0 %v1580_v63 }
 0x433   :  { %1596 = vmatprep.subr.bf16.mxu0 %v1579_v49  ;;  %v4921_v49 = vld [vmem:[#allocation31_spill] sm:$0xff] }
 0x436   :  { %1597 = vmatpush1.bf16.msra.mxu0 %v1578_v44 }
 0x437   :  { %1598 = vmatprep.subr.bf16.mxu0 %v1577_v27 }
 0x43a   :  { %1599 = vmatpush1.bf16.msra.mxu0 %v1576_v0  ;;  %v4922_v0 = vld [vmem:[#allocation29_spill] sm:$0xff] }
 0x43b   :  { %1600 = vmatprep.subr.bf16.mxu0 %v4088_v28  ;;  %v3282_v28 = vld [vmem:[%s4769_s5 + $0x28] sm:$0xff]  }
 0x43e   :  { %1601 = vmatpush1.bf16.msra.mxu0 %v4084_v55  ;;  %v3281_v55 = vld [vmem:[%s4769_s5 + $0x20] sm:$0xff]  }
 0x43f   :  { %1602 = vmatprep.subr.bf16.mxu0 %v4076_v19  ;;  %v3279_v19 = vld [vmem:[%s4769_s5 + $0x10] sm:$0xff]  }
 0x442   :  { %1603 = vmatpush1.bf16.msra.mxu0 %v4074_v33  ;;  %v3280_v33 = vld [vmem:[%s4769_s5 + $0x18] sm:$0xff]  }
 0x445   :  { %1621 = vmatmul.mubr.bf16.vlgmr.msra.gmra.mxu0 %v3277_v48 }
 0x446   :  { %1630 = vmatprep.mubr.bf16.mxu0 %v4865_v16 }
 0x44d   :  { %1631 = vmatmul.mubr.bf16.gmra.mxu0 %v3278_v45 }
 0x44e   :  { %1640 = vmatprep.mubr.bf16.mxu0 %v4865_v16 }
 0x455   :  { %1641 = vmatmul.mubr.bf16.gmra.mxu0 %v3279_v19 }
 0x456   :  { %1650 = vmatprep.mubr.bf16.mxu0 %v4865_v16 }
 0x45d   :  { %1651 = vmatmul.mubr.bf16.gmra.mxu0 %v3280_v33 }
 0x45e   :  { %1660 = vmatprep.mubr.bf16.mxu0 %v4865_v16 }
 0x465   :  { %1661 = vmatmul.mubr.bf16.gmra.mxu0 %v3281_v55 }
 0x466   :  { %1670 = vmatprep.mubr.bf16.mxu0 %v4865_v16 }
 0x46d   :  { %1671 = vmatmul.mubr.bf16.gmra.mxu0 %v3282_v28 }
 0x46e   :  { %1680 = vmatprep.mubr.bf16.mxu0 %v4865_v16 }
 0x475   :  { %1681 = vmatmul.mubr.bf16.gmra.mxu0 %v3283_v2 }
 0x476   :  { %1690 = vmatprep.mubr.bf16.mxu0 %v4865_v16 }
 0x47d   :  { %1691 = vmatmul.mubr.bf16.gmra.mxu0 %v3284_v41  ;;  %v4923_v41 = vld [vmem:[#allocation27_spill] sm:$0xff] }
 0x47e   :  { %1700 = vmatprep.mubr.bf16.mxu0 %v4865_v16 }
 0x485   :  { %1701 = vmatmul.mubr.bf16.gmra.mxu0 %v3285_v50 }
 0x486   :  { %1710 = vmatprep.mubr.bf16.mxu0 %v4865_v16 }
 0x48d   :  { %1711 = vmatmul.mubr.bf16.gmra.mxu0 %v3286_v26 }
 0x48e   :  { %1720 = vmatprep.mubr.bf16.mxu0 %v4865_v16 }
 0x495   :  { %1721 = vmatmul.mubr.bf16.gmra.mxu0 %v3287_v62 }
 0x496   :  { %1730 = vmatprep.mubr.bf16.mxu0 %v4865_v16 }
 0x49d   :  { %1731 = vmatmul.mubr.bf16.gmra.mxu0 %v4914_v52 }
 0x49e   :  { %1740 = vmatprep.mubr.bf16.mxu0 %v4865_v16 }
 0x4a5   :  { %1741 = vmatmul.mubr.bf16.gmra.mxu0 %v4915_v12 }
 0x4a6   :  { %1750 = vmatprep.mubr.bf16.mxu0 %v4865_v16 }
 0x4ad   :  { %1751 = vmatmul.mubr.bf16.gmra.mxu0 %v4916_v46 }
 0x4ae   :  { %1760 = vmatprep.mubr.bf16.mxu0 %v4865_v16 }
 0x4b5   :  { %1761 = vmatmul.mubr.bf16.gmra.mxu0 %v4917_v30 }
 0x4b6   :  { %1770 = vmatprep.mubr.bf16.mxu0 %v4865_v16 }
 0x4bd   :  { %1771 = vmatmul.mubr.bf16.gmra.mxu0 %v3288_v31  ;;  %v4924_v31 = vld [vmem:[#allocation26_spill] sm:$0xff] }
 0x505   :  { %v1622_v34 = vpop.f32.mrf.mxu0 }
 0x506   :  { %v1623_v36 = vadd.f32 %v1622_v34, %v4918_v25 }
 0x507   :  { %v1624_v58 = vpop.f32.mrf.mxu0 }
 0x508   :  { %v1625_v40 = vadd.f32 %v1624_v58, %v4918_v25  ;;  %v1781_v43 = vmax.f32 %v1623_v36, 0.0 }
 0x509   :  { %v1626_v60 = vpop.f32.mrf.mxu0 }
 0x50a   :  { %v1782_v21 = vmax.f32 %v1625_v40, 0.0  ;;  %v1627_v23 = vadd.f32 %v1626_v60, %v4919_v53 }
 0x50b   :  { %v1628_v11 = vpop.f32.mrf.mxu0 }
 0x50c   :  { %v4187_v3 = vmax.f32 %v1781_v43, %v1782_v21  ;;  %v1629_v16 = vadd.f32 %v1628_v11, %v4919_v53  ;;  %v1783_v35 = vmax.f32 %v1627_v23, 0.0  ;;  %v4925_v21 = vld [vmem:[#allocation25_spill] sm:$0xff] }
 0x50d   :  { %v1632_v17 = vpop.f32.mrf.mxu0 }
 0x50e   :  { %v1784_v14 = vmax.f32 %v1629_v16, 0.0  ;;  %v1633_v39 = vadd.f32 %v1632_v17, %v4920_v47 }
 0x50f   :  { %v1634_v20 = vpop.f32.mrf.mxu0 }
 0x510   :  { %v4191_v13 = vmax.f32 %v1783_v35, %v1784_v14  ;;  %v1635_v37 = vadd.f32 %v1634_v20, %v4920_v47  ;;  %v1785_v63 = vmax.f32 %v1633_v39, 0.0  ;;  %v4926_v39 = vld [vmem:[#allocation24_spill] sm:$0xff] }
 0x511   :  { %v1636_v15 = vpop.f32.mrf.mxu0 }
 0x512   :  { %v1786_v1 = vmax.f32 %v1635_v37, 0.0  ;;  %v1637_v38 = vadd.f32 %v1636_v15, %v4921_v49 }
 0x513   :  { %v1638_v29 = vpop.f32.mrf.mxu0 }
 0x514   :  { %v4195_v51 = vmax.f32 %v1785_v63, %v1786_v1  ;;  %v1639_v24 = vadd.f32 %v1638_v29, %v4921_v49  ;;  %v1787_v27 = vmax.f32 %v1637_v38, 0.0 }
 0x515   :  { %v1642_v44 = vpop.f32.mrf.mxu0 }
 0x516   :  { %v1788_v61 = vmax.f32 %v1639_v24, 0.0  ;;  %v1643_v48 = vadd.f32 %v1642_v44, %v4922_v0  ;;  %v4927_v24 = vld [vmem:[#allocation23_spill] sm:$0xff] }
 0x517   :  { %v1644_v45 = vpop.f32.mrf.mxu0 }
 0x518   :  { %v4199_v19 = vmax.f32 %v1787_v27, %v1788_v61  ;;  %v1645_v33 = vadd.f32 %v1644_v45, %v4922_v0  ;;  %v1789_v28 = vmax.f32 %v1643_v48, 0.0 }
 0x519   :  { %v1646_v55 = vpop.f32.mrf.mxu0 }
 0x51a   :  { %v1790_v2 = vmax.f32 %v1645_v33, 0.0  ;;  %v1647_v50 = vadd.f32 %v1646_v55, %v4923_v41 }
 0x51b   :  { %v1648_v26 = vpop.f32.mrf.mxu0 }
 0x51c   :  { %v1649_v62 = vadd.f32 %v1648_v26, %v4923_v41  ;;  %v1857_v52 = vmax.f32 %v1789_v28, %v1790_v2  ;;  %v1791_v46 = vmax.f32 %v1647_v50, 0.0 }
 0x51d   :  { %v1652_v12 = vpop.f32.mrf.mxu0 }
 0x51e   :  { %v1792_v30 = vmax.f32 %v1649_v62, 0.0  ;;  %v1653_v34 = vadd.f32 %v1652_v12, %v4924_v31  ;;  %1858 = vmax.xlane.f32.xlu0 %v1857_v52 }
 0x51f   :  { %v1654_v25 = vpop.f32.mrf.mxu0 }
 0x520   :  { %v1655_v36 = vadd.f32 %v1654_v25, %v4924_v31  ;;  %v1860_v58 = vmax.f32 %v1791_v46, %v1792_v30  ;;  %v1793_v60 = vmax.f32 %v1653_v34, 0.0 }
 0x521   :  { %v1656_v40 = vpop.f32.mrf.mxu0 }
 0x522   :  { %v1794_v43 = vmax.f32 %v1655_v36, 0.0  ;;  %v1657_v23 = vadd.f32 %v1656_v40, %v4925_v21  ;;  %1861 = vmax.xlane.f32.xlu0 %v1860_v58 }
 0x523   :  { %v1658_v11 = vpop.f32.mrf.mxu0 }
 0x524   :  { %v1659_v16 = vadd.f32 %v1658_v11, %v4925_v21  ;;  %v1863_v17 = vmax.f32 %v1793_v60, %v1794_v43  ;;  %v1795_v14 = vmax.f32 %v1657_v23, 0.0 }
 0x525   :  { %v1662_v35 = vpop.f32.mrf.mxu0 }
 0x526   :  { %v1796_v47 = vmax.f32 %v1659_v16, 0.0  ;;  %v1663_v20 = vadd.f32 %v1662_v35, %v4926_v39  ;;  %1864 = vmax.xlane.f32.xlu0 %v1863_v17 }
 0x527   :  { %v1664_v37 = vpop.f32.mrf.mxu0 }
 0x528   :  { %v1665_v15 = vadd.f32 %v1664_v37, %v4926_v39  ;;  %v1866_v63 = vmax.f32 %v1795_v14, %v1796_v47  ;;  %v1797_v38 = vmax.f32 %v1663_v20, 0.0 }
 0x529   :  { %v1666_v1 = vpop.f32.mrf.mxu0 }
 0x52a   :  { %v1798_v29 = vmax.f32 %v1665_v15, 0.0  ;;  %v1667_v44 = vadd.f32 %v1666_v1, %v4927_v24  ;;  %1867 = vmax.xlane.f32.xlu0 %v1866_v63 }
 0x52b   :  { %v1668_v27 = vpop.f32.mrf.mxu0 }
 0x52c   :  { %v1669_v61 = vadd.f32 %v1668_v27, %v4927_v24  ;;  %v1869_v0 = vmax.f32 %v1797_v38, %v1798_v29  ;;  %v1799_v45 = vmax.f32 %v1667_v44, 0.0 }
 0x52d   :  { %v1672_v48 = vpop.f32.mrf.mxu0 }
 0x52e   :  { %v1800_v33 = vmax.f32 %v1669_v61, 0.0  ;;  %v1673_v55 = vadd.f32 %v1672_v48, %v3862_v59  ;;  %1870 = vmax.xlane.f32.xlu0 %v1869_v0 }
 0x52f   :  { %v1674_v28 = vpop.f32.mrf.mxu0 }
 0x530   :  { %v1675_v2 = vadd.f32 %v1674_v28, %v3862_v59  ;;  %v1872_v41 = vmax.f32 %v1799_v45, %v1800_v33  ;;  %v1801_v26 = vmax.f32 %v1673_v55, 0.0 }
 0x531   :  { %v1676_v50 = vpop.f32.mrf.mxu0 }
 0x532   :  { %v1802_v62 = vmax.f32 %v1675_v2, 0.0  ;;  %v1677_v52 = vadd.f32 %v1676_v50, %v3860_v8  ;;  %1873 = vmax.xlane.f32.xlu0 %v1872_v41 }
 0x533   :  { %v1678_v12 = vpop.f32.mrf.mxu0 }
 0x534   :  { %v1679_v46 = vadd.f32 %v1678_v12, %v3860_v8  ;;  %v1875_v30 = vmax.f32 %v1801_v26, %v1802_v62  ;;  %v1803_v34 = vmax.f32 %v1677_v52, 0.0 }
 0x535   :  { %v1682_v31 = vpop.f32.mrf.mxu0 }
 0x536   :  { %v1804_v25 = vmax.f32 %v1679_v46, 0.0  ;;  %v1683_v36 = vadd.f32 %v1682_v31, %v3858_v56  ;;  %1876 = vmax.xlane.f32.xlu0 %v1875_v30 }
 0x537   :  { %v1684_v58 = vpop.f32.mrf.mxu0 }
 0x538   :  { %v1685_v59 = vadd.f32 %v1684_v58, %v3858_v56  ;;  %v1878_v40 = vmax.f32 %v1803_v34, %v1804_v25  ;;  %v1805_v43 = vmax.f32 %v1683_v36, 0.0 }
 0x539   :  { %v1686_v60 = vpop.f32.mrf.mxu0 }
 0x53a   :  { %v1806_v21 = vmax.f32 %v1685_v59, 0.0  ;;  %v1687_v23 = vadd.f32 %v1686_v60, %v3855_v7  ;;  %1879 = vmax.xlane.f32.xlu0 %v1878_v40 }
 0x53b   :  { %v1688_v11 = vpop.f32.mrf.mxu0 }
 0x53c   :  { %v1689_v8 = vadd.f32 %v1688_v11, %v3855_v7  ;;  %v1881_v16 = vmax.f32 %v1805_v43, %v1806_v21  ;;  %v1807_v35 = vmax.f32 %v1687_v23, 0.0 }
 0x53d   :  { %v1692_v17 = vpop.f32.mrf.mxu0 }
 0x53e   :  { %v1808_v14 = vmax.f32 %v1689_v8, 0.0  ;;  %v1693_v47 = vadd.f32 %v1692_v17, %v3847_v4  ;;  %1882 = vmax.xlane.f32.xlu0 %v1881_v16 }
 0x53f   :  { %v1694_v39 = vpop.f32.mrf.mxu0 }
 0x540   :  { %v1695_v56 = vadd.f32 %v1694_v39, %v3847_v4  ;;  %v1884_v20 = vmax.f32 %v1807_v35, %v1808_v14  ;;  %v1809_v15 = vmax.f32 %v1693_v47, 0.0 }
 0x541   :  { %v1696_v37 = vpop.f32.mrf.mxu0 }
 0x542   :  { %v1810_v63 = vmax.f32 %v1695_v56, 0.0  ;;  %v1697_v1 = vadd.f32 %v1696_v37, %v3843_v18  ;;  %1885 = vmax.xlane.f32.xlu0 %v1884_v20 }
 0x543   :  { %v1698_v38 = vpop.f32.mrf.mxu0 }
 0x544   :  { %v1699_v7 = vadd.f32 %v1698_v38, %v3843_v18  ;;  %v1887_v29 = vmax.f32 %v1809_v15, %v1810_v63  ;;  %v1811_v44 = vmax.f32 %v1697_v1, 0.0 }
 0x545   :  { %v1702_v24 = vpop.f32.mrf.mxu0 }
 0x546   :  { %v1812_v27 = vmax.f32 %v1699_v7, 0.0  ;;  %v1703_v61 = vadd.f32 %v1702_v24, %v3998_v54  ;;  %1888 = vmax.xlane.f32.xlu0 %v1887_v29 }
 0x547   :  { %v1704_v0 = vpop.f32.mrf.mxu0 }
 0x548   :  { %v1705_v4 = vadd.f32 %v1704_v0, %v3998_v54  ;;  %v1890_v48 = vmax.f32 %v1811_v44, %v1812_v27  ;;  %v1813_v33 = vmax.f32 %v1703_v61, 0.0 }
 0x549   :  { %v1706_v45 = vpop.f32.mrf.mxu0 }
 0x54a   :  { %v1814_v55 = vmax.f32 %v1705_v4, 0.0  ;;  %v1707_v28 = vadd.f32 %v1706_v45, %v3990_v32  ;;  %1891 = vmax.xlane.f32.xlu0 %v1890_v48 }
 0x54b   :  { %v1708_v2 = vpop.f32.mrf.mxu0 }
 0x54c   :  { %v4227_v41 = vmax.f32 %v1813_v33, %v1814_v55  ;;  %v1709_v18 = vadd.f32 %v1708_v2, %v3990_v32  ;;  %v1815_v26 = vmax.f32 %v1707_v28, 0.0 }
 0x54d   :  { %v4230_v50 = vpop.f32.mrf.mxu0 }
 0x54e   :  { %v1816_v62 = vmax.f32 %v1709_v18, 0.0 }
 0x54f   :  { %v4232_v52 = vpop.f32.mrf.mxu0 }
 0x550   :  { %v4234_v12 = vmax.f32 %v1815_v26, %v1816_v62  ;;  %v4928_v62 = vld [vmem:[#allocation36_spill] sm:$0xff] }
 0x551   :  { %v4236_v54 = vpop.f32.mrf.mxu0 }
 0x553   :  { %v4238_v46 = vpop.f32.mrf.mxu0 }
 0x555   :  { %v1722_v30 = vpop.f32.mrf.mxu0 }
 0x556   :  { %v1723_v31 = vadd.f32 %v1722_v30, %v3960_v9 }
 0x557   :  { %v1724_v34 = vpop.f32.mrf.mxu0 }
 0x558   :  { %v1725_v25 = vadd.f32 %v1724_v34, %v3960_v9  ;;  %v1821_v32 = vmax.f32 %v1723_v31, 0.0 }
 0x559   :  { %v1726_v36 = vpop.f32.mrf.mxu0 }
 0x55a   :  { %v1822_v58 = vmax.f32 %v1725_v25, 0.0  ;;  %v1727_v59 = vadd.f32 %v1726_v36, %v3946_v6 }
 0x55b   :  { %v1728_v40 = vpop.f32.mrf.mxu0 }
 0x55c   :  { %v1729_v60 = vadd.f32 %v1728_v40, %v3946_v6  ;;  %v1905_v43 = vmax.f32 %v1821_v32, %v1822_v58  ;;  %v1823_v23 = vmax.f32 %v1727_v59, 0.0  ;;  %v4929_v58 = vld [vmem:[#allocation34_spill] sm:$0xff] }
 0x55d   :  { %v1732_v21 = vpop.f32.mrf.mxu0 }
 0x55e   :  { %v1824_v11 = vmax.f32 %v1729_v60, 0.0  ;;  %v1733_v8 = vadd.f32 %v1732_v21, %v3941_v57  ;;  %1906 = vmax.xlane.f32.xlu0 %v1905_v43 }
 0x55f   :  { %v1734_v16 = vpop.f32.mrf.mxu0 }
 0x560   :  { %v1735_v17 = vadd.f32 %v1734_v16, %v3941_v57  ;;  %v1908_v35 = vmax.f32 %v1823_v23, %v1824_v11  ;;  %v1825_v14 = vmax.f32 %v1733_v8, 0.0  ;;  %v4930_v11 = vld [vmem:[#allocation32_spill] sm:$0xff] }
 0x561   :  { %v1736_v9 = vpop.f32.mrf.mxu0 }
 0x562   :  { %v1826_v47 = vmax.f32 %v1735_v17, 0.0  ;;  %v1737_v39 = vadd.f32 %v1736_v9, %v3936_v42  ;;  %1909 = vmax.xlane.f32.xlu0 %v1908_v35 }
 0x563   :  { %v1738_v56 = vpop.f32.mrf.mxu0 }
 0x564   :  { %v1739_v6 = vadd.f32 %v1738_v56, %v3936_v42  ;;  %v1911_v20 = vmax.f32 %v1825_v14, %v1826_v47  ;;  %v1827_v15 = vmax.f32 %v1737_v39, 0.0  ;;  %v4931_v39 = vld [vmem:[#allocation30_spill] sm:$0xff] }
 0x565   :  { %v1742_v37 = vpop.f32.mrf.mxu0 }
 0x566   :  { %v1828_v63 = vmax.f32 %v1739_v6, 0.0  ;;  %v1743_v1 = vadd.f32 %v1742_v37, %v3924_v10  ;;  %1912 = vmax.xlane.f32.xlu0 %v1911_v20  ;;  %v4932_v20 = vld [vmem:[#allocation4_spill] sm:$0xff] }
 0x567   :  { %v1744_v38 = vpop.f32.mrf.mxu0  ;;  %v1719_v37 = vadd.f32 %v4238_v46, %v4932_v20 }
 0x568   :  { %v1745_v57 = vadd.f32 %v1744_v38, %v3924_v10  ;;  %v1914_v7 = vmax.f32 %v1827_v15, %v1828_v63  ;;  %v1829_v24 = vmax.f32 %v1743_v1, 0.0  ;;  %v1717_v38 = vadd.f32 %v4236_v54, %v4932_v20 }
 0x569   :  { %v1746_v29 = vpop.f32.mrf.mxu0 }
 0x56a   :  { %v1830_v44 = vmax.f32 %v1745_v57, 0.0  ;;  %v1747_v27 = vadd.f32 %v1746_v29, %v3910_v5  ;;  %1915 = vmax.xlane.f32.xlu0 %v1914_v7  ;;  %v4933_v29 = vld [vmem:[#allocation28_spill] sm:$0xff] }
 0x56b   :  { %v1748_v61 = vpop.f32.mrf.mxu0 }
 0x56c   :  { %v1749_v42 = vadd.f32 %v1748_v61, %v3910_v5  ;;  %v1917_v0 = vmax.f32 %v1829_v24, %v1830_v44  ;;  %v1831_v48 = vmax.f32 %v1747_v27, 0.0  ;;  %v1820_v27 = vmax.f32 %v1719_v37, 0.0  ;;  %v200_v37 = vld [vmem:[%s4771_s8 + $0x58] sm:$0xff] }
 0x56d   :  { %v1752_v4 = vpop.f32.mrf.mxu0 }
 0x56e   :  { %v1832_v45 = vmax.f32 %v1749_v42, 0.0  ;;  %v1753_v33 = vadd.f32 %v1752_v4, %v3896_v22  ;;  %1918 = vmax.xlane.f32.xlu0 %v1917_v0  ;;  %v1819_v0 = vmax.f32 %v1717_v38, 0.0 }
 0x56f   :  { %v1754_v55 = vpop.f32.mrf.mxu0 }
 0x570   :  { %v1755_v10 = vadd.f32 %v1754_v55, %v3896_v22  ;;  %v1920_v28 = vmax.f32 %v1831_v48, %v1832_v45  ;;  %v1833_v18 = vmax.f32 %v1753_v33, 0.0  ;;  %v4934_v48 = vld [vmem:[#allocation42_spill] sm:$0xff]  ;;  %v4935_v33 = vld [vmem:[#allocation3_spill] sm:$0xff]  ;;  %v1902_v55 = vmax.f32 %v1819_v0, %v1820_v27  ;;  %v192_v0 = vld [vmem:[%s4771_s8 + $0x18] sm:$0xff] }
 0x571   :  { %v1756_v2 = vpop.f32.mrf.mxu0  ;;  %v1017_v45 = vadd.f32 %v4934_v48, %v4921_v49  ;;  %v1715_v54 = vadd.f32 %v4232_v52, %v4935_v33 }
 0x572   :  { %v1834_v26 = vmax.f32 %v1755_v10, 0.0  ;;  %v1757_v30 = vadd.f32 %v1756_v2, %v4928_v62  ;;  %1921 = vmax.xlane.f32.xlu0 %v1920_v28  ;;  %v4936_v28 = vld [vmem:[#allocation41_spill] sm:$0xff] }
 0x573   :  { %v1758_v31 = vpop.f32.mrf.mxu0  ;;  %v1015_v2 = vadd.f32 %v4936_v28, %v4921_v49  ;;  %v4938_v49 = vld [vmem:[#allocation2_spill] sm:$0xff] }
 0x574   :  { %v1759_v5 = vadd.f32 %v1758_v31, %v4928_v62  ;;  %v1923_v34 = vmax.f32 %v1833_v18, %v1834_v26  ;;  %v1835_v36 = vmax.f32 %v1757_v30, 0.0  ;;  %v1713_v18 = vadd.f32 %v4230_v50, %v4935_v33  ;;  %v4939_v50 = vld [vmem:[#allocation39_spill] sm:$0xff]  ;;  %v191_v33 = vld [vmem:[%s4771_s8 + $0x10] sm:$0xff]  ;;  %v189_v28 = vld [vmem:[%s4771_s8] sm:$0xff] }
 0x575   :  { %v1762_v25 = vpop.f32.mrf.mxu0  ;;  %v1166_v26 = vmax.f32 %v1017_v45, 0.0  ;;  %v1818_v62 = vmax.f32 %v1715_v54, 0.0  ;;  %v1165_v30 = vmax.f32 %v1015_v2, 0.0  ;;  %v190_v45 = vld [vmem:[%s4771_s8 + $0x8] sm:$0xff] }
 0x576   :  { %v1836_v32 = vmax.f32 %v1759_v5, 0.0  ;;  %v1763_v59 = vadd.f32 %v1762_v25, %v4929_v58  ;;  %1924 = vmax.xlane.f32.xlu0 %v1923_v34  ;;  %v1817_v31 = vmax.f32 %v1713_v18, 0.0  ;;  %v4937_v5 = vld [vmem:[#allocation8_spill] sm:$0xff]  ;;  %v4278_v25 = vpop.xlane.xlu1 %1314  ;;  %v218_v18 = vld [vmem:[%s4772_s10 + $0x28] sm:$0xff] }
 0x577   :  { %v1764_v40 = vpop.f32.mrf.mxu0  ;;  %v1232_v52 = vmax.f32 %v1165_v30, %v1166_v26  ;;  %v219_v26 = vld [vmem:[%s4772_s10 + $0x30] sm:$0xff]  ;;  %v216_v30 = vld [vmem:[%s4772_s10 + $0x18] sm:$0xff] }
 0x578   :  { %v1926_v60 = vmax.f32 %v1835_v36, %v1836_v32  ;;  %v1765_v22 = vadd.f32 %v1764_v40, %v4929_v58  ;;  %v1837_v21 = vmax.f32 %v1763_v59, 0.0  ;;  %v1899_v34 = vmax.f32 %v1817_v31, %v1818_v62  ;;  %v4940_v58 = vld [vmem:[#allocation38_spill] sm:$0xff]  ;;  %v4941_v59 = vld [vmem:[#allocation43_spill] sm:$0xff] }
 0x579   :  { %v1766_v43 = vpop.f32.mrf.mxu0  ;;  %v1007_v36 = vadd.f32 %v4939_v50, %v4919_v53 }
 0x57a   :  { %v1838_v23 = vmax.f32 %v1765_v22, 0.0  ;;  %v1767_v8 = vadd.f32 %v1766_v43, %v4930_v11  ;;  %1927 = vmax.xlane.f32.xlu0 %v1926_v60  ;;  %v4284_v32 = vpop.xlane.xlu1 %1236  ;;  %v4942_v22 = vld [vmem:[#allocation6_spill] sm:$0xff] }
 0x57b   :  { %v1768_v16 = vpop.f32.mrf.mxu0  ;;  %v1162_v40 = vmax.f32 %v1007_v36, 0.0  ;;  %v222_v36 = vld [vmem:[%s4773_s12] sm:$0x3f] }
 0x57c   :  { %v1929_v17 = vmax.f32 %v1837_v21, %v1838_v23  ;;  %v1769_v35 = vadd.f32 %v1768_v16, %v4930_v11  ;;  %v1839_v14 = vmax.f32 %v1767_v8, 0.0 }
 0x57d   :  { %v1772_v9 = vpop.f32.mrf.mxu0 }
 0x57e   :  { %v1840_v47 = vmax.f32 %v1769_v35, 0.0  ;;  %v1773_v56 = vadd.f32 %v1772_v9, %v4931_v39  ;;  %1930 = vmax.xlane.f32.xlu0 %v1929_v17  ;;  %v4294_v43 = vpop.xlane.xlu1 %1239 }
 0x57f   :  { %v1774_v6 = vpop.f32.mrf.mxu0 }
 0x580   :  { %v1932_v15 = vmax.f32 %v1839_v14, %v1840_v47  ;;  %v1775_v63 = vadd.f32 %v1774_v6, %v4931_v39  ;;  %v1841_v57 = vmax.f32 %v1773_v56, 0.0  ;;  %v204_v47 = vld [vmem:[%s4771_s8 + $0x78] sm:$0xff]  ;;  %v203_v39 = vld [vmem:[%s4771_s8 + $0x70] sm:$0xff]  ;;  %v202_v6 = vld [vmem:[%s4771_s8 + $0x68] sm:$0xff] }
 0x581   :  { %v1776_v1 = vpop.f32.mrf.mxu0 }
 0x582   :  { %v1842_v7 = vmax.f32 %v1775_v63, 0.0  ;;  %v1777_v24 = vadd.f32 %v1776_v1, %v4933_v29  ;;  %1933 = vmax.xlane.f32.xlu0 %v1932_v15  ;;  %v201_v63 = vld [vmem:[%s4771_s8 + $0x60] sm:$0xff]  ;;  %v198_v1 = vld [vmem:[%s4771_s8 + $0x48] sm:$0xff] }
 0x583   :  { %v1778_v44 = vpop.f32.mrf.mxu0 }
 0x584   :  { %v1935_v61 = vmax.f32 %v1841_v57, %v1842_v7  ;;  %v1779_v42 = vadd.f32 %v1778_v44, %v4933_v29  ;;  %v1843_v4 = vmax.f32 %v1777_v24, 0.0  ;;  %v199_v29 = vld [vmem:[%s4771_s8 + $0x50] sm:$0xff]  ;;  %v196_v24 = vld [vmem:[%s4771_s8 + $0x38] sm:$0xff]  ;;  %v197_v44 = vld [vmem:[%s4771_s8 + $0x40] sm:$0xff] }
 0x586   :  { %v1844_v46 = vmax.f32 %v1779_v42, 0.0  ;;  %1936 = vmax.xlane.f32.xlu0 %v1935_v61  ;;  %v194_v61 = vld [vmem:[%s4771_s8 + $0x28] sm:$0xff]  ;;  %v195_v42 = vld [vmem:[%s4771_s8 + $0x30] sm:$0xff] }
 0x588   :  { %v1938_v10 = vmax.f32 %v1843_v4, %v1844_v46  ;;  %v193_v46 = vld [vmem:[%s4771_s8 + $0x20] sm:$0xff] }
 0x58a   :  { %1903 = vmax.xlane.f32.xlu0 %v1902_v55  ;;  %1939 = vmax.xlane.f32.xlu1 %v1938_v10  ;;  %v220_v55 = vld [vmem:[%s4772_s10 + $0x38] sm:$0xff] }
 0x58e   :  { %1855 = vmax.xlane.f32.xlu0 %v4199_v19  ;;  %1281 = vmax.xlane.f32.xlu1 %v4937_v5  ;;  %v1005_v19 = vadd.f32 %v4940_v58, %v4919_v53  ;;  %v4299_v53 = vpop.xlane.xlu1 %1242  ;;  %v217_v5 = vld [vmem:[%s4772_s10 + $0x20] sm:$0xff] }
 0x590   :  { %v1161_v60 = vmax.f32 %v1005_v19, 0.0  ;;  %v213_v19 = vld [vmem:[%s4772_s10] sm:$0xff] }
 0x592   :  { %1900 = vmax.xlane.f32.xlu0 %v1899_v34  ;;  %1233 = vmax.xlane.f32.xlu1 %v1232_v52  ;;  %v1226_v21 = vmax.f32 %v1161_v60, %v1162_v40  ;;  %v4306_v8 = vpop.xlane.xlu1 %1245  ;;  %v214_v34 = vld [vmem:[%s4772_s10 + $0x8] sm:$0xff] }
 0x596   :  { %1852 = vmax.xlane.f32.xlu0 %v4195_v51  ;;  %1278 = vmax.xlane.f32.xlu1 %v4938_v49  ;;  %v4292_v51 = vpop.xlane.xlu0 %1317  ;;  %v215_v49 = vld [vmem:[%s4772_s10 + $0x10] sm:$0xff] }
 0x59a   :  { %1897 = vmax.xlane.f32.xlu0 %v4234_v12  ;;  %1230 = vmax.xlane.f32.xlu1 %v4941_v59  ;;  %v4297_v23 = vpop.xlane.xlu0 %1269  ;;  %v4943_v12 = vld [vmem:[#allocation5_spill] sm:$0xff] }
 0x59e   :  { %1849 = vmax.xlane.f32.xlu0 %v4191_v13  ;;  %1275 = vmax.xlane.f32.xlu1 %v4942_v22  ;;  %v4944_v13 = vld [vmem:[#allocation40_spill] sm:$0xff] }
 0x5a2   :  { %1894 = vmax.xlane.f32.xlu0 %v4227_v41  ;;  %1227 = vmax.xlane.f32.xlu1 %v1226_v21  ;;  %v4312_v41 = vpop.xlane.xlu1 %1248 }
 0x5a6   :  { %1846 = vmax.xlane.f32.xlu0 %v4187_v3  ;;  %1272 = vmax.xlane.f32.xlu1 %v4943_v12  ;;  %v158_v3 = vld [vmem:[%s4770_s7 + $0x8] sm:$0xff]  ;;  %v4319_v9 = vpop.xlane.xlu1 %1251 }
 0x5a7   :  { %v4303_v11 = vpop.xlane.xlu0 %1858  ;;  %2118 = vmatprep.mubr.f32.mxu1 %v158_v3 }
 0x5aa   :  { %1224 = vmax.xlane.f32.xlu1 %v4944_v13  ;;  %v4334_v20 = vpop.xlane.xlu1 %1254 }
 0x5ab   :  { %v4308_v16 = vpop.xlane.xlu0 %1861 }
 0x5ae   :  { %v1258_v38 = vpop.xlane.xlu1 %1257 }
 0x5af   :  { %v4310_v17 = vpop.xlane.xlu0 %1864 }
 0x5b2   :  { %v4359_v27 = vpop.xlane.xlu1 %1260 }
 0x5b3   :  { %v4314_v35 = vpop.xlane.xlu0 %1867 }
 0x5b6   :  { %v4370_v4 = vpop.xlane.xlu1 %1263 }
 0x5b7   :  { %v4321_v14 = vpop.xlane.xlu0 %1870 }
 0x5ba   :  { %v1267_v54 = vpop.xlane.xlu1 %1266 }
 0x5bb   :  { %v4329_v56 = vpop.xlane.xlu0 %1873  ;;  %2051 = vperm.xlu1 %3237, %v204_v47  }
 0x5bc   :  { %2046 = vperm.xlu0 %3236, %v203_v39  }
 0x5be   :  { %v4389_v2 = vpop.xlane.xlu1 %1284 }
 0x5bf   :  { %v4339_v15 = vpop.xlane.xlu0 %1876  ;;  %2041 = vperm.xlu1 %3237, %v202_v6  }
 0x5c0   :  { %2031 = vperm.xlu0 %3236, %v200_v37  }
 0x5c2   :  { %v4400_v31 = vpop.xlane.xlu1 %1287 }
 0x5c3   :  { %v1880_v57 = vpop.xlane.xlu0 %1879  ;;  %2036 = vperm.xlu1 %3237, %v201_v63  }
 0x5c4   :  { %v4348_v7 = vsel %vm1941_vm3, %v1258_v38, %v1880_v57  ;;  %2021 = vperm.xlu0 %3236, %v198_v1  }
 0x5c6   :  { %v4411_v50 = vpop.xlane.xlu1 %1290 }
 0x5c7   :  { %2026 = vperm.xlu1 %3237, %v199_v29   ;;  %v4375_v48 = vpop.xlane.xlu0 %1882 }
 0x5c8   :  { %2011 = vperm.xlu0 %3236, %v196_v24  }
 0x5ca   :  { %v1294_v59 = vpop.xlane.xlu1 %1293 }
 0x5cb   :  { %2016 = vperm.xlu1 %3237, %v197_v44   ;;  %v1886_v10 = vpop.xlane.xlu0 %1885 }
 0x5cc   :  { %2001 = vperm.xlu0 %3236, %v194_v61  }
 0x5ce   :  { %v1297_v22 = vpop.xlane.xlu1 %1296 }
 0x5cf   :  { %2006 = vperm.xlu1 %3237, %v195_v42   ;;  %v1889_v62 = vpop.xlane.xlu0 %1888 }
 0x5d0   :  { %1991 = vperm.xlu0 %3236, %v192_v0  }
 0x5d2   :  { %v1300_v12 = vpop.xlane.xlu1 %1299 }
 0x5d3   :  { %1996 = vperm.xlu1 %3237, %v193_v46   ;;  %v1892_v52 = vpop.xlane.xlu0 %1891  ;;  %v1956_v46 = vsel %vm1941_vm3, %v1267_v54, %v1889_v62 }
 0x5d4   :  { %1981 = vperm.xlu0 %3236, %v190_v45   ;;  %v1957_v42 = vsel %vm1941_vm3, %v4297_v23, %v1892_v52  ;;  %v1954_v23 = vsel %vm1941_vm3, %v4359_v27, %v4375_v48  ;;  %v1951_v48 = vsel %vm1941_vm3, %v4319_v9, %v4329_v56  ;;  %v1948_v56 = vsel %vm1941_vm3, %v4299_v53, %v4310_v17 }
 0x5d5   :  { %v1946_v53 = vsel %vm1941_vm3, %v4284_v32, %v4303_v11 }
 0x5d6   :  { %v1303_v47 = vpop.xlane.xlu1 %1302 }
 0x5d7   :  { %1986 = vperm.xlu1 %3237, %v191_v33  }
 0x5d8   :  { %2252 = vperm.xlu0 %3236, %v220_v55  }
 0x5da   :  { %v1306_v6 = vpop.xlane.xlu1 %1305 }
 0x5db   :  { %1976 = vperm.xlu1 %3237, %v189_v28   ;;  %v1955_v28 = vsel %vm1941_vm3, %v4370_v4, %v1886_v10  ;;  %v1952_v4 = vsel %vm1941_vm3, %v4334_v20, %v4339_v15 }
 0x5dc   :  { %2242 = vperm.xlu0 %3236, %v218_v18  }
 0x5de   :  { %v1309_v1 = vpop.xlane.xlu1 %1308 }
 0x5df   :  { %2247 = vperm.xlu1 %3237, %v219_v26  }
 0x5e0   :  { %2232 = vperm.xlu0 %3236, %v216_v30   ;;  %v1950_v30 = vsel %vm1941_vm3, %v4312_v41, %v4321_v14 }
 0x5e2   :  { %v1312_v57 = vpop.xlane.xlu1 %1311 }
 0x5e3   :  { %2237 = vperm.xlu1 %3237, %v217_v5  }
 0x5e4   :  { %2222 = vperm.xlu0 %3236, %v214_v34   ;;  %v1949_v34 = vsel %vm1941_vm3, %v4306_v8, %v4314_v35  ;;  %v1947_v8 = vsel %vm1941_vm3, %v4294_v43, %v4308_v16 }
 0x5e7   :  { %v4416_v58 = vpop.xlane.xlu0 %1906  ;;  %2227 = vperm.xlu1 %3237, %v215_v49  }
 0x5e8   :  { %2370 = vperm.xlu0 %3236, %v222_v36   ;;  %v1962_v35 = vsel %vm1941_vm3, %v4389_v2, %v4416_v58 }
 0x5eb   :  { %v4421_v40 = vpop.xlane.xlu0 %1909  ;;  %2217 = vperm.xlu1 %3237, %v213_v19  }
 0x5ec   :  { %v1963_v52 = vsel %vm1941_vm3, %v4400_v31, %v4421_v40 }
 0x5ef   :  { %v1913_v60 = vpop.xlane.xlu0 %1912 }
 0x5f0   :  { %v1964_v9 = vsel %vm1941_vm3, %v4411_v50, %v1913_v60  ;;  %v160_v60 = vld [vmem:[%s4770_s7 + $0x18] sm:$0xff] }
 0x5f3   :  { %v1916_v21 = vpop.xlane.xlu0 %1915 }
 0x5f4   :  { %v1965_v15 = vsel %vm1941_vm3, %v1294_v59, %v1916_v21  ;;  %v157_v59 = vld [vmem:[%s4770_s7] sm:$0xff]  ;;  %v162_v21 = vld [vmem:[%s4770_s7 + $0x28] sm:$0xff] }
 0x5f7   :  { %v1919_v13 = vpop.xlane.xlu0 %1918 }
 0x5fb   :  { %v1922_v3 = vpop.xlane.xlu0 %1921 }
 0x5fc   :  { %v1967_v27 = vsel %vm1941_vm3, %v1300_v12, %v1922_v3  ;;  %v161_v12 = vld [vmem:[%s4770_s7 + $0x20] sm:$0xff]  ;;  %v163_v3 = vld [vmem:[%s4770_s7 + $0x30] sm:$0xff] }
 0x5ff   :  { %v1925_v39 = vpop.xlane.xlu0 %1924 }
 0x600   :  { %v1968_v26 = vsel %vm1941_vm3, %v1303_v47, %v1925_v39  ;;  %v166_v47 = vld [vmem:[%s4770_s7 + $0x48] sm:$0xff]  ;;  %v165_v39 = vld [vmem:[%s4770_s7 + $0x40] sm:$0xff] }
 0x603   :  { %v1928_v37 = vpop.xlane.xlu0 %1927 }
 0x604   :  { %v1969_v18 = vsel %vm1941_vm3, %v1306_v6, %v1928_v37  ;;  %v168_v6 = vld [vmem:[%s4770_s7 + $0x58] sm:$0xff]  ;;  %v167_v37 = vld [vmem:[%s4770_s7 + $0x50] sm:$0xff] }
 0x607   :  { %v1931_v63 = vpop.xlane.xlu0 %1930 }
 0x60b   :  { %v1934_v38 = vpop.xlane.xlu0 %1933 }
 0x60c   :  { %v1971_v55 = vsel %vm1941_vm3, %v1312_v57, %v1934_v38  ;;  %v172_v38 = vld [vmem:[%s4770_s7 + $0x78] sm:$0xff]  ;;  %v171_v57 = vld [vmem:[%s4770_s7 + $0x70] sm:$0xff] }
 0x60f   :  { %v1937_v29 = vpop.xlane.xlu0 %1936 }
 0x610   :  { %v1972_v0 = vsel %vm1941_vm3, %v4278_v25, %v1937_v29  ;;  %v174_v29 = vld [vmem:[%s4770_s7 + $0x88] sm:$0xff] }
 0x613   :  { %v1904_v24 = vpop.xlane.xlu0 %1903  ;;  %v1940_v44 = vpop.xlane.xlu1 %1939 }
 0x614   :  { %v1973_v61 = vsel %vm1941_vm3, %v4292_v51, %v1940_v44  ;;  %v1970_v51 = vsel %vm1941_vm3, %v1309_v1, %v1931_v63  ;;  %v170_v63 = vld [vmem:[%s4770_s7 + $0x68] sm:$0xff]  ;;  %v169_v1 = vld [vmem:[%s4770_s7 + $0x60] sm:$0xff]  ;;  %v176_v44 = vld [vmem:[%s4770_s7 + $0x98] sm:$0xff] }
 0x615   :  { %3038 = vmatprep.subr.mxu1 %v1973_v61  ;;  %v175_v61 = vld [vmem:[%s4770_s7 + $0x90] sm:$0xff] }
 0x616   :  { %3039 = vmatpush3.msra.mxu1 %v1957_v42  ;;  %v178_v42 = vld [vmem:[%s4770_s7 + $0xa8] sm:$0xff] }
 0x617   :  { %v1856_v45 = vpop.xlane.xlu0 %1855  ;;  %3040 = vmatprep.subr.mxu1 %v1972_v0  ;;  %v1282_v33 = vpop.xlane.xlu1 %1281  ;;  %v177_v0 = vld [vmem:[%s4770_s7 + $0xa0] sm:$0xff] }
 0x618   :  { %3041 = vmatpush3.msra.mxu1 %v1956_v46  ;;  %v1961_v49 = vsel %vm1941_vm3, %v1282_v33, %v1904_v24  ;;  %v173_v24 = vld [vmem:[%s4770_s7 + $0x80] sm:$0xff]  ;;  %v180_v46 = vld [vmem:[%s4770_s7 + $0xb8] sm:$0xff]  ;;  %v182_v33 = vld [vmem:[%s4770_s7 + $0xc8] sm:$0xff] }
 0x619   :  { %3042 = vmatprep.subr.mxu1 %v1971_v55  ;;  %v181_v55 = vld [vmem:[%s4770_s7 + $0xc0] sm:$0xff] }
 0x61a   :  { %3043 = vmatpush3.msra.mxu1 %v1955_v28  ;;  %v184_v28 = vld [vmem:[%s4770_s7 + $0xd8] sm:$0xff] }
 0x61b   :  { %v1901_v25 = vpop.xlane.xlu0 %1900  ;;  %3044 = vmatprep.subr.mxu1 %v1970_v51  ;;  %v1234_v54 = vpop.xlane.xlu1 %1233  ;;  %v183_v51 = vld [vmem:[%s4770_s7 + $0xd0] sm:$0xff] }
 0x61c   :  { %3045 = vmatpush3.msra.mxu1 %v1954_v23  ;;  %v1945_v31 = vsel %vm1941_vm3, %v1234_v54, %v1856_v45  ;;  %v179_v45 = vld [vmem:[%s4770_s7 + $0xb0] sm:$0xff]  ;;  %v186_v23 = vld [vmem:[%s4770_s7 + $0xe8] sm:$0xff]  ;;  %v188_v54 = vld [vmem:[%s4770_s7 + $0xf8] sm:$0xff] }
 0x61d   :  { %3046 = vmatprep.subr.mxu1 %v1969_v18  ;;  %v187_v18 = vld [vmem:[%s4770_s7 + $0xf0] sm:$0xff] }
 0x61e   :  { %3047 = vmatpush3.msra.mxu1 %v4348_v7  ;;  %v1966_v7 = vsel %vm1941_vm3, %v1297_v22, %v1919_v13  ;;  %v159_v22 = vld [vmem:[%s4770_s7 + $0x10] sm:$0xff]  ;;  %v164_v13 = vld [vmem:[%s4770_s7 + $0x38] sm:$0xff] }
 0x61f   :  { %v1853_v10 = vpop.xlane.xlu0 %1852  ;;  %3048 = vmatprep.subr.mxu1 %v1968_v26  ;;  %v1279_v62 = vpop.xlane.xlu1 %1278  ;;  %v205_v26 = vld [vmem:[%s4774_s9] sm:$0xff] }
 0x620   :  { %3049 = vmatpush3.msra.mxu1 %v1952_v4  ;;  %v1960_v43 = vsel %vm1941_vm3, %v1279_v62, %v1901_v25  ;;  %v185_v25 = vld [vmem:[%s4770_s7 + $0xe0] sm:$0xff] }
 0x621   :  { %3050 = vmatprep.subr.mxu1 %v1967_v27 }
 0x622   :  { %3051 = vmatpush3.msra.mxu1 %v1951_v48 }
 0x623   :  { %v1898_v5 = vpop.xlane.xlu0 %1897  ;;  %3052 = vmatprep.subr.mxu1 %v1966_v7  ;;  %v1231_v20 = vpop.xlane.xlu1 %1230 }
 0x624   :  { %3053 = vmatpush3.msra.mxu1 %v1950_v30  ;;  %v1944_v16 = vsel %vm1941_vm3, %v1231_v20, %v1853_v10 }
 0x625   :  { %3054 = vmatprep.subr.mxu1 %v1965_v15 }
 0x626   :  { %3055 = vmatpush3.msra.mxu1 %v1949_v34 }
 0x627   :  { %v1850_v41 = vpop.xlane.xlu0 %1849  ;;  %3056 = vmatprep.subr.mxu1 %v1964_v9  ;;  %v1276_v14 = vpop.xlane.xlu1 %1275 }
 0x628   :  { %3057 = vmatpush3.msra.mxu1 %v1948_v56  ;;  %v1959_v36 = vsel %vm1941_vm3, %v1276_v14, %v1898_v5 }
 0x629   :  { %3058 = vmatprep.subr.mxu1 %v1963_v52 }
 0x62a   :  { %3059 = vmatpush3.msra.mxu1 %v1947_v8 }
 0x62b   :  { %3060 = vmatprep.subr.mxu1 %v1962_v35  ;;  %v1228_v17 = vpop.xlane.xlu1 %1227  ;;  %v1895_v50 = vpop.xlane.xlu0 %1894 }
 0x62c   :  { %3061 = vmatpush3.msra.mxu1 %v1946_v53  ;;  %v1943_v32 = vsel %vm1941_vm3, %v1228_v17, %v1850_v41 }
 0x62d   :  { %3062 = vmatprep.subr.mxu1 %v1961_v49 }
 0x62e   :  { %3063 = vmatpush3.msra.mxu1 %v1945_v31 }
 0x62f   :  { %3064 = vmatprep.subr.mxu1 %v1960_v43  ;;  %v1273_v2 = vpop.xlane.xlu1 %1272  ;;  %v1847_v58 = vpop.xlane.xlu0 %1846 }
 0x630   :  { %3065 = vmatpush3.msra.mxu1 %v1944_v16  ;;  %v1958_v11 = vsel %vm1941_vm3, %v1273_v2, %v1895_v50 }
 0x631   :  { %3066 = vmatprep.subr.mxu1 %v1959_v36 }
 0x632   :  { %3067 = vmatpush3.msra.mxu1 %v1943_v32 }
 0x633   :  { %3068 = vmatprep.subr.mxu1 %v1958_v11  ;;  %v1225_v19 = vpop.xlane.xlu1 %1224 }
 0x634   :  { %v1942_v40 = vsel %vm1941_vm3, %v1225_v19, %v1847_v58 }
 0x635   :  { %3069 = vmatpush3.msra.mxu1 %v1942_v40 }
 0x636   :  { %2119 = vmatmul.mubr.f32.vlgmr.msra.gmra.mxu1 %v157_v59 }
 0x637   :  { %2123 = vmatprep.mubr.f32.mxu1 %v160_v60  ;;  %v2052_v32 = vpop.permute.xlu1 %2051 }
 0x63a   :  { %2124 = vmatmul.mubr.f32.gmra.mxu1 %v159_v22  ;;  %v2047_v22 = vpop.permute.xlu0 %2046 }
 0x63b   :  { %2128 = vmatprep.mubr.f32.mxu1 %v162_v21  ;;  %v2042_v59 = vpop.permute.xlu1 %2041 }
 0x63e   :  { %2129 = vmatmul.mubr.f32.gmra.mxu1 %v161_v12 }
 0x63f   :  { %2133 = vmatprep.mubr.f32.mxu1 %v164_v13  ;;  %v2037_v12 = vpop.permute.xlu1 %2036 }
 0x642   :  { %2134 = vmatmul.mubr.f32.gmra.mxu1 %v163_v3 }
 0x643   :  { %2138 = vmatprep.mubr.f32.mxu1 %v166_v47  ;;  %v2032_v47 = vpop.permute.xlu0 %2031 }
 0x646   :  { %2139 = vmatmul.mubr.f32.gmra.mxu1 %v165_v39 }
 0x647   :  { %2143 = vmatprep.mubr.f32.mxu1 %v168_v6 }
 0x64a   :  { %2144 = vmatmul.mubr.f32.gmra.mxu1 %v167_v37  ;;  %v2027_v37 = vpop.permute.xlu1 %2026 }
 0x64b   :  { %2148 = vmatprep.mubr.f32.mxu1 %v170_v63 }
 0x64e   :  { %2149 = vmatmul.mubr.f32.gmra.mxu1 %v169_v1 }
 0x64f   :  { %2153 = vmatprep.mubr.f32.mxu1 %v172_v38 }
 0x652   :  { %2154 = vmatmul.mubr.f32.gmra.mxu1 %v171_v57 }
 0x653   :  { %2158 = vmatprep.mubr.f32.mxu1 %v174_v29 }
 0x656   :  { %2159 = vmatmul.mubr.f32.gmra.mxu1 %v173_v24 }
 0x657   :  { %2163 = vmatprep.mubr.f32.mxu1 %v176_v44  ;;  %v2022_v44 = vpop.permute.xlu0 %2021 }
 0x65a   :  { %2164 = vmatmul.mubr.f32.gmra.mxu1 %v175_v61 }
 0x65b   :  { %2168 = vmatprep.mubr.f32.mxu1 %v178_v42 }
 0x65e   :  { %2169 = vmatmul.mubr.f32.gmra.mxu1 %v177_v0 }
 0x65f   :  { %2173 = vmatprep.mubr.f32.mxu1 %v180_v46  ;;  %v2017_v46 = vpop.permute.xlu1 %2016 }
 0x662   :  { %2174 = vmatmul.mubr.f32.gmra.mxu1 %v179_v45 }
 0x663   :  { %2178 = vmatprep.mubr.f32.mxu1 %v182_v33 }
 0x666   :  { %2179 = vmatmul.mubr.f32.gmra.mxu1 %v181_v55 }
 0x667   :  { %2183 = vmatprep.mubr.f32.mxu1 %v184_v28 }
 0x66a   :  { %2184 = vmatmul.mubr.f32.gmra.mxu1 %v183_v51 }
 0x66b   :  { %2188 = vmatprep.mubr.f32.mxu1 %v186_v23 }
 0x66e   :  { %2189 = vmatmul.mubr.f32.gmra.mxu1 %v185_v25  ;;  %v2012_v25 = vpop.permute.xlu0 %2011 }
 0x66f   :  { %2193 = vmatprep.mubr.f32.mxu1 %v188_v54 }
 0x672   :  { %2194 = vmatmul.mubr.f32.gmra.mxu1 %v187_v18 }
 0x673   :  { %3183 = vmatprep.mubr.f32.mxu1 %v205_v26 }
 0x6f6   :  { %v3070_v4 = vpop.f32.mrf.mxu1 }
 0x6f8   :  { %v3071_v10 = vpop.f32.mrf.mxu1 }
 0x6f9   :  { %v4576_v62 = vadd.f32 %v3071_v10, %v3070_v4  ;;  %v2007_v4 = vpop.permute.xlu1 %2006 }
 0x6fa   :  { %v3073_v27 = vpop.f32.mrf.mxu1 }
 0x6fc   :  { %v3074_v48 = vpop.f32.mrf.mxu1 }
 0x6fd   :  { %v4578_v7 = vadd.f32 %v3074_v48, %v3073_v27 }
 0x6fe   :  { %v3076_v30 = vpop.f32.mrf.mxu1 }
 0x700   :  { %v3077_v5 = vpop.f32.mrf.mxu1 }
 0x701   :  { %v4580_v20 = vadd.f32 %v3077_v5, %v3076_v30 }
 0x702   :  { %v3079_v15 = vpop.f32.mrf.mxu1 }
 0x704   :  { %v3080_v34 = vpop.f32.mrf.mxu1 }
 0x705   :  { %v4582_v9 = vadd.f32 %v3080_v34, %v3079_v15  ;;  %v2002_v34 = vpop.permute.xlu0 %2001 }
 0x706   :  { %v3082_v56 = vpop.f32.mrf.mxu1 }
 0x708   :  { %v3083_v41 = vpop.f32.mrf.mxu1 }
 0x709   :  { %v4584_v14 = vadd.f32 %v3083_v41, %v3082_v56 }
 0x70a   :  { %v4586_v52 = vpop.f32.mrf.mxu1 }
 0x70c   :  { %v4588_v8 = vpop.f32.mrf.mxu1 }
 0x70d   :  { %v3087_v56 = vadd.f32 %v4588_v8, %v4586_v52 }
 0x70e   :  { %v3088_v35 = vpop.f32.mrf.mxu1 }
 0x710   :  { %v3089_v53 = vpop.f32.mrf.mxu1 }
 0x711   :  { %v3090_v30 = vadd.f32 %v3089_v53, %v3088_v35  ;;  %v1992_v35 = vpop.permute.xlu0 %1991 }
 0x712   :  { %v3091_v17 = vpop.f32.mrf.mxu1  ;;  %v2136_v52 = vadd.f32 %v4582_v9, %v1992_v35 }
 0x714   :  { %v3092_v49 = vpop.f32.mrf.mxu1 }
 0x715   :  { %v3093_v10 = vadd.f32 %v3092_v49, %v3091_v17  ;;  %v2146_v49 = vadd.f32 %v3087_v56, %v2002_v34  ;;  %v221_v56 = vld [vmem:[%s4775_s11] sm:$0x3f]  ;;  %s3294_s11 = smov 127  }
 0x716   :  { %v3094_v31 = vpop.f32.mrf.mxu1 }
 0x717   :  { %v2156_v41 = vadd.f32 %v3093_v10, %v2012_v25  ;;  %v2204_v8 = vmax.f32 %v2146_v49, 0.0 }
 0x718   :  { %v3095_v50 = vpop.f32.mrf.mxu1 }
 0x719   :  { %v3096_v54 = vadd.f32 %v3095_v50, %v3094_v31  ;;  %v1997_v50 = vpop.permute.xlu1 %1996 }
 0x71a   :  { %v3097_v43 = vpop.f32.mrf.mxu1  ;;  %v2141_v53 = vadd.f32 %v4584_v14, %v1997_v50  ;;  %v4638_v50 = vld [vmem:[%s4764_s0] sm:$0x3f] }
 0x71b   :  { %v2161_v5 = vadd.f32 %v3096_v54, %v2017_v46 }
 0x71c   :  { %v3098_v16 = vpop.f32.mrf.mxu1 }
 0x71d   :  { %v3099_v28 = vadd.f32 %v3098_v16, %v3097_v43  ;;  %v2151_v43 = vadd.f32 %v3090_v30, %v2007_v4  ;;  %v2207_v17 = vmax.f32 %v2161_v5, 0.0  ;;  %v2206_v16 = vmax.f32 %v2156_v41, 0.0  ;;  %v3289_v41 = vld [vmem:[%s4764_s0 + $0x8] sm:$0x3f] }
 0x71e   :  { %v3100_v2 = vpop.f32.mrf.mxu1 }
 0x71f   :  { %v2166_v27 = vadd.f32 %v3099_v28, %v2022_v44 }
 0x720   :  { %v3101_v36 = vpop.f32.mrf.mxu1 }
 0x721   :  { %v3102_v45 = vadd.f32 %v3101_v36, %v3100_v2  ;;  %v2208_v31 = vmax.f32 %v2166_v27, 0.0  ;;  %v2205_v2 = vmax.f32 %v2151_v43, 0.0  ;;  %v1987_v36 = vpop.permute.xlu1 %1986 }
 0x722   :  { %v3103_v11 = vpop.f32.mrf.mxu1 }
 0x723   :  { %v2171_v18 = vadd.f32 %v3102_v45, %v2027_v37 }
 0x724   :  { %v3104_v58 = vpop.f32.mrf.mxu1 }
 0x725   :  { %v3105_v61 = vadd.f32 %v3104_v58, %v3103_v11  ;;  %v2209_v15 = vmax.f32 %v2171_v18, 0.0  ;;  %v2203_v11 = vmax.f32 %v2141_v53, 0.0  ;;  %v1982_v58 = vpop.permute.xlu0 %1981  ;;  %v1977_v14 = vpop.permute.xlu1 %1976 }
 0x726   :  { %v3106_v19 = vpop.f32.mrf.mxu1 }
 0x727   :  { %v2176_v51 = vadd.f32 %v3105_v61, %v2032_v47  ;;  %v3292_v47 = vmov 0.0  }
 0x728   :  { %v3107_v40 = vpop.f32.mrf.mxu1 }
 0x729   :  { %v3108_v57 = vadd.f32 %v3107_v40, %v3106_v19  ;;  %v2210_v48 = vmax.f32 %v2176_v51, 0.0  ;;  %v2126_v19 = vadd.f32 %v4578_v7, %v1982_v58  ;;  %v2121_v40 = vadd.f32 %v4576_v62, %v1977_v14  ;;  %v207_v7 = vld [vmem:[%s4774_s9 + $0x10] sm:$0xff]  ;;  %v208_v62 = vld [vmem:[%s4774_s9 + $0x18] sm:$0xff]  ;;  %v2253_v37 = vpop.permute.xlu0 %2252 }
 0x72a   :  { %v3109_v60 = vpop.f32.mrf.mxu1 }
 0x72b   :  { %v2181_v33 = vadd.f32 %v3108_v57, %v2037_v12  ;;  %v2200_v9 = vmax.f32 %v2126_v19, 0.0  ;;  %v210_v12 = vld [vmem:[%s4774_s9 + $0x28] sm:$0xff] }
 0x72c   :  { %v3110_v21 = vpop.f32.mrf.mxu1 }
 0x72d   :  { %v3111_v1 = vadd.f32 %v3110_v21, %v3109_v60  ;;  %v2211_v26 = vmax.f32 %v2181_v33, 0.0  ;;  %v209_v21 = vld [vmem:[%s4774_s9 + $0x20] sm:$0xff] }
 0x72e   :  { %v3112_v13 = vpop.f32.mrf.mxu1 }
 0x72f   :  { %v2186_v42 = vadd.f32 %v3111_v1, %v2042_v59  ;;  %v2202_v59 = vmax.f32 %v2136_v52, 0.0  ;;  %v2248_v1 = vpop.permute.xlu1 %2247 }
 0x730   :  { %v3113_v3 = vpop.f32.mrf.mxu1 }
 0x731   :  { %v3114_v6 = vadd.f32 %v3113_v3, %v3112_v13  ;;  %v2212_v23 = vmax.f32 %v2186_v42, 0.0  ;;  %v211_v13 = vld [vmem:[%s4774_s9 + $0x30] sm:$0xff]  ;;  %v212_v3 = vld [vmem:[%s4774_s9 + $0x38] sm:$0xff] }
 0x732   :  { %v3115_v39 = vpop.f32.mrf.mxu1 }
 0x733   :  { %v2191_v29 = vadd.f32 %v3114_v6, %v2047_v22  ;;  %v2199_v22 = vmax.f32 %v2121_v40, 0.0  ;;  %v2238_v44 = vpop.permute.xlu1 %2237 }
 0x734   :  { %v3116_v63 = vpop.f32.mrf.mxu1 }
 0x735   :  { %v3117_v38 = vadd.f32 %v3116_v63, %v3115_v39  ;;  %v2213_v55 = vmax.f32 %v2191_v29, 0.0  ;;  %v2243_v29 = vpop.permute.xlu0 %2242 }
 0x737   :  { %v2196_v24 = vadd.f32 %v3117_v38, %v2052_v32  ;;  %v2131_v32 = vadd.f32 %v4580_v20, %v1987_v36  ;;  %v206_v20 = vld [vmem:[%s4774_s9 + $0x8] sm:$0xff] }
 0x739   :  { %v2214_v0 = vmax.f32 %v2196_v24, 0.0  ;;  %v2201_v60 = vmax.f32 %v2131_v32, 0.0 }
 0x73b   :  { %3151 = vmatprep.subr.mxu1 %v2214_v0 }
 0x73c   :  { %3152 = vmatpush3.msra.mxu1 %v2214_v0 }
 0x73d   :  { %3153 = vmatprep.subr.mxu1 %v2213_v55 }
 0x73e   :  { %3154 = vmatpush3.msra.mxu1 %v2213_v55  ;;  %v2233_v55 = vpop.permute.xlu0 %2232 }
 0x73f   :  { %3155 = vmatprep.subr.mxu1 %v2212_v23 }
 0x740   :  { %3156 = vmatpush3.msra.mxu1 %v2212_v23  ;;  %v2228_v23 = vpop.permute.xlu1 %2227 }
 0x741   :  { %3157 = vmatprep.subr.mxu1 %v2211_v26 }
 0x742   :  { %3158 = vmatpush3.msra.mxu1 %v2211_v26  ;;  %v2223_v4 = vpop.permute.xlu0 %2222 }
 0x743   :  { %3159 = vmatprep.subr.mxu1 %v2210_v48 }
 0x744   :  { %3160 = vmatpush3.msra.mxu1 %v2210_v48  ;;  %v2218_v48 = vpop.permute.xlu1 %2217 }
 0x745   :  { %3161 = vmatprep.subr.mxu1 %v2209_v15 }
 0x746   :  { %3162 = vmatpush3.msra.mxu1 %v2209_v15  ;;  %v2371_v43 = vpop.permute.xlu0 %2370 }
 0x747   :  { %3163 = vmatprep.subr.mxu1 %v2208_v31 }
 0x748   :  { %3164 = vmatpush3.msra.mxu1 %v2208_v31  ;;  %v2675_v31 = vrot.slane %v3289_v41, 3 }
 0x749   :  { %3165 = vmatprep.subr.mxu1 %v2207_v17 }
 0x74a   :  { %3166 = vmatpush3.msra.mxu1 %v2207_v17 }
 0x74b   :  { %3167 = vmatprep.subr.mxu1 %v2206_v16 }
 0x74c   :  { %3168 = vmatpush3.msra.mxu1 %v2206_v16 }
 0x74d   :  { %3169 = vmatprep.subr.mxu1 %v2205_v2 }
 0x74e   :  { %3170 = vmatpush3.msra.mxu1 %v2205_v2 }
 0x74f   :  { %3171 = vmatprep.subr.mxu1 %v2204_v8 }
 0x750   :  { %3172 = vmatpush3.msra.mxu1 %v2204_v8 }
 0x751   :  { %3173 = vmatprep.subr.mxu1 %v2203_v11 }
 0x752   :  { %3174 = vmatpush3.msra.mxu1 %v2203_v11 }
 0x753   :  { %3175 = vmatprep.subr.mxu1 %v2202_v59 }
 0x754   :  { %3176 = vmatpush3.msra.mxu1 %v2202_v59 }
 0x755   :  { %3177 = vmatprep.subr.mxu1 %v2201_v60 }
 0x756   :  { %3178 = vmatpush3.msra.mxu1 %v2201_v60 }
 0x757   :  { %3179 = vmatprep.subr.mxu1 %v2200_v9 }
 0x758   :  { %3180 = vmatpush3.msra.mxu1 %v2200_v9 }
 0x759   :  { %3181 = vmatprep.subr.mxu1 %v2199_v22 }
 0x75a   :  { %3182 = vmatpush3.msra.mxu1 %v2199_v22 }
 0x75b   :  { %3184 = vmatmul.mubr.f32.vlgmr.msra.gmra.mxu1 %v206_v20  ;;  %3195 = vmatprep.subr.mxu1 %v3292_v47 }
 0x75c   :  { %3186 = vmatprep.mubr.f32.mxu1 %v207_v7 }
 0x75f   :  { %3187 = vmatmul.mubr.f32.gmra.mxu1 %v208_v62 }
 0x760   :  { %3189 = vmatprep.mubr.f32.mxu1 %v209_v21 }
 0x763   :  { %3190 = vmatmul.mubr.f32.gmra.mxu1 %v210_v12 }
 0x764   :  { %3192 = vmatprep.mubr.f32.mxu1 %v211_v13 }
 0x767   :  { %3193 = vmatmul.mubr.f32.gmra.mxu1 %v212_v3 }
 0x768   :  { %3211 = vmatprep.mubr.msk.f32.mxu1 %vm3293_vm4, %v3292_v47 }
 0x81b   :  { %v3185_v39 = vpop.f32.mrf.mxu1 }
 0x81c   :  { %v2327_v10 = vadd.f32 %v3185_v39, %v2223_v4 }
 0x81d   :  { %v2321_v6 = vpop.f32.mrf.mxu1 }
 0x81e   :  { %v2322_v30 = vadd.f32 %v2321_v6, %v2218_v48  ;;  %v2361_v15 = vmax.f32 %v2327_v10, 0.0 }
 0x81f   :  { %v3188_v63 = vpop.f32.mrf.mxu1 }
 0x820   :  { %v2337_v25 = vadd.f32 %v3188_v63, %v2233_v55  ;;  %v2360_v34 = vmax.f32 %v2322_v30, 0.0 }
 0x821   :  { %v2331_v38 = vpop.f32.mrf.mxu1 }
 0x822   :  { %v2332_v18 = vadd.f32 %v2331_v38, %v2228_v23  ;;  %v2363_v27 = vmax.f32 %v2337_v25, 0.0 }
 0x823   :  { %v3191_v57 = vpop.f32.mrf.mxu1 }
 0x824   :  { %v2347_v46 = vadd.f32 %v3191_v57, %v2243_v29  ;;  %v2362_v5 = vmax.f32 %v2332_v18, 0.0 }
 0x825   :  { %v2341_v24 = vpop.f32.mrf.mxu1 }
 0x826   :  { %v2342_v28 = vadd.f32 %v2341_v24, %v2238_v44  ;;  %v2365_v54 = vmax.f32 %v2347_v46, 0.0 }
 0x827   :  { %v3194_v61 = vpop.f32.mrf.mxu1 }
 0x828   :  { %v2357_v42 = vadd.f32 %v3194_v61, %v2253_v37  ;;  %v2364_v26 = vmax.f32 %v2342_v28, 0.0 }
 0x829   :  { %v2351_v0 = vpop.f32.mrf.mxu1 }
 0x82a   :  { %v2367_v45 = vmax.f32 %v2357_v42, 0.0  ;;  %v2352_v33 = vadd.f32 %v2351_v0, %v2248_v1 }
 0x82c   :  { %v2366_v51 = vmax.f32 %v2352_v33, 0.0  ;;  %3196 = vmatpush3.msra.mxu1 %v2367_v45 }
 0x82d   :  { %3197 = vmatprep.subr.mxu1 %v3292_v47 }
 0x82e   :  { %3198 = vmatpush3.msra.mxu1 %v2366_v51 }
 0x82f   :  { %3199 = vmatprep.subr.mxu1 %v3292_v47 }
 0x830   :  { %3200 = vmatpush3.msra.mxu1 %v2365_v54 }
 0x831   :  { %3201 = vmatprep.subr.mxu1 %v3292_v47 }
 0x832   :  { %3202 = vmatpush3.msra.mxu1 %v2364_v26 }
 0x833   :  { %3203 = vmatprep.subr.mxu1 %v3292_v47 }
 0x834   :  { %3204 = vmatpush3.msra.mxu1 %v2363_v27 }
 0x835   :  { %3205 = vmatprep.subr.mxu1 %v3292_v47 }
 0x836   :  { %3206 = vmatpush3.msra.mxu1 %v2362_v5 }
 0x837   :  { %3207 = vmatprep.subr.mxu1 %v3292_v47 }
 0x838   :  { %3208 = vmatpush3.msra.mxu1 %v2361_v15 }
 0x839   :  { %3209 = vmatprep.subr.mxu1 %v3292_v47 }
 0x83a   :  { %3210 = vmatpush3.msra.mxu1 %v2360_v34 }
 0x83b   :  { %3212 = vmatmul.mubr.msk.f32.vlgmr.msra.gmra.mxu1 %vm524_vm2, %v221_v56  ;;  %3020 = vmatprep.subr.msk.mxu1 %vm300_vm0, %v3289_v41 }
 0x83c   :  { %3021 = vmatpush1.msk.msra.mxu1 %vm300_vm0, %v4638_v50  ;;  %2665 = vmatprep.mubr.f32.mxu1 %v3292_v47 }
 0x83d   :  { %3023 = vmatprep.subr.msk.mxu1 %vm300_vm0, %v2675_v31 }
 0x8fb   :  { %v2442_v17 = vpop.f32.mrf.mxu1 }
 0x8fc   :  { %v2443_v49 = vadd.f32 %v2442_v17, %v2371_v43 }
 0x8fd   :  { %v3213_v16 = vpop.f32.mrf.mxu1 }
 0x8fe   :  { %v2446_v35 = vmul.f32 %v2443_v49, %v2443_v49  ;;  %v2465_v40 = vrot.slane %v2443_v49, 3 }
 0x900   :  { %v2448_v53 = vrot.slane %v2446_v35, 1  ;;  %v2451_v36 = vrot.slane %v2446_v35, 2 }
 0x902   :  { %v2450_v2 = vadd.f32 %v2448_v53, %v2446_v35 }
 0x904   :  { %v2453_v52 = vadd.f32 %v2451_v36, %v2450_v2 }
 0x906   :  { %v2454_v8 = vmax.f32 %v2453_v52, 1e-24 }
 0x908   :  { %3266 = vrsqrt.f32 %v2454_v8 }
 0x915   :  { %v3267_v32 = vpop.eup %3266 }
 0x916   :  { %v2458_v11 = vrot.slane %v3267_v32, 7  ;;  %v2461_v58 = vrot.slane %v3267_v32, 6  ;;  %v4644_v19 = vmul.f32 %v3267_v32, %v2443_v49 }
 0x918   :  { %v4646_v59 = vmul.f32 %v2458_v11, %v2443_v49  ;;  %v4648_v14 = vmul.f32 %v2461_v58, %v2443_v49  ;;  %2760 = vrot.lane.b32.xlu1 %v4644_v19, %s3294_s11  ;;  %v2467_v22 = vmul.f32 %v2465_v40, %v4644_v19 }
 0x91a   :  { %v2468_v60 = vmul.f32 %v2465_v40, %v4646_v59  ;;  %v2473_v9 = vmul.f32 %v2465_v40, %v4648_v14  ;;  %v2484_v12 = vrot.slane %v4646_v59, 1  ;;  %v2492_v13 = vrot.slane %v4648_v14, 2 }
 0x91c   :  { %v2470_v20 = vrot.slane %v2468_v60, 1  ;;  %v2475_v62 = vrot.slane %v2473_v9, 2 }
 0x91e   :  { %v2472_v7 = vadd.f32 %v2470_v20, %v2467_v22  ;;  %v2674_v20 = vrot.slane %v4638_v50, 3 }
 0x920   :  { %v2477_v21 = vadd.f32 %v2475_v62, %v2472_v7 }
 0x922   :  { %v2478_v3 = vmul.f32 %v2477_v21, %v4644_v19  ;;  %v2486_v39 = vmul.f32 %v2484_v12, %v2477_v21  ;;  %v2494_v6 = vmul.f32 %v2492_v13, %v2477_v21 }
 0x924   :  { %v2480_v37 = vrot.slane %v2478_v3, 5  ;;  %v2488_v63 = vrot.slane %v2486_v39, 4  ;;  %v2496_v1 = vrot.slane %v2494_v6, 3 }
 0x926   :  { %v2482_v38 = vsub.f32 %v2443_v49, %v2480_v37  ;;  %v2490_v57 = vsub.f32 %v2443_v49, %v2488_v63  ;;  %v2498_v29 = vsub.f32 %v2443_v49, %v2496_v1  ;;  %v3026_v63 = vld [vmem:[%s4764_s0 + $0x10] sm:$0x3f] }
 0x928   :  { %v2500_v24 = vmul.f32 %v2490_v57, %v2490_v57  ;;  %v2505_v44 = vmul.f32 %v2498_v29, %v2498_v29  ;;  %v2499_v61 = vmul.f32 %v2482_v38, %v2482_v38 }
 0x92a   :  { %v2502_v42 = vrot.slane %v2500_v24, 1  ;;  %v2507_v46 = vrot.slane %v2505_v44, 2 }
 0x92c   :  { %v2504_v0 = vadd.f32 %v2502_v42, %v2499_v61 }
 0x92e   :  { %v2509_v45 = vadd.f32 %v2507_v46, %v2504_v0  ;;  %v2874_v0 = vrot.slane %v3026_v63, 3 }
 0x930   :  { %v2510_v33 = vmax.f32 %v2509_v45, 1e-24 }
 0x932   :  { %3268 = vrsqrt.f32 %v2510_v33 }
 0x93f   :  { %v3269_v55 = vpop.eup %3268 }
 0x940   :  { %v4658_v28 = vmul.f32 %v3269_v55, %v2482_v38  ;;  %v2514_v51 = vrot.slane %v3269_v55, 7  ;;  %v2517_v23 = vrot.slane %v3269_v55, 6 }
 0x942   :  { %v2553_v25 = vrot.slane %v4658_v28, 3  ;;  %v4661_v54 = vmul.f32 %v2514_v51, %v2490_v57  ;;  %v4663_v18 = vmul.f32 %v2517_v23, %v2498_v29  ;;  %v2546_v26 = vrot.slane %v4658_v28, 2 }
 0x943   :  { %v2533_v5 = vrot.slane %v4658_v28, 1 }
 0x944   :  { %2554 = vrot.lane.b32.xlu1 %v2553_v25, %s3295_s24  ;;  %v2565_v4 = vrot.slane %v4661_v54, 3  ;;  %v2543_v10 = vrot.slane %v4661_v54, 4  ;;  %v2548_v27 = vmul.f32 %v2546_v26, %v4646_v59  ;;  %v2521_v48 = vrot.slane %v4663_v18, 4 }
 0x945   :  { %v2525_v30 = vrot.slane %v4661_v54, 2  ;;  %v2536_v15 = vrot.slane %v4663_v18, 5  ;;  %v2576_v34 = vrot.slane %v4663_v18, 3  ;;  %v2535_v35 = vmul.f32 %v2533_v5, %v4648_v14 }
 0x946   :  { %2566 = vrot.lane.b32.xlu0 %v2565_v4, %s3295_s24  ;;  %v2545_v56 = vmul.f32 %v2543_v10, %v4644_v19  ;;  %v2550_v41 = vrot.slane %v2548_v27, 1  ;;  %v2523_v49 = vmul.f32 %v2521_v48, %v4646_v59 }
 0x947   :  { %v2527_v31 = vmul.f32 %v2525_v30, %v4648_v14  ;;  %v2538_v43 = vmul.f32 %v2536_v15, %v4644_v19 }
 0x948   :  { %2577 = vrot.lane.b32.xlu1 %v2576_v34, %s3295_s24  ;;  %v2552_v17 = vsub.f32 %v2545_v56, %v2550_v41 }
 0x949   :  { %v2529_v16 = vrot.slane %v2527_v31, 1  ;;  %v2540_v53 = vrot.slane %v2538_v43, 6 }
 0x94a   :  { %v2581_v2 = vrot.slane %v2552_v17, 6 }
 0x94b   :  { %v2531_v36 = vsub.f32 %v2523_v49, %v2529_v16  ;;  %v2542_v52 = vsub.f32 %v2535_v35, %v2540_v53 }
 0x94c   :  { %2582 = vrot.lane.b32.xlu0 %v2581_v2, %s3296_s25 }
 0x94d   :  { %v2558_v8 = vrot.slane %v2531_v36, 1  ;;  %v2570_v32 = vrot.slane %v2542_v52, 1 }
 0x94f   :  { %2559 = vrot.lane.b32.xlu1 %v2558_v8, %s3296_s25 }
 0x950   :  { %2571 = vrot.lane.b32.xlu0 %v2570_v32, %s3296_s25 }
 0x953   :  { %2764 = vrot.lane.b32.xlu1 %v2558_v8, %s3295_s24 }
 0x954   :  { %2769 = vrot.lane.b32.xlu0 %v4646_v59, %s3294_s11 }
 0x957   :  { %2778 = vrot.lane.b32.xlu1 %v4648_v14, %s3294_s11 }
 0x958   :  { %2773 = vrot.lane.b32.xlu0 %v2570_v32, %s3295_s24 }
 0x95c   :  { %2782 = vrot.lane.b32.xlu0 %v2581_v2, %s3295_s24 }
 0x98a   :  { %v2761_v11 = vpop.permute.xlu1 %2760 }
 0x98b   :  { %v2767_v24 = vsel %vm1941_vm3, %v2761_v11, %v2553_v25 }
 0x9b6   :  { %v2555_v58 = vpop.permute.xlu1 %2554 }
 0x9b7   :  { %v2562_v7 = vsel %vm1941_vm3, %v4644_v19, %v2555_v58 }
 0x9b8   :  { %v2567_v40 = vpop.permute.xlu0 %2566 }
 0x9b9   :  { %v2574_v62 = vsel %vm1941_vm3, %v4646_v59, %v2567_v40  ;;  %v3027_v59 = vld [vmem:[%s4764_s0 + $0x18] sm:$0x3f] }
 0x9ba   :  { %v2578_v60 = vpop.permute.xlu1 %2577 }
 0x9bb   :  { %v2585_v12 = vsel %vm1941_vm3, %v4648_v14, %v2578_v60  ;;  %v2875_v14 = vrot.slane %v3027_v59, 3 }
 0x9be   :  { %v2583_v9 = vpop.permute.xlu0 %2582 }
 0x9bf   :  { %v2586_v39 = vsel %vm2563_vm5, %v2585_v12, %v2583_v9 }
 0x9c1   :  { %v2560_v22 = vpop.permute.xlu1 %2559 }
 0x9c2   :  { %v2572_v21 = vpop.permute.xlu0 %2571  ;;  %v2564_v13 = vsel %vm2563_vm5, %v2562_v7, %v2560_v22 }
 0x9c3   :  { %v2575_v3 = vsel %vm2563_vm5, %v2574_v62, %v2572_v21 }
 0x9c4   :  { %v2588_v50 = vsel %vm2587_vm6, %v2564_v13, %v2575_v3 }
 0x9c5   :  { %v2590_v6 = vsel %vm2589_vm7, %v2588_v50, %v2586_v39  ;;  %v2765_v19 = vpop.permute.xlu1 %2764 }
 0x9c6   :  { %3022 = vmatmul.mubr.msk.f32.vlgmr.msra.gmra.mxu1 %vm2591_vm8, %v2590_v6  ;;  %v2770_v37 = vpop.permute.xlu0 %2769  ;;  %v2768_v44 = vsel %vm2563_vm5, %v2767_v24, %v2765_v19 }
 0x9c7   :  { %3024 = vmatpush1.msk.msra.mxu1 %vm300_vm0, %v2674_v20  ;;  %2744 = vmatprep.mubr.f32.mxu1 %v3292_v47  ;;  %v2776_v38 = vsel %vm1941_vm3, %v2770_v37, %v2565_v4 }
 0x9c8   :  { %3028 = vmatprep.subr.msk.mxu1 %vm300_vm0, %v3027_v59 }
 0x9c9   :  { %v2779_v57 = vpop.permute.xlu1 %2778 }
 0x9ca   :  { %3025 = vmatmul.mubr.msk.f32.vlgmr.msra.gmra.mxu1 %vm2591_vm8, %v2590_v6  ;;  %v2774_v1 = vpop.permute.xlu0 %2773  ;;  %v2785_v61 = vsel %vm1941_vm3, %v2779_v57, %v2576_v34 }
 0x9cb   :  { %3029 = vmatpush1.msk.msra.mxu1 %vm300_vm0, %v3026_v63  ;;  %2864 = vmatprep.mubr.f32.mxu1 %v3292_v47  ;;  %v2777_v29 = vsel %vm2563_vm5, %v2776_v38, %v2774_v1 }
 0x9cc   :  { %3033 = vmatprep.subr.msk.mxu1 %vm300_vm0, %v2875_v14  ;;  %v2787_v46 = vsel %vm2587_vm6, %v2768_v44, %v2777_v29 }
 0x9ce   :  { %v2783_v42 = vpop.permute.xlu0 %2782 }
 0x9cf   :  { %v2786_v45 = vsel %vm2563_vm5, %v2785_v61, %v2783_v42 }
 0x9d0   :  { %v2788_v33 = vsel %vm2589_vm7, %v2787_v46, %v2786_v45 }
 0x9d1   :  { %3030 = vmatmul.mubr.msk.f32.vlgmr.msra.gmra.mxu1 %vm2591_vm8, %v2788_v33 }
 0x9d2   :  { %3034 = vmatpush1.msk.msra.mxu1 %vm300_vm0, %v2874_v0  ;;  %2944 = vmatprep.mubr.f32.mxu1 %v3292_v47 }
 0x9d5   :  { %3035 = vmatmul.mubr.msk.f32.vlgmr.msra.gmra.mxu1 %vm2591_vm8, %v2788_v33 }
 0xa86   :  { %v2667_v55 = vpop.f32.mrf.mxu1 }
 0xa87   :  { %2672 = vst [vmem:[%s4776_s13] sm:$0x7] %v2667_v55 }
 0xa88   :  { %v2669_v28 = vpop.f32.mrf.mxu1 }
 0xa89   :  { %2673 = vst [vmem:[%s4776_s13 + $0x8] sm:$0x7] %v2669_v28 }
 0xa8a   :  { %v2746_v51 = vpop.f32.mrf.mxu1 }
 0xa8b   :  { %v2753_v23 = vrot.slane %v2746_v51, 5 }
 0xa8c   :  { %v2748_v25 = vpop.f32.mrf.mxu1 }
 0xa8d   :  { %2757 = vst [vmem:[%s4776_s13] sm:$0x38] %v2753_v23  ;;  %v2754_v47 = vrot.slane %v2748_v25, 5 }
 0xa8f   :  { %2758 = vst [vmem:[%s4776_s13 + $0x8] sm:$0x38] %v2754_v47 }
 0xa91   :  { %v2866_v54 = vpop.f32.mrf.mxu1 }
 0xa92   :  { %3031 = vst [vmem:[%s4776_s13 + $0x10] sm:$0x7] %v2866_v54 }
 0xa93   :  { %v2868_v18 = vpop.f32.mrf.mxu1 }
 0xa94   :  { %3032 = vst [vmem:[%s4776_s13 + $0x18] sm:$0x7] %v2868_v18 }
 0xa95   :  { %v2946_v26 = vpop.f32.mrf.mxu1 }
 0xa96   :  { %v2953_v4 = vrot.slane %v2946_v26, 5 }
 0xa97   :  { %v2948_v10 = vpop.f32.mrf.mxu1 }
 0xa98   :  { %3036 = vst [vmem:[%s4776_s13 + $0x10] sm:$0x38] %v2953_v4  ;;  %v2954_v27 = vrot.slane %v2948_v10, 5 }
 0xa9a   :  { %3037 = vst [vmem:[%s4776_s13 + $0x18] sm:$0x38] %v2954_v27 }

</bundles_post_ra>
